<compile_context>
chip_gen: v7x
topology: tpu7x:2x2x1
jax: 0.10.0
libtpu: 0.0.40
codegen_flags: <defaults>
</compile_context>

<pallas_src>
import functools

import jax
import jax.numpy as jnp
from jax import lax
from jax.experimental import pallas as pl
from jax.experimental.pallas import tpu as pltpu


def _round_up(x, m):
    return ((x + m - 1) // m) * m


# ----------------------------------------------------------------------------- kernel


def _bigru_kernel(x2d_ref, len_ref, w_ih_ref, w_hh_f_ref, w_hh_b_ref, bias_ref,
                  out_ref, hid_ref, gi_ref, bwd_ref, *, T, B, H):
    """Bidirectional GRU over a padded batch, both directions interleaved.

    Shapes (already padded to (8,128)-friendly sizes):
      x2d_ref    : (T*B, H)   bf16   time-major embedded input, flattened
      len_ref    : (B, 1)     int32  per-row valid length (0 for padded batch rows)
      w_ih_ref   : (H, 6H)    bf16   [w_ih_f | w_ih_b], gate blocks lane-aligned
      w_hh_*_ref : (H, 3H)    bf16
      bias_ref   : (1, 6H)    f32    [b_ih_f+b_hh_f | b_ih_b+b_hh_b]
      out_ref    : (T, B, H)  f32    fwd + bwd summed per-step outputs
      hid_ref    : (2, B, H)  f32    final hidden (fwd, bwd)
      gi_ref     : (T*B, 6H)  bf16   scratch: hoisted input projection (+ folded bias)
      bwd_ref    : (T, B, H)  f32    scratch: backward-direction per-step outputs
    """
    # ---- Hoisted input projection for BOTH directions: one big MXU matmul. ----
    gi_ref[...] = (jnp.dot(x2d_ref[...], w_ih_ref[...],
                           preferred_element_type=jnp.float32)
                   + bias_ref[...]).astype(jnp.bfloat16)

    w_hh_f = w_hh_f_ref[...]
    w_hh_b = w_hh_b_ref[...]
    lengths = len_ref[...]                          # (B, 1) int32 — one vreg mask source

    h_f = jnp.zeros((B, H), jnp.float32)
    h_b = jnp.zeros((B, H), jnp.float32)

    def gru_gates(gi, gh, h):
        r = jax.nn.sigmoid(gi[:, :H] + gh[:, :H])
        z = jax.nn.sigmoid(gi[:, H:2 * H] + gh[:, H:2 * H])
        n = jnp.tanh(gi[:, 2 * H:] + r * gh[:, 2 * H:])
        return (1.0 - z) * n + z * h

    # Static Python loop: every gi slice offset and out/bwd store row is a compile-time
    # constant (unmasked lane-dense stores, no per-step scalar address dependency).
    # TODO(synk): switch to lax.fori_loop(..., unroll=4..8) once T is production-sized.
    for s in range(T):
        t_f = s
        t_b = T - 1 - s
        gi_f = gi_ref[t_f * B:(t_f + 1) * B, :3 * H].astype(jnp.float32)
        gi_b = gi_ref[t_b * B:(t_b + 1) * B, 3 * H:].astype(jnp.float32)
        # Two independent chains — the scheduler interleaves their MXU/EUP latencies.
        gh_f = jnp.dot(h_f.astype(jnp.bfloat16), w_hh_f,
                       preferred_element_type=jnp.float32)
        gh_b = jnp.dot(h_b.astype(jnp.bfloat16), w_hh_b,
                       preferred_element_type=jnp.float32)
        hn_f = gru_gates(gi_f, gh_f, h_f)
        hn_b = gru_gates(gi_b, gh_b, h_b)
        valid_f = lengths > t_f                     # (B, 1) bool, broadcasts over lanes
        valid_b = lengths > t_b
        h_f = jnp.where(valid_f, hn_f, h_f)         # padded steps freeze the state
        h_b = jnp.where(valid_b, hn_b, h_b)
        out_ref[t_f] = jnp.where(valid_f, h_f, 0.0)   # pad_packed: zeros past length
        bwd_ref[t_b] = jnp.where(valid_b, h_b, 0.0)

    # Sum the two directions in-kernel -> single f32 output write to HBM.
    out_ref[...] = out_ref[...] + bwd_ref[...]
    hid_ref[0] = h_f
    hid_ref[1] = h_b


# ----------------------------------------------------------------------------- wrapper


def _pad_gates(a, H, Hp):
    """Pad each of the 3 gate blocks along the last axis from H to Hp columns."""
    parts = jnp.split(a, 3, axis=-1)
    widths = [(0, 0)] * (a.ndim - 1) + [(0, Hp - H)]
    return jnp.concatenate([jnp.pad(p, widths) for p in parts], axis=-1)


def _prepare_params(params, H, Hp):
    def pad_w(w):                                   # (H, 3H) -> (Hp, 3Hp)
        return jnp.pad(_pad_gates(w, H, Hp), ((0, Hp - H), (0, 0)))

    w_ih_cat = jnp.concatenate(
        [pad_w(params["w_ih_f"]), pad_w(params["w_ih_b"])], axis=-1).astype(jnp.bfloat16)
    w_hh_f = pad_w(params["w_hh_f"]).astype(jnp.bfloat16)
    w_hh_b = pad_w(params["w_hh_b"]).astype(jnp.bfloat16)
    # Folded bias: b_ih + b_hh added once in the hoisted projection.
    bias_cat = jnp.concatenate(
        [_pad_gates(params["b_ih_f"] + params["b_hh_f"], H, Hp),
         _pad_gates(params["b_ih_b"] + params["b_hh_b"], H, Hp)],
        axis=-1).astype(jnp.float32)
    return w_ih_cat, w_hh_f, w_hh_b, bias_cat


def encoder_rnn_forward(input_seq, input_lengths, embedding_table, params):
    """input_seq: (T, B) int32, input_lengths: (B,) int32 -> (outputs, hidden)."""
    T, B = input_seq.shape
    H = embedding_table.shape[1]
    Bp = _round_up(B, 8)         # sublane multiple
    Hp = _round_up(H, 128)       # lane multiple -> lane-dense stores, aligned gate slices

    # Embedding gather in the wrapper (bf16: MXU-native, half the HBM traffic); padding
    # via jnp.pad so XLA fuses gather+pad instead of materializing two copies.
    embedded = embedding_table[input_seq].astype(jnp.bfloat16)           # (T, B, H)
    x2d = jnp.pad(embedded, ((0, 0), (0, Bp - B), (0, Hp - H))).reshape(T * Bp, Hp)

    lengths2d = jnp.pad(input_lengths.astype(jnp.int32), (0, Bp - B)).reshape(Bp, 1)

    w_ih_cat, w_hh_f, w_hh_b, bias_cat = _prepare_params(params, H, Hp)

    kernel = functools.partial(_bigru_kernel, T=T, B=Bp, H=Hp)

    # VMEM budget from the actual buffer sizes (inputs + outputs + scratch) + headroom.
    vmem_bytes = (
        T * Bp * Hp * 2            # x2d (bf16)
        + Bp * 4                   # lengths
        + Hp * 6 * Hp * 2          # w_ih_cat
        + 2 * Hp * 3 * Hp * 2      # w_hh_f, w_hh_b
        + 6 * Hp * 4               # bias
        + T * Bp * Hp * 4          # out
        + 2 * Bp * Hp * 4          # hid
        + T * Bp * 6 * Hp * 2      # gi scratch (bf16)
        + T * Bp * Hp * 4)         # bwd scratch
    vmem_limit = int(min(max(2 * vmem_bytes + (8 << 20), 32 << 20), 100 << 20))

    out, hid = pl.pallas_call(
        kernel,
        out_shape=(jax.ShapeDtypeStruct((T, Bp, Hp), jnp.float32),
                   jax.ShapeDtypeStruct((2, Bp, Hp), jnp.float32)),
        scratch_shapes=[pltpu.VMEM((T * Bp, 6 * Hp), jnp.bfloat16),
                        pltpu.VMEM((T, Bp, Hp), jnp.float32)],
        compiler_params=pltpu.CompilerParams(vmem_limit_bytes=vmem_limit),
    )(x2d, lengths2d, w_ih_cat, w_hh_f, w_hh_b, bias_cat)

    outputs = out[:, :B, :H]
    hidden = hid[:, :B, :H]
    return outputs, hidden


# ----------------------------------------------------------------------------- reference


def _reference_forward(input_seq, input_lengths, embedding_table, params):
    """Pure-JAX reference mirroring the kernel numerics (bf16 MXU operands, bf16 gi
    storage, folded bias, f32 gate math / accumulation)."""
    T, B = input_seq.shape
    H = embedding_table.shape[1]
    x = embedding_table[input_seq].astype(jnp.bfloat16)                       # (T, B, H)
    valid = (jnp.arange(T)[:, None] < input_lengths[None, :])[..., None]      # (T, B, 1)

    def direction(w_ih, w_hh, b_ih, b_hh, xs, ms):
        bias = (b_ih + b_hh).astype(jnp.float32)
        gi_all = (jnp.dot(xs.reshape(T * B, H), w_ih.astype(jnp.bfloat16),
                          preferred_element_type=jnp.float32) + bias)
        gi_all = gi_all.astype(jnp.bfloat16).astype(jnp.float32).reshape(T, B, 3 * H)

        def step(h, inp):
            gi, m = inp
            gh = jnp.dot(h.astype(jnp.bfloat16), w_hh.astype(jnp.bfloat16),
                         preferred_element_type=jnp.float32)
            r = jax.nn.sigmoid(gi[:, :H] + gh[:, :H])
            z = jax.nn.sigmoid(gi[:, H:2 * H] + gh[:, H:2 * H])
            n = jnp.tanh(gi[:, 2 * H:] + r * gh[:, 2 * H:])
            h_new = (1.0 - z) * n + z * h
            h = jnp.where(m, h_new, h)
            return h, jnp.where(m, h, 0.0)

        h0 = jnp.zeros((B, H), jnp.float32)
        return lax.scan(step, h0, (gi_all, ms))

    h_f, out_f = direction(params["w_ih_f"], params["w_hh_f"],
                           params["b_ih_f"], params["b_hh_f"], x, valid)
    h_b, out_b_rev = direction(params["w_ih_b"], params["w_hh_b"],
                               params["b_ih_b"], params["b_hh_b"],
                               x[::-1], valid[::-1])
    out_b = out_b_rev[::-1]
    return out_f + out_b, jnp.stack([h_f, h_b], axis=0)


def _init_params(key, H):
    ks = jax.random.split(key, 8)
    s = 0.1
    # Stored pre-transposed: (H, 3H) so the kernel does x @ W (== x @ W_ih.T in torch).
    return {
        "w_ih_f": jax.random.normal(ks[0], (H, 3 * H), jnp.float32) * s,
        "w_hh_f": jax.random.normal(ks[1], (H, 3 * H), jnp.float32) * s,
        "b_ih_f": jax.random.normal(ks[2], (1, 3 * H), jnp.float32) * s,
        "b_hh_f": jax.random.normal(ks[3], (1, 3 * H), jnp.float32) * s,
        "w_ih_b": jax.random.normal(ks[4], (H, 3 * H), jnp.float32) * s,
        "w_hh_b": jax.random.normal(ks[5], (H, 3 * H), jnp.float32) * s,
        "b_ih_b": jax.random.normal(ks[6], (1, 3 * H), jnp.float32) * s,
        "b_hh_b": jax.random.normal(ks[7], (1, 3 * H), jnp.float32) * s,
    }


if __name__ == "__main__":
    T, B, H, VOCAB = 8, 4, 32, 20

    key = jax.random.PRNGKey(0)
    k_emb, k_tok, k_par = jax.random.split(key, 3)

    embedding_table = jax.random.normal(k_emb, (VOCAB, H), jnp.float32) * 0.1
    input_seq = jax.random.randint(k_tok, (T, B), 0, VOCAB, dtype=jnp.int32)
    # pack_padded_sequence expects lengths sorted in decreasing order
    input_lengths = jnp.array([8, 6, 5, 3], dtype=jnp.int32)
    params = _init_params(k_par, H)

    fwd = jax.jit(encoder_rnn_forward)
    outputs, hidden = fwd(input_seq, input_lengths, embedding_table, params)
    outputs = jax.block_until_ready(outputs)
    hidden = jax.block_until_ready(hidden)

    ref_out, ref_hid = _reference_forward(input_seq, input_lengths, embedding_table, params)
    assert outputs.shape == (T, B, H)
    assert hidden.shape == (2, B, H)
    assert jnp.allclose(outputs, ref_out, atol=2e-3, rtol=2e-3)
    assert jnp.allclose(hidden, ref_hid, atol=2e-3, rtol=2e-3)

    print("KERNEL_OK")
</pallas_src>

<mosaic_0001>
module attributes {stable_mosaic.version = 11 : i64} {
  func.func @_bigru_kernel(%arg0: memref<64x128xbf16, #tpu.memory_space<vmem>>, %arg1: memref<8x1xi32, #tpu.memory_space<vmem>>, %arg2: memref<128x768xbf16, #tpu.memory_space<vmem>>, %arg3: memref<128x384xbf16, #tpu.memory_space<vmem>>, %arg4: memref<128x384xbf16, #tpu.memory_space<vmem>>, %arg5: memref<1x768xf32, #tpu.memory_space<vmem>>, %arg6: memref<8x8x128xf32, #tpu.memory_space<vmem>>, %arg7: memref<2x8x128xf32, #tpu.memory_space<vmem>>, %arg8: memref<64x768xbf16, #tpu.memory_space<vmem>>, %arg9: memref<8x8x128xf32, #tpu.memory_space<vmem>>) attributes {dimension_semantics = [], scalar_prefetch = 0 : i64, scratch_operands = 2 : i64, tpu.core_type = #tpu.core_type<tc>} {
    %c0 = arith.constant 0 : index
    %c0_0 = arith.constant 0 : index
    %0 = vector.load %arg0[%c0, %c0_0] : memref<64x128xbf16, #tpu.memory_space<vmem>>, vector<64x128xbf16>
    %c0_1 = arith.constant 0 : index
    %c0_2 = arith.constant 0 : index
    %1 = vector.load %arg2[%c0_1, %c0_2] : memref<128x768xbf16, #tpu.memory_space<vmem>>, vector<128x768xbf16>
    %cst = arith.constant dense<0.000000e+00> : vector<64x768xf32>
    %2 = tpu.matmul %0, %1, %cst {dimension_numbers = #tpu.dot_dimension_numbers<[1], [0], [0], [1], [0, 0, 1, 1], [], []>} : vector<64x128xbf16>, vector<128x768xbf16>, vector<64x768xf32> -> vector<64x768xf32>
    %c0_3 = arith.constant 0 : index
    %c0_4 = arith.constant 0 : index
    %3 = vector.load %arg5[%c0_3, %c0_4] : memref<1x768xf32, #tpu.memory_space<vmem>>, vector<1x768xf32>
    %4 = vector.broadcast %3 : vector<1x768xf32> to vector<64x768xf32>
    %5 = arith.addf %2, %4 : vector<64x768xf32>
    %6 = arith.truncf %5 : vector<64x768xf32> to vector<64x768xbf16>
    %c0_5 = arith.constant 0 : index
    %c0_6 = arith.constant 0 : index
    %7 = vector.load %arg8[%c0_5, %c0_6] : memref<64x768xbf16, #tpu.memory_space<vmem>>, vector<64x768xbf16>
    tpu.vector_store %arg8[%c0_5, %c0_6], %6 {strides = array<i32>} : memref<64x768xbf16, #tpu.memory_space<vmem>>, vector<64x768xbf16>,
    %c0_7 = arith.constant 0 : index
    %c0_8 = arith.constant 0 : index
    %8 = vector.load %arg3[%c0_7, %c0_8] : memref<128x384xbf16, #tpu.memory_space<vmem>>, vector<128x384xbf16>
    %c0_9 = arith.constant 0 : index
    %c0_10 = arith.constant 0 : index
    %9 = vector.load %arg4[%c0_9, %c0_10] : memref<128x384xbf16, #tpu.memory_space<vmem>>, vector<128x384xbf16>
    %c0_11 = arith.constant 0 : index
    %c0_12 = arith.constant 0 : index
    %10 = vector.load %arg1[%c0_11, %c0_12] : memref<8x1xi32, #tpu.memory_space<vmem>>, vector<8x1xi32>
    %cst_13 = arith.constant 0.000000e+00 : f32
    %11 = vector.broadcast %cst_13 : f32 to vector<8x128xf32>
    %cst_14 = arith.constant 0.000000e+00 : f32
    %12 = vector.broadcast %cst_14 : f32 to vector<8x128xf32>
    %c0_15 = arith.constant 0 : index
    %c0_16 = arith.constant 0 : index
    %13 = vector.load %arg8[%c0_15, %c0_16] : memref<64x768xbf16, #tpu.memory_space<vmem>>, vector<8x384xbf16>
    %14 = arith.extf %13 : vector<8x384xbf16> to vector<8x384xf32>
    %c56 = arith.constant 56 : index
    %c384 = arith.constant 384 : index
    %15 = vector.load %arg8[%c56, %c384] : memref<64x768xbf16, #tpu.memory_space<vmem>>, vector<8x384xbf16>
    %16 = arith.extf %15 : vector<8x384xbf16> to vector<8x384xf32>
    %17 = arith.truncf %11 : vector<8x128xf32> to vector<8x128xbf16>
    %cst_17 = arith.constant dense<0.000000e+00> : vector<8x384xf32>
    %18 = tpu.matmul %17, %8, %cst_17 {dimension_numbers = #tpu.dot_dimension_numbers<[1], [0], [0], [1], [0, 0, 1, 1], [], []>} : vector<8x128xbf16>, vector<128x384xbf16>, vector<8x384xf32> -> vector<8x384xf32>
    %19 = arith.truncf %12 : vector<8x128xf32> to vector<8x128xbf16>
    %cst_18 = arith.constant dense<0.000000e+00> : vector<8x384xf32>
    %20 = tpu.matmul %19, %9, %cst_18 {dimension_numbers = #tpu.dot_dimension_numbers<[1], [0], [0], [1], [0, 0, 1, 1], [], []>} : vector<8x128xbf16>, vector<128x384xbf16>, vector<8x384xf32> -> vector<8x384xf32>
    %21 = vector.extract_strided_slice %14 {offsets = [0, 0], sizes = [8, 128], strides = [1, 1]} : vector<8x384xf32> to vector<8x128xf32>
    %22 = vector.extract_strided_slice %18 {offsets = [0, 0], sizes = [8, 128], strides = [1, 1]} : vector<8x384xf32> to vector<8x128xf32>
    %23 = arith.addf %21, %22 : vector<8x128xf32>
    %24 = arith.negf %23 : vector<8x128xf32>
    %25 = math.exp %24 : vector<8x128xf32>
    %cst_19 = arith.constant 1.000000e+00 : f32
    %26 = vector.broadcast %cst_19 : f32 to vector<8x128xf32>
    %27 = arith.addf %26, %25 : vector<8x128xf32>
    %28 = arith.divf %26, %27 : vector<8x128xf32>
    %29 = vector.extract_strided_slice %14 {offsets = [0, 128], sizes = [8, 128], strides = [1, 1]} : vector<8x384xf32> to vector<8x128xf32>
    %30 = vector.extract_strided_slice %18 {offsets = [0, 128], sizes = [8, 128], strides = [1, 1]} : vector<8x384xf32> to vector<8x128xf32>
    %31 = arith.addf %29, %30 : vector<8x128xf32>
    %32 = arith.negf %31 : vector<8x128xf32>
    %33 = math.exp %32 : vector<8x128xf32>
    %cst_20 = arith.constant 1.000000e+00 : f32
    %34 = vector.broadcast %cst_20 : f32 to vector<8x128xf32>
    %35 = arith.addf %34, %33 : vector<8x128xf32>
    %36 = arith.divf %34, %35 : vector<8x128xf32>
    %37 = vector.extract_strided_slice %14 {offsets = [0, 256], sizes = [8, 128], strides = [1, 1]} : vector<8x384xf32> to vector<8x128xf32>
    %38 = vector.extract_strided_slice %18 {offsets = [0, 256], sizes = [8, 128], strides = [1, 1]} : vector<8x384xf32> to vector<8x128xf32>
    %39 = arith.mulf %28, %38 : vector<8x128xf32>
    %40 = arith.addf %37, %39 : vector<8x128xf32>
    %41 = math.tanh %40 : vector<8x128xf32>
    %cst_21 = arith.constant 1.000000e+00 : f32
    %42 = vector.broadcast %cst_21 : f32 to vector<8x128xf32>
    %43 = arith.subf %42, %36 : vector<8x128xf32>
    %44 = arith.mulf %43, %41 : vector<8x128xf32>
    %45 = arith.mulf %36, %11 : vector<8x128xf32>
    %46 = arith.addf %44, %45 : vector<8x128xf32>
    %47 = vector.extract_strided_slice %16 {offsets = [0, 0], sizes = [8, 128], strides = [1, 1]} : vector<8x384xf32> to vector<8x128xf32>
    %48 = vector.extract_strided_slice %20 {offsets = [0, 0], sizes = [8, 128], strides = [1, 1]} : vector<8x384xf32> to vector<8x128xf32>
    %49 = arith.addf %47, %48 : vector<8x128xf32>
    %50 = arith.negf %49 : vector<8x128xf32>
    %51 = math.exp %50 : vector<8x128xf32>
    %cst_22 = arith.constant 1.000000e+00 : f32
    %52 = vector.broadcast %cst_22 : f32 to vector<8x128xf32>
    %53 = arith.addf %52, %51 : vector<8x128xf32>
    %54 = arith.divf %52, %53 : vector<8x128xf32>
    %55 = vector.extract_strided_slice %16 {offsets = [0, 128], sizes = [8, 128], strides = [1, 1]} : vector<8x384xf32> to vector<8x128xf32>
    %56 = vector.extract_strided_slice %20 {offsets = [0, 128], sizes = [8, 128], strides = [1, 1]} : vector<8x384xf32> to vector<8x128xf32>
    %57 = arith.addf %55, %56 : vector<8x128xf32>
    %58 = arith.negf %57 : vector<8x128xf32>
    %59 = math.exp %58 : vector<8x128xf32>
    %cst_23 = arith.constant 1.000000e+00 : f32
    %60 = vector.broadcast %cst_23 : f32 to vector<8x128xf32>
    %61 = arith.addf %60, %59 : vector<8x128xf32>
    %62 = arith.divf %60, %61 : vector<8x128xf32>
    %63 = vector.extract_strided_slice %16 {offsets = [0, 256], sizes = [8, 128], strides = [1, 1]} : vector<8x384xf32> to vector<8x128xf32>
    %64 = vector.extract_strided_slice %20 {offsets = [0, 256], sizes = [8, 128], strides = [1, 1]} : vector<8x384xf32> to vector<8x128xf32>
    %65 = arith.mulf %54, %64 : vector<8x128xf32>
    %66 = arith.addf %63, %65 : vector<8x128xf32>
    %67 = math.tanh %66 : vector<8x128xf32>
    %cst_24 = arith.constant 1.000000e+00 : f32
    %68 = vector.broadcast %cst_24 : f32 to vector<8x128xf32>
    %69 = arith.subf %68, %62 : vector<8x128xf32>
    %70 = arith.mulf %69, %67 : vector<8x128xf32>
    %71 = arith.mulf %62, %12 : vector<8x128xf32>
    %72 = arith.addf %70, %71 : vector<8x128xf32>
    %c0_i32 = arith.constant 0 : i32
    %73 = vector.broadcast %c0_i32 : i32 to vector<8x1xi32>
    %74 = arith.cmpi sgt, %10, %73 : vector<8x1xi32>
    %c7_i32 = arith.constant 7 : i32
    %75 = vector.broadcast %c7_i32 : i32 to vector<8x1xi32>
    %76 = arith.cmpi sgt, %10, %75 : vector<8x1xi32>
    %77 = vector.shape_cast %74 : vector<8x1xi1> to vector<8x1xi1>
    %78 = vector.broadcast %77 : vector<8x1xi1> to vector<8x128xi1>
    %79 = arith.select %78, %46, %11 : vector<8x128xi1>, vector<8x128xf32>
    %80 = vector.shape_cast %76 : vector<8x1xi1> to vector<8x1xi1>
    %81 = vector.broadcast %80 : vector<8x1xi1> to vector<8x128xi1>
    %82 = arith.select %81, %72, %12 : vector<8x128xi1>, vector<8x128xf32>
    %cst_25 = arith.constant 0.000000e+00 : f32
    %83 = vector.shape_cast %74 : vector<8x1xi1> to vector<8x1xi1>
    %84 = vector.broadcast %83 : vector<8x1xi1> to vector<8x128xi1>
    %85 = vector.broadcast %cst_25 : f32 to vector<8x128xf32>
    %86 = arith.select %84, %79, %85 : vector<8x128xi1>, vector<8x128xf32>
    %c0_26 = arith.constant 0 : index
    %c0_27 = arith.constant 0 : index
    %c0_28 = arith.constant 0 : index
    %87 = vector.load %arg6[%c0_26, %c0_27, %c0_28] : memref<8x8x128xf32, #tpu.memory_space<vmem>>, vector<1x8x128xf32>
    %88 = vector.shape_cast %87 : vector<1x8x128xf32> to vector<8x128xf32>
    %89 = vector.shape_cast %86 : vector<8x128xf32> to vector<1x8x128xf32>
    tpu.vector_store %arg6[%c0_26, %c0_27, %c0_28], %89 {strides = array<i32>} : memref<8x8x128xf32, #tpu.memory_space<vmem>>, vector<1x8x128xf32>,
    %cst_29 = arith.constant 0.000000e+00 : f32
    %90 = vector.shape_cast %76 : vector<8x1xi1> to vector<8x1xi1>
    %91 = vector.broadcast %90 : vector<8x1xi1> to vector<8x128xi1>
    %92 = vector.broadcast %cst_29 : f32 to vector<8x128xf32>
    %93 = arith.select %91, %82, %92 : vector<8x128xi1>, vector<8x128xf32>
    %c7 = arith.constant 7 : index
    %c0_30 = arith.constant 0 : index
    %c0_31 = arith.constant 0 : index
    %94 = vector.load %arg9[%c7, %c0_30, %c0_31] : memref<8x8x128xf32, #tpu.memory_space<vmem>>, vector<1x8x128xf32>
    %95 = vector.shape_cast %94 : vector<1x8x128xf32> to vector<8x128xf32>
    %96 = vector.shape_cast %93 : vector<8x128xf32> to vector<1x8x128xf32>
    tpu.vector_store %arg9[%c7, %c0_30, %c0_31], %96 {strides = array<i32>} : memref<8x8x128xf32, #tpu.memory_space<vmem>>, vector<1x8x128xf32>,
    %c8 = arith.constant 8 : index
    %c0_32 = arith.constant 0 : index
    %97 = vector.load %arg8[%c8, %c0_32] : memref<64x768xbf16, #tpu.memory_space<vmem>>, vector<8x384xbf16>
    %98 = arith.extf %97 : vector<8x384xbf16> to vector<8x384xf32>
    %c48 = arith.constant 48 : index
    %c384_33 = arith.constant 384 : index
    %99 = vector.load %arg8[%c48, %c384_33] : memref<64x768xbf16, #tpu.memory_space<vmem>>, vector<8x384xbf16>
    %100 = arith.extf %99 : vector<8x384xbf16> to vector<8x384xf32>
    %101 = arith.truncf %79 : vector<8x128xf32> to vector<8x128xbf16>
    %cst_34 = arith.constant dense<0.000000e+00> : vector<8x384xf32>
    %102 = tpu.matmul %101, %8, %cst_34 {dimension_numbers = #tpu.dot_dimension_numbers<[1], [0], [0], [1], [0, 0, 1, 1], [], []>} : vector<8x128xbf16>, vector<128x384xbf16>, vector<8x384xf32> -> vector<8x384xf32>
    %103 = arith.truncf %82 : vector<8x128xf32> to vector<8x128xbf16>
    %cst_35 = arith.constant dense<0.000000e+00> : vector<8x384xf32>
    %104 = tpu.matmul %103, %9, %cst_35 {dimension_numbers = #tpu.dot_dimension_numbers<[1], [0], [0], [1], [0, 0, 1, 1], [], []>} : vector<8x128xbf16>, vector<128x384xbf16>, vector<8x384xf32> -> vector<8x384xf32>
    %105 = vector.extract_strided_slice %98 {offsets = [0, 0], sizes = [8, 128], strides = [1, 1]} : vector<8x384xf32> to vector<8x128xf32>
    %106 = vector.extract_strided_slice %102 {offsets = [0, 0], sizes = [8, 128], strides = [1, 1]} : vector<8x384xf32> to vector<8x128xf32>
    %107 = arith.addf %105, %106 : vector<8x128xf32>
    %108 = arith.negf %107 : vector<8x128xf32>
    %109 = math.exp %108 : vector<8x128xf32>
    %cst_36 = arith.constant 1.000000e+00 : f32
    %110 = vector.broadcast %cst_36 : f32 to vector<8x128xf32>
    %111 = arith.addf %110, %109 : vector<8x128xf32>
    %112 = arith.divf %110, %111 : vector<8x128xf32>
    %113 = vector.extract_strided_slice %98 {offsets = [0, 128], sizes = [8, 128], strides = [1, 1]} : vector<8x384xf32> to vector<8x128xf32>
    %114 = vector.extract_strided_slice %102 {offsets = [0, 128], sizes = [8, 128], strides = [1, 1]} : vector<8x384xf32> to vector<8x128xf32>
    %115 = arith.addf %113, %114 : vector<8x128xf32>
    %116 = arith.negf %115 : vector<8x128xf32>
    %117 = math.exp %116 : vector<8x128xf32>
    %cst_37 = arith.constant 1.000000e+00 : f32
    %118 = vector.broadcast %cst_37 : f32 to vector<8x128xf32>
    %119 = arith.addf %118, %117 : vector<8x128xf32>
    %120 = arith.divf %118, %119 : vector<8x128xf32>
    %121 = vector.extract_strided_slice %98 {offsets = [0, 256], sizes = [8, 128], strides = [1, 1]} : vector<8x384xf32> to vector<8x128xf32>
    %122 = vector.extract_strided_slice %102 {offsets = [0, 256], sizes = [8, 128], strides = [1, 1]} : vector<8x384xf32> to vector<8x128xf32>
    %123 = arith.mulf %112, %122 : vector<8x128xf32>
    %124 = arith.addf %121, %123 : vector<8x128xf32>
    %125 = math.tanh %124 : vector<8x128xf32>
    %cst_38 = arith.constant 1.000000e+00 : f32
    %126 = vector.broadcast %cst_38 : f32 to vector<8x128xf32>
    %127 = arith.subf %126, %120 : vector<8x128xf32>
    %128 = arith.mulf %127, %125 : vector<8x128xf32>
    %129 = arith.mulf %120, %79 : vector<8x128xf32>
    %130 = arith.addf %128, %129 : vector<8x128xf32>
    %131 = vector.extract_strided_slice %100 {offsets = [0, 0], sizes = [8, 128], strides = [1, 1]} : vector<8x384xf32> to vector<8x128xf32>
    %132 = vector.extract_strided_slice %104 {offsets = [0, 0], sizes = [8, 128], strides = [1, 1]} : vector<8x384xf32> to vector<8x128xf32>
    %133 = arith.addf %131, %132 : vector<8x128xf32>
    %134 = arith.negf %133 : vector<8x128xf32>
    %135 = math.exp %134 : vector<8x128xf32>
    %cst_39 = arith.constant 1.000000e+00 : f32
    %136 = vector.broadcast %cst_39 : f32 to vector<8x128xf32>
    %137 = arith.addf %136, %135 : vector<8x128xf32>
    %138 = arith.divf %136, %137 : vector<8x128xf32>
    %139 = vector.extract_strided_slice %100 {offsets = [0, 128], sizes = [8, 128], strides = [1, 1]} : vector<8x384xf32> to vector<8x128xf32>
    %140 = vector.extract_strided_slice %104 {offsets = [0, 128], sizes = [8, 128], strides = [1, 1]} : vector<8x384xf32> to vector<8x128xf32>
    %141 = arith.addf %139, %140 : vector<8x128xf32>
    %142 = arith.negf %141 : vector<8x128xf32>
    %143 = math.exp %142 : vector<8x128xf32>
    %cst_40 = arith.constant 1.000000e+00 : f32
    %144 = vector.broadcast %cst_40 : f32 to vector<8x128xf32>
    %145 = arith.addf %144, %143 : vector<8x128xf32>
    %146 = arith.divf %144, %145 : vector<8x128xf32>
    %147 = vector.extract_strided_slice %100 {offsets = [0, 256], sizes = [8, 128], strides = [1, 1]} : vector<8x384xf32> to vector<8x128xf32>
    %148 = vector.extract_strided_slice %104 {offsets = [0, 256], sizes = [8, 128], strides = [1, 1]} : vector<8x384xf32> to vector<8x128xf32>
    %149 = arith.mulf %138, %148 : vector<8x128xf32>
    %150 = arith.addf %147, %149 : vector<8x128xf32>
    %151 = math.tanh %150 : vector<8x128xf32>
    %cst_41 = arith.constant 1.000000e+00 : f32
    %152 = vector.broadcast %cst_41 : f32 to vector<8x128xf32>
    %153 = arith.subf %152, %146 : vector<8x128xf32>
    %154 = arith.mulf %153, %151 : vector<8x128xf32>
    %155 = arith.mulf %146, %82 : vector<8x128xf32>
    %156 = arith.addf %154, %155 : vector<8x128xf32>
    %c1_i32 = arith.constant 1 : i32
    %157 = vector.broadcast %c1_i32 : i32 to vector<8x1xi32>
    %158 = arith.cmpi sgt, %10, %157 : vector<8x1xi32>
    %c6_i32 = arith.constant 6 : i32
    %159 = vector.broadcast %c6_i32 : i32 to vector<8x1xi32>
    %160 = arith.cmpi sgt, %10, %159 : vector<8x1xi32>
    %161 = vector.shape_cast %158 : vector<8x1xi1> to vector<8x1xi1>
    %162 = vector.broadcast %161 : vector<8x1xi1> to vector<8x128xi1>
    %163 = arith.select %162, %130, %79 : vector<8x128xi1>, vector<8x128xf32>
    %164 = vector.shape_cast %160 : vector<8x1xi1> to vector<8x1xi1>
    %165 = vector.broadcast %164 : vector<8x1xi1> to vector<8x128xi1>
    %166 = arith.select %165, %156, %82 : vector<8x128xi1>, vector<8x128xf32>
    %cst_42 = arith.constant 0.000000e+00 : f32
    %167 = vector.shape_cast %158 : vector<8x1xi1> to vector<8x1xi1>
    %168 = vector.broadcast %167 : vector<8x1xi1> to vector<8x128xi1>
    %169 = vector.broadcast %cst_42 : f32 to vector<8x128xf32>
    %170 = arith.select %168, %163, %169 : vector<8x128xi1>, vector<8x128xf32>
    %c1 = arith.constant 1 : index
    %c0_43 = arith.constant 0 : index
    %c0_44 = arith.constant 0 : index
    %171 = vector.load %arg6[%c1, %c0_43, %c0_44] : memref<8x8x128xf32, #tpu.memory_space<vmem>>, vector<1x8x128xf32>
    %172 = vector.shape_cast %171 : vector<1x8x128xf32> to vector<8x128xf32>
    %173 = vector.shape_cast %170 : vector<8x128xf32> to vector<1x8x128xf32>
    tpu.vector_store %arg6[%c1, %c0_43, %c0_44], %173 {strides = array<i32>} : memref<8x8x128xf32, #tpu.memory_space<vmem>>, vector<1x8x128xf32>,
    %cst_45 = arith.constant 0.000000e+00 : f32
    %174 = vector.shape_cast %160 : vector<8x1xi1> to vector<8x1xi1>
    %175 = vector.broadcast %174 : vector<8x1xi1> to vector<8x128xi1>
    %176 = vector.broadcast %cst_45 : f32 to vector<8x128xf32>
    %177 = arith.select %175, %166, %176 : vector<8x128xi1>, vector<8x128xf32>
    %c6 = arith.constant 6 : index
    %c0_46 = arith.constant 0 : index
    %c0_47 = arith.constant 0 : index
    %178 = vector.load %arg9[%c6, %c0_46, %c0_47] : memref<8x8x128xf32, #tpu.memory_space<vmem>>, vector<1x8x128xf32>
    %179 = vector.shape_cast %178 : vector<1x8x128xf32> to vector<8x128xf32>
    %180 = vector.shape_cast %177 : vector<8x128xf32> to vector<1x8x128xf32>
    tpu.vector_store %arg9[%c6, %c0_46, %c0_47], %180 {strides = array<i32>} : memref<8x8x128xf32, #tpu.memory_space<vmem>>, vector<1x8x128xf32>,
    %c16 = arith.constant 16 : index
    %c0_48 = arith.constant 0 : index
    %181 = vector.load %arg8[%c16, %c0_48] : memref<64x768xbf16, #tpu.memory_space<vmem>>, vector<8x384xbf16>
    %182 = arith.extf %181 : vector<8x384xbf16> to vector<8x384xf32>
    %c40 = arith.constant 40 : index
    %c384_49 = arith.constant 384 : index
    %183 = vector.load %arg8[%c40, %c384_49] : memref<64x768xbf16, #tpu.memory_space<vmem>>, vector<8x384xbf16>
    %184 = arith.extf %183 : vector<8x384xbf16> to vector<8x384xf32>
    %185 = arith.truncf %163 : vector<8x128xf32> to vector<8x128xbf16>
    %cst_50 = arith.constant dense<0.000000e+00> : vector<8x384xf32>
    %186 = tpu.matmul %185, %8, %cst_50 {dimension_numbers = #tpu.dot_dimension_numbers<[1], [0], [0], [1], [0, 0, 1, 1], [], []>} : vector<8x128xbf16>, vector<128x384xbf16>, vector<8x384xf32> -> vector<8x384xf32>
    %187 = arith.truncf %166 : vector<8x128xf32> to vector<8x128xbf16>
    %cst_51 = arith.constant dense<0.000000e+00> : vector<8x384xf32>
    %188 = tpu.matmul %187, %9, %cst_51 {dimension_numbers = #tpu.dot_dimension_numbers<[1], [0], [0], [1], [0, 0, 1, 1], [], []>} : vector<8x128xbf16>, vector<128x384xbf16>, vector<8x384xf32> -> vector<8x384xf32>
    %189 = vector.extract_strided_slice %182 {offsets = [0, 0], sizes = [8, 128], strides = [1, 1]} : vector<8x384xf32> to vector<8x128xf32>
    %190 = vector.extract_strided_slice %186 {offsets = [0, 0], sizes = [8, 128], strides = [1, 1]} : vector<8x384xf32> to vector<8x128xf32>
    %191 = arith.addf %189, %190 : vector<8x128xf32>
    %192 = arith.negf %191 : vector<8x128xf32>
    %193 = math.exp %192 : vector<8x128xf32>
    %cst_52 = arith.constant 1.000000e+00 : f32
    %194 = vector.broadcast %cst_52 : f32 to vector<8x128xf32>
    %195 = arith.addf %194, %193 : vector<8x128xf32>
    %196 = arith.divf %194, %195 : vector<8x128xf32>
    %197 = vector.extract_strided_slice %182 {offsets = [0, 128], sizes = [8, 128], strides = [1, 1]} : vector<8x384xf32> to vector<8x128xf32>
    %198 = vector.extract_strided_slice %186 {offsets = [0, 128], sizes = [8, 128], strides = [1, 1]} : vector<8x384xf32> to vector<8x128xf32>
    %199 = arith.addf %197, %198 : vector<8x128xf32>
    %200 = arith.negf %199 : vector<8x128xf32>
    %201 = math.exp %200 : vector<8x128xf32>
    %cst_53 = arith.constant 1.000000e+00 : f32
    %202 = vector.broadcast %cst_53 : f32 to vector<8x128xf32>
    %203 = arith.addf %202, %201 : vector<8x128xf32>
    %204 = arith.divf %202, %203 : vector<8x128xf32>
    %205 = vector.extract_strided_slice %182 {offsets = [0, 256], sizes = [8, 128], strides = [1, 1]} : vector<8x384xf32> to vector<8x128xf32>
    %206 = vector.extract_strided_slice %186 {offsets = [0, 256], sizes = [8, 128], strides = [1, 1]} : vector<8x384xf32> to vector<8x128xf32>
    %207 = arith.mulf %196, %206 : vector<8x128xf32>
    %208 = arith.addf %205, %207 : vector<8x128xf32>
    %209 = math.tanh %208 : vector<8x128xf32>
    %cst_54 = arith.constant 1.000000e+00 : f32
    %210 = vector.broadcast %cst_54 : f32 to vector<8x128xf32>
    %211 = arith.subf %210, %204 : vector<8x128xf32>
    %212 = arith.mulf %211, %209 : vector<8x128xf32>
    %213 = arith.mulf %204, %163 : vector<8x128xf32>
    %214 = arith.addf %212, %213 : vector<8x128xf32>
    %215 = vector.extract_strided_slice %184 {offsets = [0, 0], sizes = [8, 128], strides = [1, 1]} : vector<8x384xf32> to vector<8x128xf32>
    %216 = vector.extract_strided_slice %188 {offsets = [0, 0], sizes = [8, 128], strides = [1, 1]} : vector<8x384xf32> to vector<8x128xf32>
    %217 = arith.addf %215, %216 : vector<8x128xf32>
    %218 = arith.negf %217 : vector<8x128xf32>
    %219 = math.exp %218 : vector<8x128xf32>
    %cst_55 = arith.constant 1.000000e+00 : f32
    %220 = vector.broadcast %cst_55 : f32 to vector<8x128xf32>
    %221 = arith.addf %220, %219 : vector<8x128xf32>
    %222 = arith.divf %220, %221 : vector<8x128xf32>
    %223 = vector.extract_strided_slice %184 {offsets = [0, 128], sizes = [8, 128], strides = [1, 1]} : vector<8x384xf32> to vector<8x128xf32>
    %224 = vector.extract_strided_slice %188 {offsets = [0, 128], sizes = [8, 128], strides = [1, 1]} : vector<8x384xf32> to vector<8x128xf32>
    %225 = arith.addf %223, %224 : vector<8x128xf32>
    %226 = arith.negf %225 : vector<8x128xf32>
    %227 = math.exp %226 : vector<8x128xf32>
    %cst_56 = arith.constant 1.000000e+00 : f32
    %228 = vector.broadcast %cst_56 : f32 to vector<8x128xf32>
    %229 = arith.addf %228, %227 : vector<8x128xf32>
    %230 = arith.divf %228, %229 : vector<8x128xf32>
    %231 = vector.extract_strided_slice %184 {offsets = [0, 256], sizes = [8, 128], strides = [1, 1]} : vector<8x384xf32> to vector<8x128xf32>
    %232 = vector.extract_strided_slice %188 {offsets = [0, 256], sizes = [8, 128], strides = [1, 1]} : vector<8x384xf32> to vector<8x128xf32>
    %233 = arith.mulf %222, %232 : vector<8x128xf32>
    %234 = arith.addf %231, %233 : vector<8x128xf32>
    %235 = math.tanh %234 : vector<8x128xf32>
    %cst_57 = arith.constant 1.000000e+00 : f32
    %236 = vector.broadcast %cst_57 : f32 to vector<8x128xf32>
    %237 = arith.subf %236, %230 : vector<8x128xf32>
    %238 = arith.mulf %237, %235 : vector<8x128xf32>
    %239 = arith.mulf %230, %166 : vector<8x128xf32>
    %240 = arith.addf %238, %239 : vector<8x128xf32>
    %c2_i32 = arith.constant 2 : i32
    %241 = vector.broadcast %c2_i32 : i32 to vector<8x1xi32>
    %242 = arith.cmpi sgt, %10, %241 : vector<8x1xi32>
    %c5_i32 = arith.constant 5 : i32
    %243 = vector.broadcast %c5_i32 : i32 to vector<8x1xi32>
    %244 = arith.cmpi sgt, %10, %243 : vector<8x1xi32>
    %245 = vector.shape_cast %242 : vector<8x1xi1> to vector<8x1xi1>
    %246 = vector.broadcast %245 : vector<8x1xi1> to vector<8x128xi1>
    %247 = arith.select %246, %214, %163 : vector<8x128xi1>, vector<8x128xf32>
    %248 = vector.shape_cast %244 : vector<8x1xi1> to vector<8x1xi1>
    %249 = vector.broadcast %248 : vector<8x1xi1> to vector<8x128xi1>
    %250 = arith.select %249, %240, %166 : vector<8x128xi1>, vector<8x128xf32>
    %cst_58 = arith.constant 0.000000e+00 : f32
    %251 = vector.shape_cast %242 : vector<8x1xi1> to vector<8x1xi1>
    %252 = vector.broadcast %251 : vector<8x1xi1> to vector<8x128xi1>
    %253 = vector.broadcast %cst_58 : f32 to vector<8x128xf32>
    %254 = arith.select %252, %247, %253 : vector<8x128xi1>, vector<8x128xf32>
    %c2 = arith.constant 2 : index
    %c0_59 = arith.constant 0 : index
    %c0_60 = arith.constant 0 : index
    %255 = vector.load %arg6[%c2, %c0_59, %c0_60] : memref<8x8x128xf32, #tpu.memory_space<vmem>>, vector<1x8x128xf32>
    %256 = vector.shape_cast %255 : vector<1x8x128xf32> to vector<8x128xf32>
    %257 = vector.shape_cast %254 : vector<8x128xf32> to vector<1x8x128xf32>
    tpu.vector_store %arg6[%c2, %c0_59, %c0_60], %257 {strides = array<i32>} : memref<8x8x128xf32, #tpu.memory_space<vmem>>, vector<1x8x128xf32>,
    %cst_61 = arith.constant 0.000000e+00 : f32
    %258 = vector.shape_cast %244 : vector<8x1xi1> to vector<8x1xi1>
    %259 = vector.broadcast %258 : vector<8x1xi1> to vector<8x128xi1>
    %260 = vector.broadcast %cst_61 : f32 to vector<8x128xf32>
    %261 = arith.select %259, %250, %260 : vector<8x128xi1>, vector<8x128xf32>
    %c5 = arith.constant 5 : index
    %c0_62 = arith.constant 0 : index
    %c0_63 = arith.constant 0 : index
    %262 = vector.load %arg9[%c5, %c0_62, %c0_63] : memref<8x8x128xf32, #tpu.memory_space<vmem>>, vector<1x8x128xf32>
    %263 = vector.shape_cast %262 : vector<1x8x128xf32> to vector<8x128xf32>
    %264 = vector.shape_cast %261 : vector<8x128xf32> to vector<1x8x128xf32>
    tpu.vector_store %arg9[%c5, %c0_62, %c0_63], %264 {strides = array<i32>} : memref<8x8x128xf32, #tpu.memory_space<vmem>>, vector<1x8x128xf32>,
    %c24 = arith.constant 24 : index
    %c0_64 = arith.constant 0 : index
    %265 = vector.load %arg8[%c24, %c0_64] : memref<64x768xbf16, #tpu.memory_space<vmem>>, vector<8x384xbf16>
    %266 = arith.extf %265 : vector<8x384xbf16> to vector<8x384xf32>
    %c32 = arith.constant 32 : index
    %c384_65 = arith.constant 384 : index
    %267 = vector.load %arg8[%c32, %c384_65] : memref<64x768xbf16, #tpu.memory_space<vmem>>, vector<8x384xbf16>
    %268 = arith.extf %267 : vector<8x384xbf16> to vector<8x384xf32>
    %269 = arith.truncf %247 : vector<8x128xf32> to vector<8x128xbf16>
    %cst_66 = arith.constant dense<0.000000e+00> : vector<8x384xf32>
    %270 = tpu.matmul %269, %8, %cst_66 {dimension_numbers = #tpu.dot_dimension_numbers<[1], [0], [0], [1], [0, 0, 1, 1], [], []>} : vector<8x128xbf16>, vector<128x384xbf16>, vector<8x384xf32> -> vector<8x384xf32>
    %271 = arith.truncf %250 : vector<8x128xf32> to vector<8x128xbf16>
    %cst_67 = arith.constant dense<0.000000e+00> : vector<8x384xf32>
    %272 = tpu.matmul %271, %9, %cst_67 {dimension_numbers = #tpu.dot_dimension_numbers<[1], [0], [0], [1], [0, 0, 1, 1], [], []>} : vector<8x128xbf16>, vector<128x384xbf16>, vector<8x384xf32> -> vector<8x384xf32>
    %273 = vector.extract_strided_slice %266 {offsets = [0, 0], sizes = [8, 128], strides = [1, 1]} : vector<8x384xf32> to vector<8x128xf32>
    %274 = vector.extract_strided_slice %270 {offsets = [0, 0], sizes = [8, 128], strides = [1, 1]} : vector<8x384xf32> to vector<8x128xf32>
    %275 = arith.addf %273, %274 : vector<8x128xf32>
    %276 = arith.negf %275 : vector<8x128xf32>
    %277 = math.exp %276 : vector<8x128xf32>
    %cst_68 = arith.constant 1.000000e+00 : f32
    %278 = vector.broadcast %cst_68 : f32 to vector<8x128xf32>
    %279 = arith.addf %278, %277 : vector<8x128xf32>
    %280 = arith.divf %278, %279 : vector<8x128xf32>
    %281 = vector.extract_strided_slice %266 {offsets = [0, 128], sizes = [8, 128], strides = [1, 1]} : vector<8x384xf32> to vector<8x128xf32>
    %282 = vector.extract_strided_slice %270 {offsets = [0, 128], sizes = [8, 128], strides = [1, 1]} : vector<8x384xf32> to vector<8x128xf32>
    %283 = arith.addf %281, %282 : vector<8x128xf32>
    %284 = arith.negf %283 : vector<8x128xf32>
    %285 = math.exp %284 : vector<8x128xf32>
    %cst_69 = arith.constant 1.000000e+00 : f32
    %286 = vector.broadcast %cst_69 : f32 to vector<8x128xf32>
    %287 = arith.addf %286, %285 : vector<8x128xf32>
    %288 = arith.divf %286, %287 : vector<8x128xf32>
    %289 = vector.extract_strided_slice %266 {offsets = [0, 256], sizes = [8, 128], strides = [1, 1]} : vector<8x384xf32> to vector<8x128xf32>
    %290 = vector.extract_strided_slice %270 {offsets = [0, 256], sizes = [8, 128], strides = [1, 1]} : vector<8x384xf32> to vector<8x128xf32>
    %291 = arith.mulf %280, %290 : vector<8x128xf32>
    %292 = arith.addf %289, %291 : vector<8x128xf32>
    %293 = math.tanh %292 : vector<8x128xf32>
    %cst_70 = arith.constant 1.000000e+00 : f32
    %294 = vector.broadcast %cst_70 : f32 to vector<8x128xf32>
    %295 = arith.subf %294, %288 : vector<8x128xf32>
    %296 = arith.mulf %295, %293 : vector<8x128xf32>
    %297 = arith.mulf %288, %247 : vector<8x128xf32>
    %298 = arith.addf %296, %297 : vector<8x128xf32>
    %299 = vector.extract_strided_slice %268 {offsets = [0, 0], sizes = [8, 128], strides = [1, 1]} : vector<8x384xf32> to vector<8x128xf32>
    %300 = vector.extract_strided_slice %272 {offsets = [0, 0], sizes = [8, 128], strides = [1, 1]} : vector<8x384xf32> to vector<8x128xf32>
    %301 = arith.addf %299, %300 : vector<8x128xf32>
    %302 = arith.negf %301 : vector<8x128xf32>
    %303 = math.exp %302 : vector<8x128xf32>
    %cst_71 = arith.constant 1.000000e+00 : f32
    %304 = vector.broadcast %cst_71 : f32 to vector<8x128xf32>
    %305 = arith.addf %304, %303 : vector<8x128xf32>
    %306 = arith.divf %304, %305 : vector<8x128xf32>
    %307 = vector.extract_strided_slice %268 {offsets = [0, 128], sizes = [8, 128], strides = [1, 1]} : vector<8x384xf32> to vector<8x128xf32>
    %308 = vector.extract_strided_slice %272 {offsets = [0, 128], sizes = [8, 128], strides = [1, 1]} : vector<8x384xf32> to vector<8x128xf32>
    %309 = arith.addf %307, %308 : vector<8x128xf32>
    %310 = arith.negf %309 : vector<8x128xf32>
    %311 = math.exp %310 : vector<8x128xf32>
    %cst_72 = arith.constant 1.000000e+00 : f32
    %312 = vector.broadcast %cst_72 : f32 to vector<8x128xf32>
    %313 = arith.addf %312, %311 : vector<8x128xf32>
    %314 = arith.divf %312, %313 : vector<8x128xf32>
    %315 = vector.extract_strided_slice %268 {offsets = [0, 256], sizes = [8, 128], strides = [1, 1]} : vector<8x384xf32> to vector<8x128xf32>
    %316 = vector.extract_strided_slice %272 {offsets = [0, 256], sizes = [8, 128], strides = [1, 1]} : vector<8x384xf32> to vector<8x128xf32>
    %317 = arith.mulf %306, %316 : vector<8x128xf32>
    %318 = arith.addf %315, %317 : vector<8x128xf32>
    %319 = math.tanh %318 : vector<8x128xf32>
    %cst_73 = arith.constant 1.000000e+00 : f32
    %320 = vector.broadcast %cst_73 : f32 to vector<8x128xf32>
    %321 = arith.subf %320, %314 : vector<8x128xf32>
    %322 = arith.mulf %321, %319 : vector<8x128xf32>
    %323 = arith.mulf %314, %250 : vector<8x128xf32>
    %324 = arith.addf %322, %323 : vector<8x128xf32>
    %c3_i32 = arith.constant 3 : i32
    %325 = vector.broadcast %c3_i32 : i32 to vector<8x1xi32>
    %326 = arith.cmpi sgt, %10, %325 : vector<8x1xi32>
    %c4_i32 = arith.constant 4 : i32
    %327 = vector.broadcast %c4_i32 : i32 to vector<8x1xi32>
    %328 = arith.cmpi sgt, %10, %327 : vector<8x1xi32>
    %329 = vector.shape_cast %326 : vector<8x1xi1> to vector<8x1xi1>
    %330 = vector.broadcast %329 : vector<8x1xi1> to vector<8x128xi1>
    %331 = arith.select %330, %298, %247 : vector<8x128xi1>, vector<8x128xf32>
    %332 = vector.shape_cast %328 : vector<8x1xi1> to vector<8x1xi1>
    %333 = vector.broadcast %332 : vector<8x1xi1> to vector<8x128xi1>
    %334 = arith.select %333, %324, %250 : vector<8x128xi1>, vector<8x128xf32>
    %cst_74 = arith.constant 0.000000e+00 : f32
    %335 = vector.shape_cast %326 : vector<8x1xi1> to vector<8x1xi1>
    %336 = vector.broadcast %335 : vector<8x1xi1> to vector<8x128xi1>
    %337 = vector.broadcast %cst_74 : f32 to vector<8x128xf32>
    %338 = arith.select %336, %331, %337 : vector<8x128xi1>, vector<8x128xf32>
    %c3 = arith.constant 3 : index
    %c0_75 = arith.constant 0 : index
    %c0_76 = arith.constant 0 : index
    %339 = vector.load %arg6[%c3, %c0_75, %c0_76] : memref<8x8x128xf32, #tpu.memory_space<vmem>>, vector<1x8x128xf32>
    %340 = vector.shape_cast %339 : vector<1x8x128xf32> to vector<8x128xf32>
    %341 = vector.shape_cast %338 : vector<8x128xf32> to vector<1x8x128xf32>
    tpu.vector_store %arg6[%c3, %c0_75, %c0_76], %341 {strides = array<i32>} : memref<8x8x128xf32, #tpu.memory_space<vmem>>, vector<1x8x128xf32>,
    %cst_77 = arith.constant 0.000000e+00 : f32
    %342 = vector.shape_cast %328 : vector<8x1xi1> to vector<8x1xi1>
    %343 = vector.broadcast %342 : vector<8x1xi1> to vector<8x128xi1>
    %344 = vector.broadcast %cst_77 : f32 to vector<8x128xf32>
    %345 = arith.select %343, %334, %344 : vector<8x128xi1>, vector<8x128xf32>
    %c4 = arith.constant 4 : index
    %c0_78 = arith.constant 0 : index
    %c0_79 = arith.constant 0 : index
    %346 = vector.load %arg9[%c4, %c0_78, %c0_79] : memref<8x8x128xf32, #tpu.memory_space<vmem>>, vector<1x8x128xf32>
    %347 = vector.shape_cast %346 : vector<1x8x128xf32> to vector<8x128xf32>
    %348 = vector.shape_cast %345 : vector<8x128xf32> to vector<1x8x128xf32>
    tpu.vector_store %arg9[%c4, %c0_78, %c0_79], %348 {strides = array<i32>} : memref<8x8x128xf32, #tpu.memory_space<vmem>>, vector<1x8x128xf32>,
    %c32_80 = arith.constant 32 : index
    %c0_81 = arith.constant 0 : index
    %349 = vector.load %arg8[%c32_80, %c0_81] : memref<64x768xbf16, #tpu.memory_space<vmem>>, vector<8x384xbf16>
    %350 = arith.extf %349 : vector<8x384xbf16> to vector<8x384xf32>
    %c24_82 = arith.constant 24 : index
    %c384_83 = arith.constant 384 : index
    %351 = vector.load %arg8[%c24_82, %c384_83] : memref<64x768xbf16, #tpu.memory_space<vmem>>, vector<8x384xbf16>
    %352 = arith.extf %351 : vector<8x384xbf16> to vector<8x384xf32>
    %353 = arith.truncf %331 : vector<8x128xf32> to vector<8x128xbf16>
    %cst_84 = arith.constant dense<0.000000e+00> : vector<8x384xf32>
    %354 = tpu.matmul %353, %8, %cst_84 {dimension_numbers = #tpu.dot_dimension_numbers<[1], [0], [0], [1], [0, 0, 1, 1], [], []>} : vector<8x128xbf16>, vector<128x384xbf16>, vector<8x384xf32> -> vector<8x384xf32>
    %355 = arith.truncf %334 : vector<8x128xf32> to vector<8x128xbf16>
    %cst_85 = arith.constant dense<0.000000e+00> : vector<8x384xf32>
    %356 = tpu.matmul %355, %9, %cst_85 {dimension_numbers = #tpu.dot_dimension_numbers<[1], [0], [0], [1], [0, 0, 1, 1], [], []>} : vector<8x128xbf16>, vector<128x384xbf16>, vector<8x384xf32> -> vector<8x384xf32>
    %357 = vector.extract_strided_slice %350 {offsets = [0, 0], sizes = [8, 128], strides = [1, 1]} : vector<8x384xf32> to vector<8x128xf32>
    %358 = vector.extract_strided_slice %354 {offsets = [0, 0], sizes = [8, 128], strides = [1, 1]} : vector<8x384xf32> to vector<8x128xf32>
    %359 = arith.addf %357, %358 : vector<8x128xf32>
    %360 = arith.negf %359 : vector<8x128xf32>
    %361 = math.exp %360 : vector<8x128xf32>
    %cst_86 = arith.constant 1.000000e+00 : f32
    %362 = vector.broadcast %cst_86 : f32 to vector<8x128xf32>
    %363 = arith.addf %362, %361 : vector<8x128xf32>
    %364 = arith.divf %362, %363 : vector<8x128xf32>
    %365 = vector.extract_strided_slice %350 {offsets = [0, 128], sizes = [8, 128], strides = [1, 1]} : vector<8x384xf32> to vector<8x128xf32>
    %366 = vector.extract_strided_slice %354 {offsets = [0, 128], sizes = [8, 128], strides = [1, 1]} : vector<8x384xf32> to vector<8x128xf32>
    %367 = arith.addf %365, %366 : vector<8x128xf32>
    %368 = arith.negf %367 : vector<8x128xf32>
    %369 = math.exp %368 : vector<8x128xf32>
    %cst_87 = arith.constant 1.000000e+00 : f32
    %370 = vector.broadcast %cst_87 : f32 to vector<8x128xf32>
    %371 = arith.addf %370, %369 : vector<8x128xf32>
    %372 = arith.divf %370, %371 : vector<8x128xf32>
    %373 = vector.extract_strided_slice %350 {offsets = [0, 256], sizes = [8, 128], strides = [1, 1]} : vector<8x384xf32> to vector<8x128xf32>
    %374 = vector.extract_strided_slice %354 {offsets = [0, 256], sizes = [8, 128], strides = [1, 1]} : vector<8x384xf32> to vector<8x128xf32>
    %375 = arith.mulf %364, %374 : vector<8x128xf32>
    %376 = arith.addf %373, %375 : vector<8x128xf32>
    %377 = math.tanh %376 : vector<8x128xf32>
    %cst_88 = arith.constant 1.000000e+00 : f32
    %378 = vector.broadcast %cst_88 : f32 to vector<8x128xf32>
    %379 = arith.subf %378, %372 : vector<8x128xf32>
    %380 = arith.mulf %379, %377 : vector<8x128xf32>
    %381 = arith.mulf %372, %331 : vector<8x128xf32>
    %382 = arith.addf %380, %381 : vector<8x128xf32>
    %383 = vector.extract_strided_slice %352 {offsets = [0, 0], sizes = [8, 128], strides = [1, 1]} : vector<8x384xf32> to vector<8x128xf32>
    %384 = vector.extract_strided_slice %356 {offsets = [0, 0], sizes = [8, 128], strides = [1, 1]} : vector<8x384xf32> to vector<8x128xf32>
    %385 = arith.addf %383, %384 : vector<8x128xf32>
    %386 = arith.negf %385 : vector<8x128xf32>
    %387 = math.exp %386 : vector<8x128xf32>
    %cst_89 = arith.constant 1.000000e+00 : f32
    %388 = vector.broadcast %cst_89 : f32 to vector<8x128xf32>
    %389 = arith.addf %388, %387 : vector<8x128xf32>
    %390 = arith.divf %388, %389 : vector<8x128xf32>
    %391 = vector.extract_strided_slice %352 {offsets = [0, 128], sizes = [8, 128], strides = [1, 1]} : vector<8x384xf32> to vector<8x128xf32>
    %392 = vector.extract_strided_slice %356 {offsets = [0, 128], sizes = [8, 128], strides = [1, 1]} : vector<8x384xf32> to vector<8x128xf32>
    %393 = arith.addf %391, %392 : vector<8x128xf32>
    %394 = arith.negf %393 : vector<8x128xf32>
    %395 = math.exp %394 : vector<8x128xf32>
    %cst_90 = arith.constant 1.000000e+00 : f32
    %396 = vector.broadcast %cst_90 : f32 to vector<8x128xf32>
    %397 = arith.addf %396, %395 : vector<8x128xf32>
    %398 = arith.divf %396, %397 : vector<8x128xf32>
    %399 = vector.extract_strided_slice %352 {offsets = [0, 256], sizes = [8, 128], strides = [1, 1]} : vector<8x384xf32> to vector<8x128xf32>
    %400 = vector.extract_strided_slice %356 {offsets = [0, 256], sizes = [8, 128], strides = [1, 1]} : vector<8x384xf32> to vector<8x128xf32>
    %401 = arith.mulf %390, %400 : vector<8x128xf32>
    %402 = arith.addf %399, %401 : vector<8x128xf32>
    %403 = math.tanh %402 : vector<8x128xf32>
    %cst_91 = arith.constant 1.000000e+00 : f32
    %404 = vector.broadcast %cst_91 : f32 to vector<8x128xf32>
    %405 = arith.subf %404, %398 : vector<8x128xf32>
    %406 = arith.mulf %405, %403 : vector<8x128xf32>
    %407 = arith.mulf %398, %334 : vector<8x128xf32>
    %408 = arith.addf %406, %407 : vector<8x128xf32>
    %c4_i32_92 = arith.constant 4 : i32
    %409 = vector.broadcast %c4_i32_92 : i32 to vector<8x1xi32>
    %410 = arith.cmpi sgt, %10, %409 : vector<8x1xi32>
    %c3_i32_93 = arith.constant 3 : i32
    %411 = vector.broadcast %c3_i32_93 : i32 to vector<8x1xi32>
    %412 = arith.cmpi sgt, %10, %411 : vector<8x1xi32>
    %413 = vector.shape_cast %410 : vector<8x1xi1> to vector<8x1xi1>
    %414 = vector.broadcast %413 : vector<8x1xi1> to vector<8x128xi1>
    %415 = arith.select %414, %382, %331 : vector<8x128xi1>, vector<8x128xf32>
    %416 = vector.shape_cast %412 : vector<8x1xi1> to vector<8x1xi1>
    %417 = vector.broadcast %416 : vector<8x1xi1> to vector<8x128xi1>
    %418 = arith.select %417, %408, %334 : vector<8x128xi1>, vector<8x128xf32>
    %cst_94 = arith.constant 0.000000e+00 : f32
    %419 = vector.shape_cast %410 : vector<8x1xi1> to vector<8x1xi1>
    %420 = vector.broadcast %419 : vector<8x1xi1> to vector<8x128xi1>
    %421 = vector.broadcast %cst_94 : f32 to vector<8x128xf32>
    %422 = arith.select %420, %415, %421 : vector<8x128xi1>, vector<8x128xf32>
    %c4_95 = arith.constant 4 : index
    %c0_96 = arith.constant 0 : index
    %c0_97 = arith.constant 0 : index
    %423 = vector.load %arg6[%c4_95, %c0_96, %c0_97] : memref<8x8x128xf32, #tpu.memory_space<vmem>>, vector<1x8x128xf32>
    %424 = vector.shape_cast %423 : vector<1x8x128xf32> to vector<8x128xf32>
    %425 = vector.shape_cast %422 : vector<8x128xf32> to vector<1x8x128xf32>
    tpu.vector_store %arg6[%c4_95, %c0_96, %c0_97], %425 {strides = array<i32>} : memref<8x8x128xf32, #tpu.memory_space<vmem>>, vector<1x8x128xf32>,
    %cst_98 = arith.constant 0.000000e+00 : f32
    %426 = vector.shape_cast %412 : vector<8x1xi1> to vector<8x1xi1>
    %427 = vector.broadcast %426 : vector<8x1xi1> to vector<8x128xi1>
    %428 = vector.broadcast %cst_98 : f32 to vector<8x128xf32>
    %429 = arith.select %427, %418, %428 : vector<8x128xi1>, vector<8x128xf32>
    %c3_99 = arith.constant 3 : index
    %c0_100 = arith.constant 0 : index
    %c0_101 = arith.constant 0 : index
    %430 = vector.load %arg9[%c3_99, %c0_100, %c0_101] : memref<8x8x128xf32, #tpu.memory_space<vmem>>, vector<1x8x128xf32>
    %431 = vector.shape_cast %430 : vector<1x8x128xf32> to vector<8x128xf32>
    %432 = vector.shape_cast %429 : vector<8x128xf32> to vector<1x8x128xf32>
    tpu.vector_store %arg9[%c3_99, %c0_100, %c0_101], %432 {strides = array<i32>} : memref<8x8x128xf32, #tpu.memory_space<vmem>>, vector<1x8x128xf32>,
    %c40_102 = arith.constant 40 : index
    %c0_103 = arith.constant 0 : index
    %433 = vector.load %arg8[%c40_102, %c0_103] : memref<64x768xbf16, #tpu.memory_space<vmem>>, vector<8x384xbf16>
    %434 = arith.extf %433 : vector<8x384xbf16> to vector<8x384xf32>
    %c16_104 = arith.constant 16 : index
    %c384_105 = arith.constant 384 : index
    %435 = vector.load %arg8[%c16_104, %c384_105] : memref<64x768xbf16, #tpu.memory_space<vmem>>, vector<8x384xbf16>
    %436 = arith.extf %435 : vector<8x384xbf16> to vector<8x384xf32>
    %437 = arith.truncf %415 : vector<8x128xf32> to vector<8x128xbf16>
    %cst_106 = arith.constant dense<0.000000e+00> : vector<8x384xf32>
    %438 = tpu.matmul %437, %8, %cst_106 {dimension_numbers = #tpu.dot_dimension_numbers<[1], [0], [0], [1], [0, 0, 1, 1], [], []>} : vector<8x128xbf16>, vector<128x384xbf16>, vector<8x384xf32> -> vector<8x384xf32>
    %439 = arith.truncf %418 : vector<8x128xf32> to vector<8x128xbf16>
    %cst_107 = arith.constant dense<0.000000e+00> : vector<8x384xf32>
    %440 = tpu.matmul %439, %9, %cst_107 {dimension_numbers = #tpu.dot_dimension_numbers<[1], [0], [0], [1], [0, 0, 1, 1], [], []>} : vector<8x128xbf16>, vector<128x384xbf16>, vector<8x384xf32> -> vector<8x384xf32>
    %441 = vector.extract_strided_slice %434 {offsets = [0, 0], sizes = [8, 128], strides = [1, 1]} : vector<8x384xf32> to vector<8x128xf32>
    %442 = vector.extract_strided_slice %438 {offsets = [0, 0], sizes = [8, 128], strides = [1, 1]} : vector<8x384xf32> to vector<8x128xf32>
    %443 = arith.addf %441, %442 : vector<8x128xf32>
    %444 = arith.negf %443 : vector<8x128xf32>
    %445 = math.exp %444 : vector<8x128xf32>
    %cst_108 = arith.constant 1.000000e+00 : f32
    %446 = vector.broadcast %cst_108 : f32 to vector<8x128xf32>
    %447 = arith.addf %446, %445 : vector<8x128xf32>
    %448 = arith.divf %446, %447 : vector<8x128xf32>
    %449 = vector.extract_strided_slice %434 {offsets = [0, 128], sizes = [8, 128], strides = [1, 1]} : vector<8x384xf32> to vector<8x128xf32>
    %450 = vector.extract_strided_slice %438 {offsets = [0, 128], sizes = [8, 128], strides = [1, 1]} : vector<8x384xf32> to vector<8x128xf32>
    %451 = arith.addf %449, %450 : vector<8x128xf32>
    %452 = arith.negf %451 : vector<8x128xf32>
    %453 = math.exp %452 : vector<8x128xf32>
    %cst_109 = arith.constant 1.000000e+00 : f32
    %454 = vector.broadcast %cst_109 : f32 to vector<8x128xf32>
    %455 = arith.addf %454, %453 : vector<8x128xf32>
    %456 = arith.divf %454, %455 : vector<8x128xf32>
    %457 = vector.extract_strided_slice %434 {offsets = [0, 256], sizes = [8, 128], strides = [1, 1]} : vector<8x384xf32> to vector<8x128xf32>
    %458 = vector.extract_strided_slice %438 {offsets = [0, 256], sizes = [8, 128], strides = [1, 1]} : vector<8x384xf32> to vector<8x128xf32>
    %459 = arith.mulf %448, %458 : vector<8x128xf32>
    %460 = arith.addf %457, %459 : vector<8x128xf32>
    %461 = math.tanh %460 : vector<8x128xf32>
    %cst_110 = arith.constant 1.000000e+00 : f32
    %462 = vector.broadcast %cst_110 : f32 to vector<8x128xf32>
    %463 = arith.subf %462, %456 : vector<8x128xf32>
    %464 = arith.mulf %463, %461 : vector<8x128xf32>
    %465 = arith.mulf %456, %415 : vector<8x128xf32>
    %466 = arith.addf %464, %465 : vector<8x128xf32>
    %467 = vector.extract_strided_slice %436 {offsets = [0, 0], sizes = [8, 128], strides = [1, 1]} : vector<8x384xf32> to vector<8x128xf32>
    %468 = vector.extract_strided_slice %440 {offsets = [0, 0], sizes = [8, 128], strides = [1, 1]} : vector<8x384xf32> to vector<8x128xf32>
    %469 = arith.addf %467, %468 : vector<8x128xf32>
    %470 = arith.negf %469 : vector<8x128xf32>
    %471 = math.exp %470 : vector<8x128xf32>
    %cst_111 = arith.constant 1.000000e+00 : f32
    %472 = vector.broadcast %cst_111 : f32 to vector<8x128xf32>
    %473 = arith.addf %472, %471 : vector<8x128xf32>
    %474 = arith.divf %472, %473 : vector<8x128xf32>
    %475 = vector.extract_strided_slice %436 {offsets = [0, 128], sizes = [8, 128], strides = [1, 1]} : vector<8x384xf32> to vector<8x128xf32>
    %476 = vector.extract_strided_slice %440 {offsets = [0, 128], sizes = [8, 128], strides = [1, 1]} : vector<8x384xf32> to vector<8x128xf32>
    %477 = arith.addf %475, %476 : vector<8x128xf32>
    %478 = arith.negf %477 : vector<8x128xf32>
    %479 = math.exp %478 : vector<8x128xf32>
    %cst_112 = arith.constant 1.000000e+00 : f32
    %480 = vector.broadcast %cst_112 : f32 to vector<8x128xf32>
    %481 = arith.addf %480, %479 : vector<8x128xf32>
    %482 = arith.divf %480, %481 : vector<8x128xf32>
    %483 = vector.extract_strided_slice %436 {offsets = [0, 256], sizes = [8, 128], strides = [1, 1]} : vector<8x384xf32> to vector<8x128xf32>
    %484 = vector.extract_strided_slice %440 {offsets = [0, 256], sizes = [8, 128], strides = [1, 1]} : vector<8x384xf32> to vector<8x128xf32>
    %485 = arith.mulf %474, %484 : vector<8x128xf32>
    %486 = arith.addf %483, %485 : vector<8x128xf32>
    %487 = math.tanh %486 : vector<8x128xf32>
    %cst_113 = arith.constant 1.000000e+00 : f32
    %488 = vector.broadcast %cst_113 : f32 to vector<8x128xf32>
    %489 = arith.subf %488, %482 : vector<8x128xf32>
    %490 = arith.mulf %489, %487 : vector<8x128xf32>
    %491 = arith.mulf %482, %418 : vector<8x128xf32>
    %492 = arith.addf %490, %491 : vector<8x128xf32>
    %c5_i32_114 = arith.constant 5 : i32
    %493 = vector.broadcast %c5_i32_114 : i32 to vector<8x1xi32>
    %494 = arith.cmpi sgt, %10, %493 : vector<8x1xi32>
    %c2_i32_115 = arith.constant 2 : i32
    %495 = vector.broadcast %c2_i32_115 : i32 to vector<8x1xi32>
    %496 = arith.cmpi sgt, %10, %495 : vector<8x1xi32>
    %497 = vector.shape_cast %494 : vector<8x1xi1> to vector<8x1xi1>
    %498 = vector.broadcast %497 : vector<8x1xi1> to vector<8x128xi1>
    %499 = arith.select %498, %466, %415 : vector<8x128xi1>, vector<8x128xf32>
    %500 = vector.shape_cast %496 : vector<8x1xi1> to vector<8x1xi1>
    %501 = vector.broadcast %500 : vector<8x1xi1> to vector<8x128xi1>
    %502 = arith.select %501, %492, %418 : vector<8x128xi1>, vector<8x128xf32>
    %cst_116 = arith.constant 0.000000e+00 : f32
    %503 = vector.shape_cast %494 : vector<8x1xi1> to vector<8x1xi1>
    %504 = vector.broadcast %503 : vector<8x1xi1> to vector<8x128xi1>
    %505 = vector.broadcast %cst_116 : f32 to vector<8x128xf32>
    %506 = arith.select %504, %499, %505 : vector<8x128xi1>, vector<8x128xf32>
    %c5_117 = arith.constant 5 : index
    %c0_118 = arith.constant 0 : index
    %c0_119 = arith.constant 0 : index
    %507 = vector.load %arg6[%c5_117, %c0_118, %c0_119] : memref<8x8x128xf32, #tpu.memory_space<vmem>>, vector<1x8x128xf32>
    %508 = vector.shape_cast %507 : vector<1x8x128xf32> to vector<8x128xf32>
    %509 = vector.shape_cast %506 : vector<8x128xf32> to vector<1x8x128xf32>
    tpu.vector_store %arg6[%c5_117, %c0_118, %c0_119], %509 {strides = array<i32>} : memref<8x8x128xf32, #tpu.memory_space<vmem>>, vector<1x8x128xf32>,
    %cst_120 = arith.constant 0.000000e+00 : f32
    %510 = vector.shape_cast %496 : vector<8x1xi1> to vector<8x1xi1>
    %511 = vector.broadcast %510 : vector<8x1xi1> to vector<8x128xi1>
    %512 = vector.broadcast %cst_120 : f32 to vector<8x128xf32>
    %513 = arith.select %511, %502, %512 : vector<8x128xi1>, vector<8x128xf32>
    %c2_121 = arith.constant 2 : index
    %c0_122 = arith.constant 0 : index
    %c0_123 = arith.constant 0 : index
    %514 = vector.load %arg9[%c2_121, %c0_122, %c0_123] : memref<8x8x128xf32, #tpu.memory_space<vmem>>, vector<1x8x128xf32>
    %515 = vector.shape_cast %514 : vector<1x8x128xf32> to vector<8x128xf32>
    %516 = vector.shape_cast %513 : vector<8x128xf32> to vector<1x8x128xf32>
    tpu.vector_store %arg9[%c2_121, %c0_122, %c0_123], %516 {strides = array<i32>} : memref<8x8x128xf32, #tpu.memory_space<vmem>>, vector<1x8x128xf32>,
    %c48_124 = arith.constant 48 : index
    %c0_125 = arith.constant 0 : index
    %517 = vector.load %arg8[%c48_124, %c0_125] : memref<64x768xbf16, #tpu.memory_space<vmem>>, vector<8x384xbf16>
    %518 = arith.extf %517 : vector<8x384xbf16> to vector<8x384xf32>
    %c8_126 = arith.constant 8 : index
    %c384_127 = arith.constant 384 : index
    %519 = vector.load %arg8[%c8_126, %c384_127] : memref<64x768xbf16, #tpu.memory_space<vmem>>, vector<8x384xbf16>
    %520 = arith.extf %519 : vector<8x384xbf16> to vector<8x384xf32>
    %521 = arith.truncf %499 : vector<8x128xf32> to vector<8x128xbf16>
    %cst_128 = arith.constant dense<0.000000e+00> : vector<8x384xf32>
    %522 = tpu.matmul %521, %8, %cst_128 {dimension_numbers = #tpu.dot_dimension_numbers<[1], [0], [0], [1], [0, 0, 1, 1], [], []>} : vector<8x128xbf16>, vector<128x384xbf16>, vector<8x384xf32> -> vector<8x384xf32>
    %523 = arith.truncf %502 : vector<8x128xf32> to vector<8x128xbf16>
    %cst_129 = arith.constant dense<0.000000e+00> : vector<8x384xf32>
    %524 = tpu.matmul %523, %9, %cst_129 {dimension_numbers = #tpu.dot_dimension_numbers<[1], [0], [0], [1], [0, 0, 1, 1], [], []>} : vector<8x128xbf16>, vector<128x384xbf16>, vector<8x384xf32> -> vector<8x384xf32>
    %525 = vector.extract_strided_slice %518 {offsets = [0, 0], sizes = [8, 128], strides = [1, 1]} : vector<8x384xf32> to vector<8x128xf32>
    %526 = vector.extract_strided_slice %522 {offsets = [0, 0], sizes = [8, 128], strides = [1, 1]} : vector<8x384xf32> to vector<8x128xf32>
    %527 = arith.addf %525, %526 : vector<8x128xf32>
    %528 = arith.negf %527 : vector<8x128xf32>
    %529 = math.exp %528 : vector<8x128xf32>
    %cst_130 = arith.constant 1.000000e+00 : f32
    %530 = vector.broadcast %cst_130 : f32 to vector<8x128xf32>
    %531 = arith.addf %530, %529 : vector<8x128xf32>
    %532 = arith.divf %530, %531 : vector<8x128xf32>
    %533 = vector.extract_strided_slice %518 {offsets = [0, 128], sizes = [8, 128], strides = [1, 1]} : vector<8x384xf32> to vector<8x128xf32>
    %534 = vector.extract_strided_slice %522 {offsets = [0, 128], sizes = [8, 128], strides = [1, 1]} : vector<8x384xf32> to vector<8x128xf32>
    %535 = arith.addf %533, %534 : vector<8x128xf32>
    %536 = arith.negf %535 : vector<8x128xf32>
    %537 = math.exp %536 : vector<8x128xf32>
    %cst_131 = arith.constant 1.000000e+00 : f32
    %538 = vector.broadcast %cst_131 : f32 to vector<8x128xf32>
    %539 = arith.addf %538, %537 : vector<8x128xf32>
    %540 = arith.divf %538, %539 : vector<8x128xf32>
    %541 = vector.extract_strided_slice %518 {offsets = [0, 256], sizes = [8, 128], strides = [1, 1]} : vector<8x384xf32> to vector<8x128xf32>
    %542 = vector.extract_strided_slice %522 {offsets = [0, 256], sizes = [8, 128], strides = [1, 1]} : vector<8x384xf32> to vector<8x128xf32>
    %543 = arith.mulf %532, %542 : vector<8x128xf32>
    %544 = arith.addf %541, %543 : vector<8x128xf32>
    %545 = math.tanh %544 : vector<8x128xf32>
    %cst_132 = arith.constant 1.000000e+00 : f32
    %546 = vector.broadcast %cst_132 : f32 to vector<8x128xf32>
    %547 = arith.subf %546, %540 : vector<8x128xf32>
    %548 = arith.mulf %547, %545 : vector<8x128xf32>
    %549 = arith.mulf %540, %499 : vector<8x128xf32>
    %550 = arith.addf %548, %549 : vector<8x128xf32>
    %551 = vector.extract_strided_slice %520 {offsets = [0, 0], sizes = [8, 128], strides = [1, 1]} : vector<8x384xf32> to vector<8x128xf32>
    %552 = vector.extract_strided_slice %524 {offsets = [0, 0], sizes = [8, 128], strides = [1, 1]} : vector<8x384xf32> to vector<8x128xf32>
    %553 = arith.addf %551, %552 : vector<8x128xf32>
    %554 = arith.negf %553 : vector<8x128xf32>
    %555 = math.exp %554 : vector<8x128xf32>
    %cst_133 = arith.constant 1.000000e+00 : f32
    %556 = vector.broadcast %cst_133 : f32 to vector<8x128xf32>
    %557 = arith.addf %556, %555 : vector<8x128xf32>
    %558 = arith.divf %556, %557 : vector<8x128xf32>
    %559 = vector.extract_strided_slice %520 {offsets = [0, 128], sizes = [8, 128], strides = [1, 1]} : vector<8x384xf32> to vector<8x128xf32>
    %560 = vector.extract_strided_slice %524 {offsets = [0, 128], sizes = [8, 128], strides = [1, 1]} : vector<8x384xf32> to vector<8x128xf32>
    %561 = arith.addf %559, %560 : vector<8x128xf32>
    %562 = arith.negf %561 : vector<8x128xf32>
    %563 = math.exp %562 : vector<8x128xf32>
    %cst_134 = arith.constant 1.000000e+00 : f32
    %564 = vector.broadcast %cst_134 : f32 to vector<8x128xf32>
    %565 = arith.addf %564, %563 : vector<8x128xf32>
    %566 = arith.divf %564, %565 : vector<8x128xf32>
    %567 = vector.extract_strided_slice %520 {offsets = [0, 256], sizes = [8, 128], strides = [1, 1]} : vector<8x384xf32> to vector<8x128xf32>
    %568 = vector.extract_strided_slice %524 {offsets = [0, 256], sizes = [8, 128], strides = [1, 1]} : vector<8x384xf32> to vector<8x128xf32>
    %569 = arith.mulf %558, %568 : vector<8x128xf32>
    %570 = arith.addf %567, %569 : vector<8x128xf32>
    %571 = math.tanh %570 : vector<8x128xf32>
    %cst_135 = arith.constant 1.000000e+00 : f32
    %572 = vector.broadcast %cst_135 : f32 to vector<8x128xf32>
    %573 = arith.subf %572, %566 : vector<8x128xf32>
    %574 = arith.mulf %573, %571 : vector<8x128xf32>
    %575 = arith.mulf %566, %502 : vector<8x128xf32>
    %576 = arith.addf %574, %575 : vector<8x128xf32>
    %c6_i32_136 = arith.constant 6 : i32
    %577 = vector.broadcast %c6_i32_136 : i32 to vector<8x1xi32>
    %578 = arith.cmpi sgt, %10, %577 : vector<8x1xi32>
    %c1_i32_137 = arith.constant 1 : i32
    %579 = vector.broadcast %c1_i32_137 : i32 to vector<8x1xi32>
    %580 = arith.cmpi sgt, %10, %579 : vector<8x1xi32>
    %581 = vector.shape_cast %578 : vector<8x1xi1> to vector<8x1xi1>
    %582 = vector.broadcast %581 : vector<8x1xi1> to vector<8x128xi1>
    %583 = arith.select %582, %550, %499 : vector<8x128xi1>, vector<8x128xf32>
    %584 = vector.shape_cast %580 : vector<8x1xi1> to vector<8x1xi1>
    %585 = vector.broadcast %584 : vector<8x1xi1> to vector<8x128xi1>
    %586 = arith.select %585, %576, %502 : vector<8x128xi1>, vector<8x128xf32>
    %cst_138 = arith.constant 0.000000e+00 : f32
    %587 = vector.shape_cast %578 : vector<8x1xi1> to vector<8x1xi1>
    %588 = vector.broadcast %587 : vector<8x1xi1> to vector<8x128xi1>
    %589 = vector.broadcast %cst_138 : f32 to vector<8x128xf32>
    %590 = arith.select %588, %583, %589 : vector<8x128xi1>, vector<8x128xf32>
    %c6_139 = arith.constant 6 : index
    %c0_140 = arith.constant 0 : index
    %c0_141 = arith.constant 0 : index
    %591 = vector.load %arg6[%c6_139, %c0_140, %c0_141] : memref<8x8x128xf32, #tpu.memory_space<vmem>>, vector<1x8x128xf32>
    %592 = vector.shape_cast %591 : vector<1x8x128xf32> to vector<8x128xf32>
    %593 = vector.shape_cast %590 : vector<8x128xf32> to vector<1x8x128xf32>
    tpu.vector_store %arg6[%c6_139, %c0_140, %c0_141], %593 {strides = array<i32>} : memref<8x8x128xf32, #tpu.memory_space<vmem>>, vector<1x8x128xf32>,
    %cst_142 = arith.constant 0.000000e+00 : f32
    %594 = vector.shape_cast %580 : vector<8x1xi1> to vector<8x1xi1>
    %595 = vector.broadcast %594 : vector<8x1xi1> to vector<8x128xi1>
    %596 = vector.broadcast %cst_142 : f32 to vector<8x128xf32>
    %597 = arith.select %595, %586, %596 : vector<8x128xi1>, vector<8x128xf32>
    %c1_143 = arith.constant 1 : index
    %c0_144 = arith.constant 0 : index
    %c0_145 = arith.constant 0 : index
    %598 = vector.load %arg9[%c1_143, %c0_144, %c0_145] : memref<8x8x128xf32, #tpu.memory_space<vmem>>, vector<1x8x128xf32>
    %599 = vector.shape_cast %598 : vector<1x8x128xf32> to vector<8x128xf32>
    %600 = vector.shape_cast %597 : vector<8x128xf32> to vector<1x8x128xf32>
    tpu.vector_store %arg9[%c1_143, %c0_144, %c0_145], %600 {strides = array<i32>} : memref<8x8x128xf32, #tpu.memory_space<vmem>>, vector<1x8x128xf32>,
    %c56_146 = arith.constant 56 : index
    %c0_147 = arith.constant 0 : index
    %601 = vector.load %arg8[%c56_146, %c0_147] : memref<64x768xbf16, #tpu.memory_space<vmem>>, vector<8x384xbf16>
    %602 = arith.extf %601 : vector<8x384xbf16> to vector<8x384xf32>
    %c0_148 = arith.constant 0 : index
    %c384_149 = arith.constant 384 : index
    %603 = vector.load %arg8[%c0_148, %c384_149] : memref<64x768xbf16, #tpu.memory_space<vmem>>, vector<8x384xbf16>
    %604 = arith.extf %603 : vector<8x384xbf16> to vector<8x384xf32>
    %605 = arith.truncf %583 : vector<8x128xf32> to vector<8x128xbf16>
    %cst_150 = arith.constant dense<0.000000e+00> : vector<8x384xf32>
    %606 = tpu.matmul %605, %8, %cst_150 {dimension_numbers = #tpu.dot_dimension_numbers<[1], [0], [0], [1], [0, 0, 1, 1], [], []>} : vector<8x128xbf16>, vector<128x384xbf16>, vector<8x384xf32> -> vector<8x384xf32>
    %607 = arith.truncf %586 : vector<8x128xf32> to vector<8x128xbf16>
    %cst_151 = arith.constant dense<0.000000e+00> : vector<8x384xf32>
    %608 = tpu.matmul %607, %9, %cst_151 {dimension_numbers = #tpu.dot_dimension_numbers<[1], [0], [0], [1], [0, 0, 1, 1], [], []>} : vector<8x128xbf16>, vector<128x384xbf16>, vector<8x384xf32> -> vector<8x384xf32>
    %609 = vector.extract_strided_slice %602 {offsets = [0, 0], sizes = [8, 128], strides = [1, 1]} : vector<8x384xf32> to vector<8x128xf32>
    %610 = vector.extract_strided_slice %606 {offsets = [0, 0], sizes = [8, 128], strides = [1, 1]} : vector<8x384xf32> to vector<8x128xf32>
    %611 = arith.addf %609, %610 : vector<8x128xf32>
    %612 = arith.negf %611 : vector<8x128xf32>
    %613 = math.exp %612 : vector<8x128xf32>
    %cst_152 = arith.constant 1.000000e+00 : f32
    %614 = vector.broadcast %cst_152 : f32 to vector<8x128xf32>
    %615 = arith.addf %614, %613 : vector<8x128xf32>
    %616 = arith.divf %614, %615 : vector<8x128xf32>
    %617 = vector.extract_strided_slice %602 {offsets = [0, 128], sizes = [8, 128], strides = [1, 1]} : vector<8x384xf32> to vector<8x128xf32>
    %618 = vector.extract_strided_slice %606 {offsets = [0, 128], sizes = [8, 128], strides = [1, 1]} : vector<8x384xf32> to vector<8x128xf32>
    %619 = arith.addf %617, %618 : vector<8x128xf32>
    %620 = arith.negf %619 : vector<8x128xf32>
    %621 = math.exp %620 : vector<8x128xf32>
    %cst_153 = arith.constant 1.000000e+00 : f32
    %622 = vector.broadcast %cst_153 : f32 to vector<8x128xf32>
    %623 = arith.addf %622, %621 : vector<8x128xf32>
    %624 = arith.divf %622, %623 : vector<8x128xf32>
    %625 = vector.extract_strided_slice %602 {offsets = [0, 256], sizes = [8, 128], strides = [1, 1]} : vector<8x384xf32> to vector<8x128xf32>
    %626 = vector.extract_strided_slice %606 {offsets = [0, 256], sizes = [8, 128], strides = [1, 1]} : vector<8x384xf32> to vector<8x128xf32>
    %627 = arith.mulf %616, %626 : vector<8x128xf32>
    %628 = arith.addf %625, %627 : vector<8x128xf32>
    %629 = math.tanh %628 : vector<8x128xf32>
    %cst_154 = arith.constant 1.000000e+00 : f32
    %630 = vector.broadcast %cst_154 : f32 to vector<8x128xf32>
    %631 = arith.subf %630, %624 : vector<8x128xf32>
    %632 = arith.mulf %631, %629 : vector<8x128xf32>
    %633 = arith.mulf %624, %583 : vector<8x128xf32>
    %634 = arith.addf %632, %633 : vector<8x128xf32>
    %635 = vector.extract_strided_slice %604 {offsets = [0, 0], sizes = [8, 128], strides = [1, 1]} : vector<8x384xf32> to vector<8x128xf32>
    %636 = vector.extract_strided_slice %608 {offsets = [0, 0], sizes = [8, 128], strides = [1, 1]} : vector<8x384xf32> to vector<8x128xf32>
    %637 = arith.addf %635, %636 : vector<8x128xf32>
    %638 = arith.negf %637 : vector<8x128xf32>
    %639 = math.exp %638 : vector<8x128xf32>
    %cst_155 = arith.constant 1.000000e+00 : f32
    %640 = vector.broadcast %cst_155 : f32 to vector<8x128xf32>
    %641 = arith.addf %640, %639 : vector<8x128xf32>
    %642 = arith.divf %640, %641 : vector<8x128xf32>
    %643 = vector.extract_strided_slice %604 {offsets = [0, 128], sizes = [8, 128], strides = [1, 1]} : vector<8x384xf32> to vector<8x128xf32>
    %644 = vector.extract_strided_slice %608 {offsets = [0, 128], sizes = [8, 128], strides = [1, 1]} : vector<8x384xf32> to vector<8x128xf32>
    %645 = arith.addf %643, %644 : vector<8x128xf32>
    %646 = arith.negf %645 : vector<8x128xf32>
    %647 = math.exp %646 : vector<8x128xf32>
    %cst_156 = arith.constant 1.000000e+00 : f32
    %648 = vector.broadcast %cst_156 : f32 to vector<8x128xf32>
    %649 = arith.addf %648, %647 : vector<8x128xf32>
    %650 = arith.divf %648, %649 : vector<8x128xf32>
    %651 = vector.extract_strided_slice %604 {offsets = [0, 256], sizes = [8, 128], strides = [1, 1]} : vector<8x384xf32> to vector<8x128xf32>
    %652 = vector.extract_strided_slice %608 {offsets = [0, 256], sizes = [8, 128], strides = [1, 1]} : vector<8x384xf32> to vector<8x128xf32>
    %653 = arith.mulf %642, %652 : vector<8x128xf32>
    %654 = arith.addf %651, %653 : vector<8x128xf32>
    %655 = math.tanh %654 : vector<8x128xf32>
    %cst_157 = arith.constant 1.000000e+00 : f32
    %656 = vector.broadcast %cst_157 : f32 to vector<8x128xf32>
    %657 = arith.subf %656, %650 : vector<8x128xf32>
    %658 = arith.mulf %657, %655 : vector<8x128xf32>
    %659 = arith.mulf %650, %586 : vector<8x128xf32>
    %660 = arith.addf %658, %659 : vector<8x128xf32>
    %c7_i32_158 = arith.constant 7 : i32
    %661 = vector.broadcast %c7_i32_158 : i32 to vector<8x1xi32>
    %662 = arith.cmpi sgt, %10, %661 : vector<8x1xi32>
    %c0_i32_159 = arith.constant 0 : i32
    %663 = vector.broadcast %c0_i32_159 : i32 to vector<8x1xi32>
    %664 = arith.cmpi sgt, %10, %663 : vector<8x1xi32>
    %665 = vector.shape_cast %662 : vector<8x1xi1> to vector<8x1xi1>
    %666 = vector.broadcast %665 : vector<8x1xi1> to vector<8x128xi1>
    %667 = arith.select %666, %634, %583 : vector<8x128xi1>, vector<8x128xf32>
    %668 = vector.shape_cast %664 : vector<8x1xi1> to vector<8x1xi1>
    %669 = vector.broadcast %668 : vector<8x1xi1> to vector<8x128xi1>
    %670 = arith.select %669, %660, %586 : vector<8x128xi1>, vector<8x128xf32>
    %cst_160 = arith.constant 0.000000e+00 : f32
    %671 = vector.shape_cast %662 : vector<8x1xi1> to vector<8x1xi1>
    %672 = vector.broadcast %671 : vector<8x1xi1> to vector<8x128xi1>
    %673 = vector.broadcast %cst_160 : f32 to vector<8x128xf32>
    %674 = arith.select %672, %667, %673 : vector<8x128xi1>, vector<8x128xf32>
    %c7_161 = arith.constant 7 : index
    %c0_162 = arith.constant 0 : index
    %c0_163 = arith.constant 0 : index
    %675 = vector.load %arg6[%c7_161, %c0_162, %c0_163] : memref<8x8x128xf32, #tpu.memory_space<vmem>>, vector<1x8x128xf32>
    %676 = vector.shape_cast %675 : vector<1x8x128xf32> to vector<8x128xf32>
    %677 = vector.shape_cast %674 : vector<8x128xf32> to vector<1x8x128xf32>
    tpu.vector_store %arg6[%c7_161, %c0_162, %c0_163], %677 {strides = array<i32>} : memref<8x8x128xf32, #tpu.memory_space<vmem>>, vector<1x8x128xf32>,
    %cst_164 = arith.constant 0.000000e+00 : f32
    %678 = vector.shape_cast %664 : vector<8x1xi1> to vector<8x1xi1>
    %679 = vector.broadcast %678 : vector<8x1xi1> to vector<8x128xi1>
    %680 = vector.broadcast %cst_164 : f32 to vector<8x128xf32>
    %681 = arith.select %679, %670, %680 : vector<8x128xi1>, vector<8x128xf32>
    %c0_165 = arith.constant 0 : index
    %c0_166 = arith.constant 0 : index
    %c0_167 = arith.constant 0 : index
    %682 = vector.load %arg9[%c0_165, %c0_166, %c0_167] : memref<8x8x128xf32, #tpu.memory_space<vmem>>, vector<1x8x128xf32>
    %683 = vector.shape_cast %682 : vector<1x8x128xf32> to vector<8x128xf32>
    %684 = vector.shape_cast %681 : vector<8x128xf32> to vector<1x8x128xf32>
    tpu.vector_store %arg9[%c0_165, %c0_166, %c0_167], %684 {strides = array<i32>} : memref<8x8x128xf32, #tpu.memory_space<vmem>>, vector<1x8x128xf32>,
    %c0_168 = arith.constant 0 : index
    %c0_169 = arith.constant 0 : index
    %c0_170 = arith.constant 0 : index
    %685 = vector.load %arg6[%c0_168, %c0_169, %c0_170] : memref<8x8x128xf32, #tpu.memory_space<vmem>>, vector<8x8x128xf32>
    %c0_171 = arith.constant 0 : index
    %c0_172 = arith.constant 0 : index
    %c0_173 = arith.constant 0 : index
    %686 = vector.load %arg9[%c0_171, %c0_172, %c0_173] : memref<8x8x128xf32, #tpu.memory_space<vmem>>, vector<8x8x128xf32>
    %687 = arith.addf %685, %686 : vector<8x8x128xf32>
    %c0_174 = arith.constant 0 : index
    %c0_175 = arith.constant 0 : index
    %c0_176 = arith.constant 0 : index
    %688 = vector.load %arg6[%c0_174, %c0_175, %c0_176] : memref<8x8x128xf32, #tpu.memory_space<vmem>>, vector<8x8x128xf32>
    tpu.vector_store %arg6[%c0_174, %c0_175, %c0_176], %687 {strides = array<i32>} : memref<8x8x128xf32, #tpu.memory_space<vmem>>, vector<8x8x128xf32>,
    %c0_177 = arith.constant 0 : index
    %c0_178 = arith.constant 0 : index
    %c0_179 = arith.constant 0 : index
    %689 = vector.load %arg7[%c0_177, %c0_178, %c0_179] : memref<2x8x128xf32, #tpu.memory_space<vmem>>, vector<1x8x128xf32>
    %690 = vector.shape_cast %689 : vector<1x8x128xf32> to vector<8x128xf32>
    %691 = vector.shape_cast %667 : vector<8x128xf32> to vector<1x8x128xf32>
    tpu.vector_store %arg7[%c0_177, %c0_178, %c0_179], %691 {strides = array<i32>} : memref<2x8x128xf32, #tpu.memory_space<vmem>>, vector<1x8x128xf32>,
    %c1_180 = arith.constant 1 : index
    %c0_181 = arith.constant 0 : index
    %c0_182 = arith.constant 0 : index
    %692 = vector.load %arg7[%c1_180, %c0_181, %c0_182] : memref<2x8x128xf32, #tpu.memory_space<vmem>>, vector<1x8x128xf32>
    %693 = vector.shape_cast %692 : vector<1x8x128xf32> to vector<8x128xf32>
    %694 = vector.shape_cast %670 : vector<8x128xf32> to vector<1x8x128xf32>
    tpu.vector_store %arg7[%c1_180, %c0_181, %c0_182], %694 {strides = array<i32>} : memref<2x8x128xf32, #tpu.memory_space<vmem>>, vector<1x8x128xf32>,
    return
  }
}

</mosaic_0001>

<bundles_post_ra>
// kernel: encoder_rnn_forward.1
= control target key start
LH: loop header
LB: loop body
LE: loop exit
PB: predicated region body
PF: predicated region fallthrough
CT: control target
= control target key end

     0   :  { %v5768_v1 = vmov 0   ;;  %vm3950_vm4 = vmmov 0   ;;  %s5760_s2 = inlined_call_operand.vmem [shape: bf16[128,768], index: 2, kind: input, shape index: {}]   ;;  %s5761_s0 = inlined_call_operand.vmem [shape: bf16[64,128], index: 0, kind: input, shape index: {}]   ;;  %s5762_s3 = inlined_call_operand.vmem [shape: bf16[128,384], index: 3, kind: input, shape index: {}]   ;;  %s5763_s4 = inlined_call_operand.vmem [shape: bf16[128,384], index: 4, kind: input, shape index: {}]   ;;  %s5764_s1 = inlined_call_operand.vmem [shape: s32[8,1], index: 1, kind: input, shape index: {}]   ;;  %s5765_s5 = inlined_call_operand.vmem [shape: f32[1,768], index: 5, kind: input, shape index: {}]   ;;  %s5766_s6 = inlined_call_operand.vmem [shape: f32[8,8,128], index: 6, kind: output, shape index: {0}]   ;;  %s5767_s7 = inlined_call_operand.vmem [shape: f32[2,8,128], index: 7, kind: output, shape index: {1}]  }
   0x1   :  { %v3552_v0 = vld [vmem:[%s5760_s2 + $0x4] ss:$24 sps:$4 sm:$0xff]   ;;  %410 = vmatprep.mubr.bf16.mxu0 %v5768_v1  ;;  %483 = vmatprep.mubr.bf16.mxu1 %v5768_v1  ;;  %v3556_v3 = vld [vmem:[%s5760_s2] ss:$24 sps:$4 sm:$0xff]   ;;  %v3558_v5 = vld [vmem:[%s5760_s2 + $0x34] ss:$24 sps:$4 sm:$0xff]  }
   0x2   :  { %v3554_v2 = vld [vmem:[%s5760_s2 + $0xc] ss:$24 sps:$4 sm:$0xff]   ;;  %3550 = vset.pattern.permute.xlu0 %v5768_v1  ;;  %3551 = vset.pattern.permute.xlu1 %v5768_v1  ;;  %v3557_v4 = vld [vmem:[%s5760_s2 + $0x8] ss:$24 sps:$4 sm:$0xff]   ;;  %v3560_v6 = vld [vmem:[%s5760_s2 + $0x3c] ss:$24 sps:$4 sm:$0xff]  }
   0x3   :  { %378 = vmatprep.subr.bf16.mxu0 %v3552_v0  ;;  %451 = vmatprep.subr.bf16.mxu1 %v3554_v2  ;;  %v3562_v7 = vld [vmem:[%s5760_s2 + $0x30] ss:$24 sps:$4 sm:$0xff]   ;;  %v3564_v9 = vld [vmem:[%s5760_s2 + $0x64] ss:$24 sps:$4 sm:$0xff]   ;;  %v3568_v11 = vld [vmem:[%s5760_s2 + $0x60] ss:$24 sps:$4 sm:$0xff]  }
   0x4   :  { %379 = vmatpush1.bf16.msra.mxu0 %v3556_v3  ;;  %452 = vmatpush1.bf16.msra.mxu1 %v3557_v4  ;;  %v3563_v8 = vld [vmem:[%s5760_s2 + $0x38] ss:$24 sps:$4 sm:$0xff]   ;;  %v3566_v10 = vld [vmem:[%s5760_s2 + $0x6c] ss:$24 sps:$4 sm:$0xff]   ;;  %v3569_v12 = vld [vmem:[%s5760_s2 + $0x68] ss:$24 sps:$4 sm:$0xff]  }
   0x5   :  { %380 = vmatprep.subr.bf16.mxu0 %v3558_v5  ;;  %453 = vmatprep.subr.bf16.mxu1 %v3560_v6  ;;  %v3570_v13 = vld [vmem:[%s5760_s2 + $0x94] ss:$24 sps:$4 sm:$0xff]   ;;  %v3574_v15 = vld [vmem:[%s5760_s2 + $0x90] ss:$24 sps:$4 sm:$0xff]   ;;  %v3576_v17 = vld [vmem:[%s5760_s2 + $0xc4] ss:$24 sps:$4 sm:$0xff]  }
   0x6   :  { %v3572_v14 = vld [vmem:[%s5760_s2 + $0x9c] ss:$24 sps:$4 sm:$0xff]   ;;  %v3575_v16 = vld [vmem:[%s5760_s2 + $0x98] ss:$24 sps:$4 sm:$0xff]   ;;  %v3578_v18 = vld [vmem:[%s5760_s2 + $0xcc] ss:$24 sps:$4 sm:$0xff]  }
   0x7   :  { %v3580_v19 = vld [vmem:[%s5760_s2 + $0xc0] ss:$24 sps:$4 sm:$0xff]   ;;  %v3582_v21 = vld [vmem:[%s5760_s2 + $0xf4] ss:$24 sps:$4 sm:$0xff]   ;;  %v3586_v23 = vld [vmem:[%s5760_s2 + $0xf0] ss:$24 sps:$4 sm:$0xff]  }
   0x8   :  { %381 = vmatpush1.bf16.msra.mxu0 %v3562_v7  ;;  %454 = vmatpush1.bf16.msra.mxu1 %v3563_v8  ;;  %v3581_v20 = vld [vmem:[%s5760_s2 + $0xc8] ss:$24 sps:$4 sm:$0xff]   ;;  %v3584_v22 = vld [vmem:[%s5760_s2 + $0xfc] ss:$24 sps:$4 sm:$0xff]   ;;  %v3587_v24 = vld [vmem:[%s5760_s2 + $0xf8] ss:$24 sps:$4 sm:$0xff]  }
   0x9   :  { %382 = vmatprep.subr.bf16.mxu0 %v3564_v9  ;;  %455 = vmatprep.subr.bf16.mxu1 %v3566_v10  ;;  %v3588_v25 = vld [vmem:[%s5760_s2 + $0x124] ss:$24 sps:$4 sm:$0xff]   ;;  %v3592_v27 = vld [vmem:[%s5760_s2 + $0x120] ss:$24 sps:$4 sm:$0xff]   ;;  %v3594_v29 = vld [vmem:[%s5760_s2 + $0x154] ss:$24 sps:$4 sm:$0xff]  }
   0xa   :  { %v3590_v26 = vld [vmem:[%s5760_s2 + $0x12c] ss:$24 sps:$4 sm:$0xff]   ;;  %v3593_v28 = vld [vmem:[%s5760_s2 + $0x128] ss:$24 sps:$4 sm:$0xff]   ;;  %v3596_v30 = vld [vmem:[%s5760_s2 + $0x15c] ss:$24 sps:$4 sm:$0xff]  }
   0xb   :  { %v3598_v31 = vld [vmem:[%s5760_s2 + $0x150] ss:$24 sps:$4 sm:$0xff]   ;;  %v3603_v33 = vld [vmem:[%s5760_s2 + $0x14] ss:$24 sps:$4 sm:$0xff]   ;;  %v4102_v35 = vld [vmem:[%s5761_s0] sm:$0xff]   ;;  %v5775_v9 = vmov 0.0  }
   0xc   :  { %383 = vmatpush1.bf16.msra.mxu0 %v3568_v11  ;;  %456 = vmatpush1.bf16.msra.mxu1 %v3569_v12  ;;  %v3599_v32 = vld [vmem:[%s5760_s2 + $0x158] ss:$24 sps:$4 sm:$0xff]   ;;  %v4110_v37 = vld [vmem:[%s5762_s3] ss:$12 sps:$4 sm:$0xff]   ;;  %v3609_v38 = vld [vmem:[%s5760_s2 + $0x44] ss:$24 sps:$4 sm:$0xff]  }
   0xd   :  { %384 = vmatprep.subr.bf16.mxu0 %v3570_v13  ;;  %457 = vmatprep.subr.bf16.mxu1 %v3572_v14  ;;  %v4097_v34 = vld [vmem:[%s5762_s3 + $0x4] ss:$12 sps:$4 sm:$0xff]   ;;  %v4119_v39 = vld [vmem:[%s5762_s3 + $0x1c] ss:$12 sps:$4 sm:$0xff]   ;;  %v3607_v40 = vld [vmem:[%s5760_s2 + $0x40] ss:$24 sps:$4 sm:$0xff]  }
   0xe   :  { %v3601_v36 = vld [vmem:[%s5760_s2 + $0x10] ss:$24 sps:$4 sm:$0xff]   ;;  %v4130_v41 = vld [vmem:[%s5762_s3 + $0x18] ss:$12 sps:$4 sm:$0xff]   ;;  %v3616_v42 = vld [vmem:[%s5760_s2 + $0x74] ss:$24 sps:$4 sm:$0xff]  }
   0xf   :  { %v4139_v43 = vld [vmem:[%s5762_s3 + $0x34] ss:$12 sps:$4 sm:$0xff]   ;;  %v4146_v44 = vld [vmem:[%s5761_s0 + $0x8] sm:$0xff]   ;;  %v4154_v46 = vld [vmem:[%s5762_s3 + $0x30] ss:$12 sps:$4 sm:$0xff]  }
  0x10   :  { %385 = vmatpush1.bf16.msra.mxu0 %v3574_v15  ;;  %458 = vmatpush1.bf16.msra.mxu1 %v3575_v16  ;;  %v3614_v45 = vld [vmem:[%s5760_s2 + $0x70] ss:$24 sps:$4 sm:$0xff]   ;;  %v3622_v47 = vld [vmem:[%s5760_s2 + $0xa4] ss:$24 sps:$4 sm:$0xff]   ;;  %v4164_v48 = vld [vmem:[%s5762_s3 + $0x4c] ss:$12 sps:$4 sm:$0xff]  }
  0x11   :  { %386 = vmatprep.subr.bf16.mxu0 %v3576_v17  ;;  %459 = vmatprep.subr.bf16.mxu1 %v3578_v18  ;;  %v3620_v49 = vld [vmem:[%s5760_s2 + $0xa0] ss:$24 sps:$4 sm:$0xff]   ;;  %v4174_v50 = vld [vmem:[%s5762_s3 + $0x48] ss:$12 sps:$4 sm:$0xff]   ;;  %v4184_v52 = vld [vmem:[%s5762_s3 + $0x64] ss:$12 sps:$4 sm:$0xff]  }
  0x12   :  { %v3629_v51 = vld [vmem:[%s5760_s2 + $0xd4] ss:$24 sps:$4 sm:$0xff]   ;;  %v3627_v54 = vld [vmem:[%s5760_s2 + $0xd0] ss:$24 sps:$4 sm:$0xff]   ;;  %v3635_v56 = vld [vmem:[%s5760_s2 + $0x104] ss:$24 sps:$4 sm:$0xff]  }
  0x13   :  { %v4191_v53 = vld [vmem:[%s5761_s0 + $0x10] sm:$0xff]   ;;  %v4200_v55 = vld [vmem:[%s5762_s3 + $0x60] ss:$12 sps:$4 sm:$0xff]   ;;  %v4209_v57 = vld [vmem:[%s5762_s3 + $0x7c] ss:$12 sps:$4 sm:$0xff]  }
  0x14   :  { %387 = vmatpush1.bf16.msra.mxu0 %v3580_v19  ;;  %460 = vmatpush1.bf16.msra.mxu1 %v3581_v20  ;;  %v3633_v58 = vld [vmem:[%s5760_s2 + $0x100] ss:$24 sps:$4 sm:$0xff]   ;;  %v3642_v60 = vld [vmem:[%s5760_s2 + $0x134] ss:$24 sps:$4 sm:$0xff]   ;;  %v3640_v63 = vld [vmem:[%s5760_s2 + $0x130] ss:$24 sps:$4 sm:$0xff]  }
  0x15   :  { %388 = vmatprep.subr.bf16.mxu0 %v3582_v21  ;;  %461 = vmatprep.subr.bf16.mxu1 %v3584_v22  ;;  %v4220_v59 = vld [vmem:[%s5762_s3 + $0x78] ss:$12 sps:$4 sm:$0xff]   ;;  %v4229_v61 = vld [vmem:[%s5762_s3 + $0x94] ss:$12 sps:$4 sm:$0xff]   ;;  %v4244_v0 = vld [vmem:[%s5762_s3 + $0x90] ss:$12 sps:$4 sm:$0xff]  }
  0x16   :  { %v4236_v62 = vld [vmem:[%s5761_s0 + $0x18] sm:$0xff]   ;;  %v4265_v5 = vld [vmem:[%s5762_s3 + $0xa8] ss:$12 sps:$4 sm:$0xff]   ;;  %v4271_v6 = vld [vmem:[%s5763_s4 + $0x4] ss:$12 sps:$4 sm:$0xff]  }
  0x17   :  { %v3648_v2 = vld [vmem:[%s5760_s2 + $0x164] ss:$24 sps:$4 sm:$0xff]   ;;  %v4254_v3 = vld [vmem:[%s5762_s3 + $0xac] ss:$12 sps:$4 sm:$0xff]   ;;  %v4278_v7 = vld [vmem:[%s5762_s3 + $0x8] ss:$12 sps:$4 sm:$0xff]  }
  0x18   :  { %389 = vmatpush1.bf16.msra.mxu0 %v3586_v23  ;;  %462 = vmatpush1.bf16.msra.mxu1 %v3587_v24  ;;  %v3646_v4 = vld [vmem:[%s5760_s2 + $0x160] ss:$24 sps:$4 sm:$0xff]   ;;  %v4291_v10 = vld [vmem:[%s5763_s4 + $0x1c] ss:$12 sps:$4 sm:$0xff]   ;;  %v4361_v21 = vld [vmem:[%s5763_s4 + $0x64] ss:$12 sps:$4 sm:$0xff]  }
  0x19   :  { %390 = vmatprep.subr.bf16.mxu0 %v3588_v25  ;;  %463 = vmatprep.subr.bf16.mxu1 %v3590_v26  ;;  %v4284_v8 = vld [vmem:[%s5763_s4] ss:$12 sps:$4 sm:$0xff]   ;;  %v4305_v12 = vld [vmem:[%s5763_s4 + $0x18] ss:$12 sps:$4 sm:$0xff]   ;;  %v4326_v15 = vld [vmem:[%s5763_s4 + $0x30] ss:$12 sps:$4 sm:$0xff]  }
  0x1a   :  { %v4298_v11 = vld [vmem:[%s5762_s3 + $0x20] ss:$12 sps:$4 sm:$0xff]   ;;  %v4319_v14 = vld [vmem:[%s5762_s3 + $0x38] ss:$12 sps:$4 sm:$0xff]   ;;  %v4348_v19 = vld [vmem:[%s5762_s3 + $0x50] ss:$12 sps:$4 sm:$0xff]  }
  0x1b   :  { %v4312_v13 = vld [vmem:[%s5763_s4 + $0x34] ss:$12 sps:$4 sm:$0xff]   ;;  %v4333_v16 = vld [vmem:[%s5763_s4 + $0x4c] ss:$12 sps:$4 sm:$0xff]   ;;  %v4383_v25 = vld [vmem:[%s5763_s4 + $0x7c] ss:$12 sps:$4 sm:$0xff]  }
  0x1c   :  { %391 = vmatpush1.bf16.msra.mxu0 %v3592_v27  ;;  %464 = vmatpush1.bf16.msra.mxu1 %v3593_v28  ;;  %v4338_v17 = vld [vmem:[%s5764_s1] sm:$0xff]  ;;  %v4353_v20 = vld [vmem:[%s5763_s4 + $0x48] ss:$12 sps:$4 sm:$0xff]  }
  0x1d   :  { %392 = vmatprep.subr.bf16.mxu0 %v3594_v29  ;;  %465 = vmatprep.subr.bf16.mxu1 %v3596_v30  ;;  %vm1191_vm0 = vcmp.gt.s32.totalorder %v4338_v17, 0  ;;  %vm1192_vm1 = vcmp.gt.s32.totalorder %v4338_v17, 7  ;;  %v4370_v23 = vld [vmem:[%s5762_s3 + $0x68] ss:$12 sps:$4 sm:$0xff]   ;;  %v4375_v24 = vld [vmem:[%s5763_s4 + $0x60] ss:$12 sps:$4 sm:$0xff]  }
  0x1e   :  { %v1193_v18 = vsel %vm1191_vm0, 1, %v5768_v1  ;;  %v1199_v22 = vsel %vm1192_vm1, 1, %v5768_v1  ;;  %vm1682_vm2 = vcmp.gt.s32.totalorder %v4338_v17, 2  ;;  %v4392_v27 = vld [vmem:[%s5762_s3 + $0x80] ss:$12 sps:$4 sm:$0xff]   ;;  %vm1929_vm3 = vcmp.gt.s32.totalorder %v4338_v17, 3 }
  0x1f   :  { %1195 = vperm.xlu0 %3550, %v1193_v18   ;;  %v1684_v26 = vsel %vm1682_vm2, 1, %v5768_v1  ;;  %v4397_v28 = vld [vmem:[%s5763_s4 + $0x78] ss:$12 sps:$4 sm:$0xff]   ;;  %v4405_v29 = vld [vmem:[%s5763_s4 + $0x94] ss:$12 sps:$4 sm:$0xff]   ;;  %v1931_v30 = vsel %vm1929_vm3, 1, %v5768_v1 }
  0x20   :  { %393 = vmatpush1.bf16.msra.mxu0 %v3598_v31  ;;  %466 = vmatpush1.bf16.msra.mxu1 %v3599_v32  ;;  %v4414_v31 = vld [vmem:[%s5762_s3 + $0x98] ss:$12 sps:$4 sm:$0xff]   ;;  %v4419_v32 = vld [vmem:[%s5763_s4 + $0x90] ss:$12 sps:$4 sm:$0xff]   ;;  %vm1435_vm5 = vcmp.gt.s32.totalorder %v4338_v17, 1  ;;  %vm1436_vm6 = vcmp.gt.s32.totalorder %v4338_v17, 6 }
  0x21   :  { %524 = vmatprep.subr.bf16.mxu0 %v3603_v33  ;;  %859 = vmatprep.subr.bf16.mxu1 %v4097_v34  ;;  %v4426_v33 = vld [vmem:[%s5763_s4 + $0xac] ss:$12 sps:$4 sm:$0xff]   ;;  %vm1683_vm7 = vcmp.gt.s32.totalorder %v4338_v17, 5  ;;  %vm1930_vm8 = vcmp.gt.s32.totalorder %v4338_v17, 4 }
  0x23   :  { %411 = vmatmul.mubr.bf16.vlgmr.msra.gmra.mrb[0].mxu0 %v4102_v35  ;;  %484 = vmatmul.mubr.bf16.vlgmr.msra.gmra.mrb[0].mxu1 %v4102_v35 }
  0x24   :  { %525 = vmatpush1.bf16.msra.mxu0 %v3601_v36  ;;  %860 = vmatpush1.bf16.msra.mxu1 %v4110_v37  ;;  %v4439_v36 = vld [vmem:[%s5763_s4 + $0xa8] ss:$12 sps:$4 sm:$0xff]  }
  0x25   :  { %526 = vmatprep.subr.bf16.mxu0 %v3609_v38  ;;  %861 = vmatprep.subr.bf16.mxu1 %v4119_v39  ;;  %v4450_v38 = vld [vmem:[%s5763_s4 + $0x8] ss:$12 sps:$4 sm:$0xff]  }
  0x26   :  { %420 = vmatprep.mubr.bf16.mxu0 %v5768_v1  ;;  %493 = vmatprep.mubr.bf16.mxu1 %v5768_v1 }
  0x27   :  { %1201 = vperm.xlu0 %3550, %v1199_v22  }
  0x28   :  { %527 = vmatpush1.bf16.msra.mxu0 %v3607_v40  ;;  %862 = vmatpush1.bf16.msra.mxu1 %v4130_v41  ;;  %v4460_v40 = vld [vmem:[%s5763_s4 + $0x20] ss:$12 sps:$4 sm:$0xff]  }
  0x29   :  { %528 = vmatprep.subr.bf16.mxu0 %v3616_v42  ;;  %863 = vmatprep.subr.bf16.mxu1 %v4139_v43  ;;  %v4508_v42 = vld [vmem:[%s5763_s4 + $0x98] ss:$12 sps:$4 sm:$0xff]  }
  0x2b   :  { %421 = vmatmul.mubr.bf16.gmra.mrb[4].mxu0 %v4146_v44  ;;  %494 = vmatmul.mubr.bf16.gmra.mrb[4].mxu1 %v4146_v44 }
  0x2c   :  { %529 = vmatpush1.bf16.msra.mxu0 %v3614_v45  ;;  %864 = vmatpush1.bf16.msra.mxu1 %v4154_v46 }
  0x2d   :  { %530 = vmatprep.subr.bf16.mxu0 %v3622_v47  ;;  %865 = vmatprep.subr.bf16.mxu1 %v4164_v48 }
  0x2e   :  { %430 = vmatprep.mubr.bf16.mxu0 %v5768_v1  ;;  %503 = vmatprep.mubr.bf16.mxu1 %v5768_v1 }
  0x2f   :  { %1686 = vperm.xlu0 %3550, %v1684_v26  }
  0x30   :  { %531 = vmatpush1.bf16.msra.mxu0 %v3620_v49  ;;  %866 = vmatpush1.bf16.msra.mxu1 %v4174_v50  ;;  %v1443_v49 = vsel %vm1436_vm6, 1, %v5768_v1 }
  0x31   :  { %532 = vmatprep.subr.bf16.mxu0 %v3629_v51  ;;  %867 = vmatprep.subr.bf16.mxu1 %v4184_v52 }
  0x33   :  { %431 = vmatmul.mubr.bf16.gmra.mrb[8].mxu0 %v4191_v53  ;;  %504 = vmatmul.mubr.bf16.gmra.mrb[8].mxu1 %v4191_v53 }
  0x34   :  { %533 = vmatpush1.bf16.msra.mxu0 %v3627_v54  ;;  %868 = vmatpush1.bf16.msra.mxu1 %v4200_v55 }
  0x35   :  { %534 = vmatprep.subr.bf16.mxu0 %v3635_v56  ;;  %869 = vmatprep.subr.bf16.mxu1 %v4209_v57 }
  0x36   :  { %440 = vmatprep.mubr.bf16.mxu0 %v5768_v1  ;;  %513 = vmatprep.mubr.bf16.mxu1 %v5768_v1 }
  0x37   :  { %1933 = vperm.xlu0 %3550, %v1931_v30  }
  0x38   :  { %535 = vmatpush1.bf16.msra.mxu0 %v3633_v58  ;;  %870 = vmatpush1.bf16.msra.mxu1 %v4220_v59 }
  0x39   :  { %536 = vmatprep.subr.bf16.mxu0 %v3642_v60  ;;  %871 = vmatprep.subr.bf16.mxu1 %v4229_v61 }
  0x3b   :  { %441 = vmatmul.mubr.bf16.gmra.mrb[12].mxu0 %v4236_v62  ;;  %514 = vmatmul.mubr.bf16.gmra.mrb[12].mxu1 %v4236_v62 }
  0x3c   :  { %537 = vmatpush1.bf16.msra.mxu0 %v3640_v63  ;;  %872 = vmatpush1.bf16.msra.mxu1 %v4244_v0 }
  0x3d   :  { %538 = vmatprep.subr.bf16.mxu0 %v3648_v2  ;;  %873 = vmatprep.subr.bf16.mxu1 %v4254_v3 }
  0x3e   :  { %556 = vmatprep.mubr.bf16.mxu0 %v5768_v1  ;;  %891 = vmatprep.mubr.bf16.mxu1 %v5768_v1 }
  0x40   :  { %539 = vmatpush1.bf16.msra.mxu0 %v3646_v4  ;;  %874 = vmatpush1.bf16.msra.mxu1 %v4265_v5 }
  0x41   :  { %3227 = vmatprep.subr.bf16.mxu0 %v5775_v9  ;;  %1068 = vmatprep.subr.bf16.mxu1 %v4271_v6 }
  0x43   :  { %557 = vmatmul.mubr.bf16.vlgmr.msra.gmra.mrb[16].mxu0 %v4102_v35  ;;  %892 = vmatmul.mubr.bf16.vlgmr.msra.gmra.mrb[16].mxu1 %v5768_v1  ;;  %v4434_v35 = vld [vmem:[%s5762_s3 + $0xb0] ss:$12 sps:$4 sm:$0xff]  }
  0x44   :  { %3228 = vmatpush3.bf16.msra.mxu0 %v4278_v7  ;;  %1069 = vmatpush1.bf16.msra.mxu1 %v4284_v8 }
  0x45   :  { %3229 = vmatprep.subr.bf16.mxu0 %v5775_v9  ;;  %1070 = vmatprep.subr.bf16.mxu1 %v4291_v10 }
  0x46   :  { %566 = vmatprep.mubr.bf16.mxu0 %v5768_v1  ;;  %1100 = vmatprep.mubr.bf16.mxu1 %v5768_v1 }
  0x48   :  { %3230 = vmatpush3.bf16.msra.mxu0 %v4298_v11  ;;  %1071 = vmatpush1.bf16.msra.mxu1 %v4305_v12 }
  0x49   :  { %3231 = vmatprep.subr.bf16.mxu0 %v5775_v9  ;;  %1072 = vmatprep.subr.bf16.mxu1 %v4312_v13 }
  0x4b   :  { %567 = vmatmul.mubr.bf16.gmra.mrb[20].mxu0 %v4146_v44  ;;  %v84_v44 = vlaneseq }
  0x4c   :  { %3232 = vmatpush3.bf16.msra.mxu0 %v4319_v14  ;;  %1073 = vmatpush1.bf16.msra.mxu1 %v4326_v15 }
  0x4d   :  { %3233 = vmatprep.subr.bf16.mxu0 %v5775_v9  ;;  %1074 = vmatprep.subr.bf16.mxu1 %v4333_v16  ;;  %v4545_v45 = vshrl.u32 %v84_v44, 7 }
  0x4e   :  { %576 = vmatprep.mubr.bf16.mxu0 %v5768_v1 }
  0x4f   :  { %v86_v47 = vsub.s32 0, %v4545_v45  ;;  %v98_v51 = vsub.s32 3, %v4545_v45 }
  0x50   :  { %3234 = vmatpush3.bf16.msra.mxu0 %v4348_v19  ;;  %1075 = vmatpush1.bf16.msra.mxu1 %v4353_v20 }
  0x51   :  { %3235 = vmatprep.subr.bf16.mxu0 %v5775_v9  ;;  %1076 = vmatprep.subr.bf16.mxu1 %v4361_v21 }
  0x53   :  { %577 = vmatmul.mubr.bf16.gmra.mrb[24].mxu0 %v4191_v53 }
  0x54   :  { %3236 = vmatpush3.bf16.msra.mxu0 %v4370_v23  ;;  %1077 = vmatpush1.bf16.msra.mxu1 %v4375_v24 }
  0x55   :  { %3237 = vmatprep.subr.bf16.mxu0 %v5775_v9  ;;  %1078 = vmatprep.subr.bf16.mxu1 %v4383_v25 }
  0x56   :  { %586 = vmatprep.mubr.bf16.mxu0 %v5768_v1 }
  0x58   :  { %3238 = vmatpush3.bf16.msra.mxu0 %v4392_v27  ;;  %1079 = vmatpush1.bf16.msra.mxu1 %v4397_v28 }
  0x59   :  { %3239 = vmatprep.subr.bf16.mxu0 %v5775_v9  ;;  %1080 = vmatprep.subr.bf16.mxu1 %v4405_v29 }
  0x5b   :  { %587 = vmatmul.mubr.bf16.gmra.mrb[28].mxu0 %v4236_v62 }
  0x5c   :  { %3240 = vmatpush3.bf16.msra.mxu0 %v4414_v31  ;;  %1081 = vmatpush1.bf16.msra.mxu1 %v4419_v32 }
  0x5d   :  { %3241 = vmatprep.subr.bf16.mxu0 %v5775_v9  ;;  %1082 = vmatprep.subr.bf16.mxu1 %v4426_v33 }
  0x5e   :  { %3243 = vmatprep.mubr.msk.bf16.mxu0 %vm3950_vm4, %v5775_v9 }
  0x60   :  { %3242 = vmatpush3.bf16.msra.mxu0 %v4434_v35  ;;  %1083 = vmatpush1.bf16.msra.mxu1 %v4439_v36 }
  0x61   :  { %3247 = vmatprep.subr.bf16.mxu0 %v5775_v9  ;;  %1230 = vmatprep.subr.bf16.mxu1 %v4097_v34  ;;  %v4472_v34 = vld [vmem:[%s5763_s4 + $0x38] ss:$12 sps:$4 sm:$0xff]  }
  0x63   :  { %3244 = vmatmul.mubr.bf16.vlgmr.msra.gmra.mrb[32].mxu0 %v5768_v1  ;;  %1101 = vmatmul.mubr.bf16.vlgmr.msra.gmra.mrb[20].mxu1 %v5768_v1 }
  0x64   :  { %3248 = vmatpush3.bf16.msra.mxu0 %v4450_v38  ;;  %3263 = vmatprep.mubr.msk.bf16.mxu0 %vm3950_vm4, %v5775_v9 }
  0x65   :  { %3249 = vmatprep.subr.bf16.mxu0 %v5775_v9  ;;  %1231 = vmatpush1.bf16.msra.mxu1 %v4110_v37  ;;  %v4481_v37 = vld [vmem:[%s5763_s4 + $0x50] ss:$12 sps:$4 sm:$0xff]  }
  0x66   :  { %1232 = vmatprep.subr.bf16.mxu1 %v4119_v39  ;;  %1262 = vmatprep.mubr.bf16.mxu1 %v5768_v1  ;;  %v4490_v39 = vld [vmem:[%s5763_s4 + $0x68] ss:$12 sps:$4 sm:$0xff]  }
  0x68   :  { %3250 = vmatpush3.bf16.msra.mxu0 %v4460_v40 }
  0x69   :  { %3251 = vmatprep.subr.bf16.mxu0 %v5775_v9  ;;  %1233 = vmatpush1.bf16.msra.mxu1 %v4130_v41  ;;  %v4499_v41 = vld [vmem:[%s5763_s4 + $0x80] ss:$12 sps:$4 sm:$0xff]  }
  0x6a   :  { %1234 = vmatprep.subr.bf16.mxu1 %v4139_v43  ;;  %v4517_v43 = vld [vmem:[%s5763_s4 + $0xb0] ss:$12 sps:$4 sm:$0xff]  }
  0x6c   :  { %3252 = vmatpush3.bf16.msra.mxu0 %v4472_v34 }
  0x6d   :  { %3253 = vmatprep.subr.bf16.mxu0 %v5775_v9  ;;  %1235 = vmatpush1.bf16.msra.mxu1 %v4154_v46  ;;  %v1437_v46 = vsel %vm1435_vm5, 1, %v5768_v1 }
  0x6e   :  { %1236 = vmatprep.subr.bf16.mxu1 %v4164_v48  ;;  %1439 = vperm.xlu1 %3551, %v1437_v46   ;;  %v94_v48 = vsub.s32 2, %v4545_v45 }
  0x70   :  { %3254 = vmatpush3.bf16.msra.mxu0 %v4481_v37 }
  0x71   :  { %3255 = vmatprep.subr.bf16.mxu0 %v5775_v9  ;;  %1237 = vmatpush1.bf16.msra.mxu1 %v4174_v50  ;;  %v4556_v50 = vld [vmem:[%s5765_s5] sm:$0x3f] }
  0x72   :  { %1238 = vmatprep.subr.bf16.mxu1 %v4184_v52  ;;  %v90_v52 = vsub.s32 1, %v4545_v45  ;;  %1445 = vperm.xlu1 %3551, %v1443_v49   ;;  %v4562_v53 = vrot.slane %v4556_v50, %v86_v47  ;;  %v4565_v54 = vrot.slane %v4556_v50, %v94_v48  ;;  %v4569_v56 = vrot.slane %v4556_v50, %v98_v51 }
  0x74   :  { %3256 = vmatpush3.bf16.msra.mxu0 %v4490_v39  ;;  %v4573_v58 = vrot.slane %v4556_v50, %v90_v52 }
  0x75   :  { %3257 = vmatprep.subr.bf16.mxu0 %v5775_v9  ;;  %1239 = vmatpush1.bf16.msra.mxu1 %v4200_v55  ;;  %v1690_v55 = vsel %vm1683_vm7, 1, %v5768_v1 }
  0x76   :  { %1240 = vmatprep.subr.bf16.mxu1 %v4209_v57  ;;  %1692 = vperm.xlu1 %3551, %v1690_v55  }
  0x78   :  { %3258 = vmatpush3.bf16.msra.mxu0 %v4499_v41 }
  0x79   :  { %3259 = vmatprep.subr.bf16.mxu0 %v5775_v9  ;;  %1241 = vmatpush1.bf16.msra.mxu1 %v4220_v59 }
  0x7a   :  { %1242 = vmatprep.subr.bf16.mxu1 %v4229_v61 }
  0x7c   :  { %3260 = vmatpush3.bf16.msra.mxu0 %v4508_v42 }
  0x7d   :  { %3261 = vmatprep.subr.bf16.mxu0 %v5775_v9  ;;  %1243 = vmatpush1.bf16.msra.mxu1 %v4244_v0  ;;  %v1937_v0 = vsel %vm1930_vm8, 1, %v5768_v1 }
  0x7e   :  { %1244 = vmatprep.subr.bf16.mxu1 %v4254_v3  ;;  %1939 = vperm.xlu1 %3551, %v1937_v0  }
  0x80   :  { %3262 = vmatpush3.bf16.msra.mxu0 %v4517_v43 }
  0x81   :  { %3267 = vmatprep.subr.bf16.mxu0 %v5775_v9  ;;  %1245 = vmatpush1.bf16.msra.mxu1 %v4265_v5 }
  0x82   :  { %1312 = vmatprep.subr.bf16.mxu1 %v4271_v6 }
  0x83   :  { %3264 = vmatmul.mubr.bf16.vlgmr.msra.gmra.mrb[36].mxu0 %v5768_v1 }
  0x84   :  { %3268 = vmatpush3.bf16.msra.mxu0 %v4278_v7  ;;  %3283 = vmatprep.mubr.msk.bf16.mxu0 %vm3950_vm4, %v5775_v9 }
  0x85   :  { %3269 = vmatprep.subr.bf16.mxu0 %v5775_v9 }
  0x88   :  { %3270 = vmatpush3.bf16.msra.mxu0 %v4298_v11 }
  0x89   :  { %3271 = vmatprep.subr.bf16.mxu0 %v5775_v9 }
  0x8c   :  { %3272 = vmatpush3.bf16.msra.mxu0 %v4319_v14 }
  0x8d   :  { %3273 = vmatprep.subr.bf16.mxu0 %v5775_v9 }
  0x90   :  { %3274 = vmatpush3.bf16.msra.mxu0 %v4348_v19 }
  0x91   :  { %3275 = vmatprep.subr.bf16.mxu0 %v5775_v9 }
  0x94   :  { %3276 = vmatpush3.bf16.msra.mxu0 %v4370_v23 }
  0x95   :  { %3277 = vmatprep.subr.bf16.mxu0 %v5775_v9 }
  0x98   :  { %3278 = vmatpush3.bf16.msra.mxu0 %v4392_v27 }
  0x99   :  { %3279 = vmatprep.subr.bf16.mxu0 %v5775_v9 }
  0x9c   :  { %3280 = vmatpush3.bf16.msra.mxu0 %v4414_v31 }
  0x9d   :  { %3281 = vmatprep.subr.bf16.mxu0 %v5775_v9 }
  0xa0   :  { %3282 = vmatpush3.bf16.msra.mxu0 %v4434_v35 }
  0xa1   :  { %3287 = vmatprep.subr.bf16.mxu0 %v5775_v9 }
  0xf6   :  { %v412_v57 = vpop.f32.mrb[0].mxu0  ;;  %v485_v59 = vpop.f32.mrb[0].mxu1 }
  0xf7   :  { %v413_v60 = vadd.f32 %v412_v57, %v4562_v53  ;;  %v414_v61 = vpop.f32.mrb[1].mxu0  ;;  %v486_v62 = vadd.f32 %v485_v59, %v4565_v54  ;;  %v487_v63 = vpop.f32.mrb[1].mxu1 }
  0xf8   :  { %v416_v2 = vpop.f32.mrb[2].mxu0  ;;  %v488_v3 = vadd.f32 %v487_v63, %v4569_v56  ;;  %v489_v4 = vpop.f32.mrb[2].mxu1  ;;  %v415_v30 = vadd.f32 %v414_v61, %v4573_v58 }
  0xf9   :  { %v417_v17 = vadd.f32 %v416_v2, %v4562_v53  ;;  %v418_v18 = vpop.f32.mrb[3].mxu0  ;;  %v490_v22 = vadd.f32 %v489_v4, %v4565_v54  ;;  %v491_v26 = vpop.f32.mrb[3].mxu1 }
  0xfa   :  { %v419_v44 = vadd.f32 %v418_v18, %v4573_v58  ;;  %v492_v46 = vadd.f32 %v491_v26, %v4569_v56 }
  0xfb   :  { %v597_v47 = vpack.c.bf16 %v417_v17, %v413_v60  ;;  %v599_v48 = vpack.c.bf16 %v490_v22, %v486_v62 }
  0xfc   :  { %v598_v49 = vpack.c.bf16 %v419_v44, %v415_v30  ;;  %v600_v51 = vpack.c.bf16 %v492_v46, %v488_v3 }
  0xfd   :  { %621 = vst [vmem:[#allocation2] sm:$0xff] %v597_v47  ;;  %623 = vst [vmem:[#allocation2 + $0x10] sm:$0xff] %v599_v48 }
  0xfe   :  { %622 = vst [vmem:[#allocation2 + $0x8] sm:$0xff] %v598_v49  ;;  %624 = vst [vmem:[#allocation2 + $0x18] sm:$0xff] %v600_v51  ;;  %v422_v52 = vpop.f32.mrb[4].mxu0  ;;  %v495_v55 = vpop.f32.mrb[4].mxu1 }
  0xff   :  { %v423_v57 = vadd.f32 %v422_v52, %v4562_v53  ;;  %v424_v59 = vpop.f32.mrb[5].mxu0  ;;  %v496_v61 = vadd.f32 %v495_v55, %v4565_v54  ;;  %v497_v63 = vpop.f32.mrb[5].mxu1 }
 0x100   :  { %v426_v2 = vpop.f32.mrb[6].mxu0  ;;  %v498_v4 = vadd.f32 %v497_v63, %v4569_v56  ;;  %v499_v0 = vpop.f32.mrb[6].mxu1  ;;  %v425_v18 = vadd.f32 %v424_v59, %v4573_v58 }
 0x101   :  { %v427_v60 = vadd.f32 %v426_v2, %v4562_v53  ;;  %v428_v62 = vpop.f32.mrb[7].mxu0  ;;  %v500_v3 = vadd.f32 %v499_v0, %v4565_v54  ;;  %v501_v17 = vpop.f32.mrb[7].mxu1 }
 0x102   :  { %v429_v22 = vadd.f32 %v428_v62, %v4573_v58  ;;  %v502_v26 = vadd.f32 %v501_v17, %v4569_v56 }
 0x103   :  { %v603_v30 = vpack.c.bf16 %v427_v60, %v423_v57  ;;  %v605_v44 = vpack.c.bf16 %v500_v3, %v496_v61 }
 0x104   :  { %v604_v46 = vpack.c.bf16 %v429_v22, %v425_v18  ;;  %v606_v47 = vpack.c.bf16 %v502_v26, %v498_v4 }
 0x105   :  { %627 = vst [vmem:[#allocation2 + $0x30] sm:$0xff] %v603_v30  ;;  %629 = vst [vmem:[#allocation2 + $0x40] sm:$0xff] %v605_v44 }
 0x106   :  { %628 = vst [vmem:[#allocation2 + $0x38] sm:$0xff] %v604_v46  ;;  %630 = vst [vmem:[#allocation2 + $0x48] sm:$0xff] %v606_v47  ;;  %v432_v48 = vpop.f32.mrb[8].mxu0  ;;  %v505_v49 = vpop.f32.mrb[8].mxu1 }
 0x107   :  { %v433_v51 = vadd.f32 %v432_v48, %v4562_v53  ;;  %v434_v52 = vpop.f32.mrb[9].mxu0  ;;  %v506_v55 = vadd.f32 %v505_v49, %v4565_v54  ;;  %v507_v59 = vpop.f32.mrb[9].mxu1 }
 0x108   :  { %v436_v63 = vpop.f32.mrb[10].mxu0  ;;  %v508_v2 = vadd.f32 %v507_v59, %v4569_v56  ;;  %v509_v0 = vpop.f32.mrb[10].mxu1  ;;  %v435_v62 = vadd.f32 %v434_v52, %v4573_v58  ;;  %v102_v59 = vsub.s32 4, %v4545_v45 }
 0x109   :  { %v437_v57 = vadd.f32 %v436_v63, %v4562_v53  ;;  %v438_v61 = vpop.f32.mrb[11].mxu0  ;;  %v510_v4 = vadd.f32 %v509_v0, %v4565_v54  ;;  %v511_v60 = vpop.f32.mrb[11].mxu1 }
 0x10a   :  { %v439_v3 = vadd.f32 %v438_v61, %v4573_v58  ;;  %v512_v17 = vadd.f32 %v511_v60, %v4569_v56 }
 0x10b   :  { %v609_v18 = vpack.c.bf16 %v437_v57, %v433_v51  ;;  %v611_v22 = vpack.c.bf16 %v510_v4, %v506_v55 }
 0x10c   :  { %v610_v26 = vpack.c.bf16 %v439_v3, %v435_v62  ;;  %v612_v30 = vpack.c.bf16 %v512_v17, %v508_v2  ;;  %v710_v3 = vld [vmem:[#allocation2] ss:$8 sps:$4 sm:$0xff]   ;;  %v106_v17 = vsub.s32 5, %v4545_v45 }
 0x10d   :  { %633 = vst [vmem:[#allocation2 + $0x60] sm:$0xff] %v609_v18  ;;  %635 = vst [vmem:[#allocation2 + $0x70] sm:$0xff] %v611_v22 }
 0x10e   :  { %634 = vst [vmem:[#allocation2 + $0x68] sm:$0xff] %v610_v26  ;;  %636 = vst [vmem:[#allocation2 + $0x78] sm:$0xff] %v612_v30  ;;  %v442_v44 = vpop.f32.mrb[12].mxu0  ;;  %v515_v46 = vpop.f32.mrb[12].mxu1  ;;  %v4611_v26 = vrot.slane %v4556_v50, %v102_v59 }
 0x10f   :  { %v443_v47 = vadd.f32 %v442_v44, %v4562_v53  ;;  %v444_v48 = vpop.f32.mrb[13].mxu0  ;;  %v516_v49 = vadd.f32 %v515_v46, %v4565_v54  ;;  %v517_v52 = vpop.f32.mrb[13].mxu1 }
 0x110   :  { %v446_v63 = vpop.f32.mrb[14].mxu0  ;;  %v518_v51 = vadd.f32 %v517_v52, %v4569_v56  ;;  %v519_v55 = vpop.f32.mrb[14].mxu1  ;;  %v445_v4 = vadd.f32 %v444_v48, %v4573_v58 }
 0x111   :  { %v447_v2 = vadd.f32 %v446_v63, %v4562_v53  ;;  %v448_v0 = vpop.f32.mrb[15].mxu0  ;;  %v520_v57 = vadd.f32 %v519_v55, %v4565_v54  ;;  %v521_v61 = vpop.f32.mrb[15].mxu1  ;;  %v713_v54 = vunpack.c.l.bf16 %v710_v3 }
 0x112   :  { %v449_v60 = vadd.f32 %v448_v0, %v4573_v58  ;;  %v522_v62 = vadd.f32 %v521_v61, %v4569_v56  ;;  %v107_v58 = vrot.slane %v4556_v50, %v106_v17  ;;  %v714_v61 = vunpack.c.h.bf16 %v710_v3 }
 0x113   :  { %v615_v18 = vpack.c.bf16 %v447_v2, %v443_v47  ;;  %v617_v22 = vpack.c.bf16 %v520_v57, %v516_v49 }
 0x114   :  { %v616_v30 = vpack.c.bf16 %v449_v60, %v445_v4  ;;  %v618_v53 = vpack.c.bf16 %v522_v62, %v518_v51 }
 0x115   :  { %639 = vst [vmem:[#allocation2 + $0x90] sm:$0xff] %v615_v18  ;;  %641 = vst [vmem:[#allocation2 + $0xa0] sm:$0xff] %v617_v22 }
 0x116   :  { %640 = vst [vmem:[#allocation2 + $0x98] sm:$0xff] %v616_v30  ;;  %642 = vst [vmem:[#allocation2 + $0xa8] sm:$0xff] %v618_v53  ;;  %v558_v44 = vpop.f32.mrb[16].mxu0  ;;  %v893_v46 = vpop.f32.mrb[16].mxu1 }
 0x117   :  { %v559_v56 = vadd.f32 %v558_v44, %v4611_v26  ;;  %v1149_v48 = vadd.f32 %v893_v46, %v713_v54  ;;  %v560_v45 = vpop.f32.mrb[17].mxu0  ;;  %v895_v47 = vpop.f32.mrb[17].mxu1 }
 0x118   :  { %v562_v49 = vpop.f32.mrb[18].mxu0  ;;  %v897_v52 = vpop.f32.mrb[18].mxu1  ;;  %v561_v2 = vadd.f32 %v560_v45, %v107_v58  ;;  %v1156_v50 = vadd.f32 %v895_v47, %v714_v61 }
 0x119   :  { %v3031_v59 = vmul.f32 -1.442695, %v1149_v48  ;;  %v563_v63 = vadd.f32 %v562_v49, %v4611_v26  ;;  %v564_v51 = vpop.f32.mrb[19].mxu0  ;;  %v898_v55 = vpop.f32.mrb[19].mxu1 }
 0x11a   :  { %v565_v0 = vadd.f32 %v564_v51, %v107_v58  ;;  %v3032_v53 = vmul.f32 -1.442695, %v1156_v50 }
 0x11b   :  { %3692 = vpow2.f32 %v3031_v59  ;;  %v601_v57 = vpack.c.bf16 %v563_v63, %v559_v56 }
 0x11c   :  { %v602_v4 = vpack.c.bf16 %v565_v0, %v561_v2  ;;  %3694 = vpow2.f32 %v3032_v53 }
 0x11d   :  { %625 = vst [vmem:[#allocation2 + $0x20] sm:$0xff] %v601_v57  ;;  %v716_v61 = vld [vmem:[#allocation2 + $0xa8] sm:$0xf0] }
 0x11e   :  { %626 = vst [vmem:[#allocation2 + $0x28] sm:$0xff] %v602_v4  ;;  %v568_v60 = vpop.f32.mrb[20].mxu0 }
 0x11f   :  { %v569_v62 = vadd.f32 %v568_v60, %v4611_v26  ;;  %v570_v17 = vpop.f32.mrb[21].mxu0 }
 0x120   :  { %v572_v18 = vpop.f32.mrb[22].mxu0  ;;  %v571_v54 = vadd.f32 %v570_v17, %v107_v58 }
 0x121   :  { %v573_v22 = vadd.f32 %v572_v18, %v4611_v26  ;;  %v574_v30 = vpop.f32.mrb[23].mxu0 }
 0x122   :  { %v575_v44 = vadd.f32 %v574_v30, %v107_v58 }
 0x123   :  { %v607_v46 = vpack.c.bf16 %v573_v22, %v569_v62  ;;  %v722_v22 = vrot.slane %v716_v61, 4 }
 0x124   :  { %v608_v48 = vpack.c.bf16 %v575_v44, %v571_v54 }
 0x125   :  { %v3693_v45 = vpop.eup %3692  ;;  %631 = vst [vmem:[#allocation2 + $0x50] sm:$0xff] %v607_v46 }
 0x126   :  { %632 = vst [vmem:[#allocation2 + $0x58] sm:$0xff] %v608_v48  ;;  %v578_v3 = vpop.f32.mrb[24].mxu0  ;;  %v1153_v49 = vadd.f32 1.0, %v3693_v45  ;;  %v3695_v60 = vpop.eup %3694  ;;  %v712_v48 = vld [vmem:[#allocation2 + $0x10] sm:$0xf]  ;;  %v728_v45 = vunpack.c.l.bf16 %v722_v22 }
 0x127   :  { %v579_v56 = vadd.f32 %v578_v3, %v4611_v26  ;;  %v580_v47 = vpop.f32.mrb[25].mxu0  ;;  %v1160_v54 = vadd.f32 1.0, %v3695_v60 }
 0x128   :  { %v582_v52 = vpop.f32.mrb[26].mxu0  ;;  %v581_v51 = vadd.f32 %v580_v47, %v107_v58  ;;  %3696 = vrcp.f32 %v1153_v49  ;;  %v715_v49 = vunpack.c.l.bf16 %v712_v48 }
 0x129   :  { %v583_v59 = vadd.f32 %v582_v52, %v4611_v26  ;;  %v584_v63 = vpop.f32.mrb[27].mxu0  ;;  %3698 = vrcp.f32 %v1160_v54 }
 0x12a   :  { %v585_v55 = vadd.f32 %v584_v63, %v107_v58 }
 0x12b   :  { %v613_v2 = vpack.c.bf16 %v583_v59, %v579_v56 }
 0x12c   :  { %v614_v0 = vpack.c.bf16 %v585_v55, %v581_v51 }
 0x12d   :  { %637 = vst [vmem:[#allocation2 + $0x80] sm:$0xff] %v613_v2 }
 0x12e   :  { %638 = vst [vmem:[#allocation2 + $0x88] sm:$0xff] %v614_v0  ;;  %v588_v57 = vpop.f32.mrb[28].mxu0 }
 0x12f   :  { %v589_v4 = vadd.f32 %v588_v57, %v4611_v26  ;;  %v590_v50 = vpop.f32.mrb[29].mxu0 }
 0x130   :  { %v592_v62 = vpop.f32.mrb[30].mxu0  ;;  %v591_v30 = vadd.f32 %v590_v50, %v107_v58 }
 0x131   :  { %v593_v17 = vadd.f32 %v592_v62, %v4611_v26  ;;  %v594_v18 = vpop.f32.mrb[31].mxu0 }
 0x132   :  { %v595_v53 = vadd.f32 %v594_v18, %v107_v58  ;;  %v3697_v3 = vpop.eup %3696 }
 0x133   :  { %v619_v44 = vpack.c.bf16 %v593_v17, %v589_v4  ;;  %v3699_v60 = vpop.eup %3698 }
 0x134   :  { %v620_v46 = vpack.c.bf16 %v595_v53, %v591_v30  ;;  %v1166_v18 = vsub.f32 1.0, %v3699_v60  ;;  %v4622_v30 = vpop.permute.xlu0 %1195 }
 0x135   :  { %643 = vst [vmem:[#allocation2 + $0xb0] sm:$0xff] %v619_v44  ;;  %5802 = vst [vmem:[#allocation4_spill] sm:$0xff] %v4622_v30  ;;  %v1168_v44 = vmul.f32 0.0, %v3699_v60  ;;  %vm1197_vm9 = vcmp.eq.s32.totalorder %v4622_v30, 1 }
 0x136   :  { %644 = vst [vmem:[#allocation2 + $0xb8] sm:$0xff] %v620_v46  ;;  %v934_v56 = vpop.f32.mrb[32].mxu0  ;;  %v1102_v47 = vpop.f32.mrb[20].mxu1  ;;  %vm3035_vm10 = vmpackc.low %vm1197_vm9, %vm1197_vm9 }
 0x137   :  { %v1163_v52 = vmul.f32 %v3697_v3, %v934_v56  ;;  %v1170_v59 = vadd.f32 %v1102_v47, %v728_v45  ;;  %v3245_v63 = vpop.f32.mrb[33].mxu0  ;;  %v1104_v26 = vpop.f32.mrb[21].mxu1 }
 0x138   :  { %v937_v51 = vpop.f32.mrb[34].mxu0  ;;  %v1106_v55 = vpop.f32.mrb[22].mxu1 }
 0x139   :  { %v1164_v2 = vadd.f32 %v1163_v52, %v715_v49  ;;  %v3033_v58 = vmul.f32 -1.442695, %v1170_v59  ;;  %v3246_v0 = vpop.f32.mrb[35].mxu0  ;;  %v1107_v57 = vpop.f32.mrb[23].mxu1  ;;  %v4706_v55 = vld [vmem:[%s5762_s3 + $0x18] ss:$12 sps:$4 sm:$0xff]  }
 0x13a   :  { %v4748_v0 = vld [vmem:[%s5762_s3 + $0x60] ss:$12 sps:$4 sm:$0xff]   ;;  %v4762_v57 = vld [vmem:[%s5762_s3 + $0x78] ss:$12 sps:$4 sm:$0xff]  }
 0x13b   :  { %3700 = vtanh.f32 %v1164_v2  ;;  %v4720_v2 = vld [vmem:[%s5762_s3 + $0x30] ss:$12 sps:$4 sm:$0xff]   ;;  %5804 = vst [vmem:[#allocation6_spill] sm:$0xff] %v4762_v57 }
 0x13c   :  { %3702 = vpow2.f32 %v3033_v58  ;;  %v717_v61 = vld [vmem:[#allocation2 + $0xb0] sm:$0xf0] }
 0x13d   :  { %v723_v4 = vrot.slane %v717_v61, 4  ;;  %v718_v47 = vld [vmem:[#allocation2 + $0xb8] sm:$0xf0]  ;;  %v4734_v58 = vld [vmem:[%s5762_s3 + $0x48] ss:$12 sps:$4 sm:$0xff]  }
 0x13e   :  { %v724_v49 = vrot.slane %v718_v47, 4  ;;  %v4776_v61 = vld [vmem:[%s5762_s3 + $0x90] ss:$12 sps:$4 sm:$0xff]  }
 0x13f   :  { %v729_v50 = vunpack.c.l.bf16 %v723_v4  ;;  %5806 = vst [vmem:[#allocation8_spill] sm:$0xff] %v4776_v61  ;;  %v1208_v4 = vld [vmem:[#allocation2] sm:$0xf0] }
 0x141   :  { %v1177_v62 = vadd.f32 %v1104_v26, %v729_v50  ;;  %v1214_v50 = vrot.slane %v1208_v4, 4 }
 0x143   :  { %v3034_v17 = vmul.f32 -1.442695, %v1177_v62  ;;  %v1220_v62 = vunpack.c.l.bf16 %v1214_v50 }
 0x145   :  { %v3701_v22 = vpop.eup %3700  ;;  %3704 = vpow2.f32 %v3034_v17 }
 0x146   :  { %v3703_v53 = vpop.eup %3702  ;;  %v1167_v54 = vmul.f32 %v3701_v22, %v1166_v18 }
 0x147   :  { %v1174_v46 = vadd.f32 1.0, %v3703_v53 }
 0x148   :  { %v1169_v48 = vadd.f32 %v1168_v44, %v1167_v54 }
 0x149   :  { %3706 = vrcp.f32 %v1174_v46 }
 0x14a   :  { %v4630_v45 = vsel %vm1197_vm9, %v1169_v48, 0.0  ;;  %v3036_v3 = vpack.c.bf16 %v1169_v48, %v1169_v48 }
 0x14b   :  { %1205 = vst [vmem:[%s5766_s6] sm:$0xff] %v4630_v45 }
 0x14c   :  { %3037 = vmatmul.mubr.msk.bf16.vlgmr.msra.gmra.mrb[24].mxu1 %vm3035_vm10, %v3036_v3  ;;  %3284 = vmatmul.mubr.msk.bf16.vlgmr.msra.gmra.mrb[40].mxu0 %vm3035_vm10, %v3036_v3 }
 0x14d   :  { %1313 = vmatpush1.bf16.msra.mxu1 %v4284_v8  ;;  %3288 = vmatpush3.bf16.msra.mxu0 %v4450_v38 }
 0x14e   :  { %1314 = vmatprep.subr.bf16.mxu1 %v4291_v10  ;;  %3289 = vmatprep.subr.bf16.mxu0 %v5775_v9 }
 0x14f   :  { %1344 = vmatprep.mubr.bf16.mxu1 %v5768_v1  ;;  %3303 = vmatprep.mubr.msk.bf16.mxu0 %vm3950_vm4, %v5775_v9  ;;  %v3705_v56 = vpop.eup %3704 }
 0x150   :  { %v1181_v8 = vadd.f32 1.0, %v3705_v56 }
 0x151   :  { %1315 = vmatpush1.bf16.msra.mxu1 %v4305_v12  ;;  %3290 = vmatpush3.bf16.msra.mxu0 %v4460_v40  ;;  %v730_v12 = vunpack.c.l.bf16 %v724_v49 }
 0x152   :  { %1316 = vmatprep.subr.bf16.mxu1 %v4312_v13  ;;  %3291 = vmatprep.subr.bf16.mxu0 %v5775_v9  ;;  %3708 = vrcp.f32 %v1181_v8 }
 0x153   :  { %v3707_v10 = vpop.eup %3706 }
 0x155   :  { %1317 = vmatpush1.bf16.msra.mxu1 %v4326_v15  ;;  %3292 = vmatpush3.bf16.msra.mxu0 %v4472_v34 }
 0x156   :  { %v1143_v52 = vpop.f32.mrb[36].mxu0  ;;  %1318 = vmatprep.subr.bf16.mxu1 %v4333_v16  ;;  %3293 = vmatprep.subr.bf16.mxu0 %v5775_v9 }
 0x157   :  { %v1184_v59 = vmul.f32 %v3707_v10, %v1143_v52  ;;  %v3265_v63 = vpop.f32.mrb[37].mxu0  ;;  %v1210_v10 = vld [vmem:[#allocation2 + $0x10] sm:$0xf0] }
 0x158   :  { %v1146_v26 = vpop.f32.mrb[38].mxu0  ;;  %v1216_v52 = vrot.slane %v1210_v10, 4  ;;  %v4791_v63 = vld [vmem:[#allocation2 + $0xa8] ss:$16 sps:$4 sm:$0xff]   ;;  %v4816_v10 = vld [vmem:[%s5763_s4] ss:$12 sps:$4 sm:$0xff]  }
 0x159   :  { %v1185_v13 = vadd.f32 %v1184_v59, %v730_v12  ;;  %v3266_v51 = vpop.f32.mrb[39].mxu0  ;;  %1319 = vmatpush1.bf16.msra.mxu1 %v4353_v20  ;;  %3294 = vmatpush3.bf16.msra.mxu0 %v4481_v37 }
 0x15a   :  { %1320 = vmatprep.subr.bf16.mxu1 %v4361_v21  ;;  %3295 = vmatprep.subr.bf16.mxu0 %v5775_v9  ;;  %v1222_v26 = vunpack.c.l.bf16 %v1216_v52 }
 0x15b   :  { %3710 = vtanh.f32 %v1185_v13 }
 0x15c   :  { %v3709_v15 = vpop.eup %3708 }
 0x15d   :  { %1321 = vmatpush1.bf16.msra.mxu1 %v4375_v24  ;;  %3296 = vmatpush3.bf16.msra.mxu0 %v4490_v39  ;;  %v1187_v16 = vsub.f32 1.0, %v3709_v15  ;;  %v1189_v21 = vmul.f32 0.0, %v3709_v15  ;;  %v1226_v15 = vunpack.c.l.bf16 %v4791_v63 }
 0x15e   :  { %1322 = vmatprep.subr.bf16.mxu1 %v4383_v25  ;;  %3297 = vmatprep.subr.bf16.mxu0 %v5775_v9  ;;  %v4667_v25 = vpop.permute.xlu0 %1201 }
 0x15f   :  { %5803 = vst [vmem:[#allocation5_spill] sm:$0xff] %v4667_v25  ;;  %vm1203_vm11 = vcmp.eq.s32.totalorder %v4667_v25, 1 }
 0x160   :  { %vm3041_vm12 = vmpackc.low %vm1203_vm11, %vm1203_vm11 }
 0x161   :  { %1323 = vmatpush1.bf16.msra.mxu1 %v4397_v28  ;;  %3298 = vmatpush3.bf16.msra.mxu0 %v4499_v41 }
 0x162   :  { %1324 = vmatprep.subr.bf16.mxu1 %v4405_v29  ;;  %3299 = vmatprep.subr.bf16.mxu0 %v5775_v9 }
 0x165   :  { %v3711_v20 = vpop.eup %3710  ;;  %1325 = vmatpush1.bf16.msra.mxu1 %v4419_v32  ;;  %3300 = vmatpush3.bf16.msra.mxu0 %v4508_v42  ;;  %v4679_v32 = vld [vmem:[%s5762_s3 + $0x4] ss:$12 sps:$4 sm:$0xff]  }
 0x166   :  { %v1188_v24 = vmul.f32 %v3711_v20, %v1187_v16  ;;  %1326 = vmatprep.subr.bf16.mxu1 %v4426_v33  ;;  %3301 = vmatprep.subr.bf16.mxu0 %v5775_v9  ;;  %v4689_v33 = vld [vmem:[%s5762_s3] ss:$12 sps:$4 sm:$0xff]  }
 0x167   :  { %v4794_v16 = vld [vmem:[#allocation2 + $0x40] ss:$112 sps:$4 sm:$0xff]  }
 0x168   :  { %v4670_v28 = vadd.f32 %v1189_v21, %v1188_v24  ;;  %v1227_v50 = vunpack.c.h.bf16 %v4794_v16 }
 0x169   :  { %1327 = vmatpush1.bf16.msra.mxu1 %v4439_v36  ;;  %3302 = vmatpush3.bf16.msra.mxu0 %v4517_v43  ;;  %v4696_v36 = vld [vmem:[%s5762_s3 + $0x1c] ss:$12 sps:$4 sm:$0xff]  }
 0x16a   :  { %v3042_v29 = vpack.c.bf16 %v4670_v28, %v4670_v28  ;;  %1477 = vmatprep.subr.bf16.mxu1 %v4679_v32  ;;  %3307 = vmatprep.subr.bf16.mxu0 %v5775_v9 }
 0x16c   :  { %3043 = vmatmul.mubr.msk.bf16.vlgmr.msra.gmra.mrb[28].mxu1 %vm3041_vm12, %v3042_v29  ;;  %3304 = vmatmul.mubr.msk.bf16.vlgmr.msra.gmra.mrb[44].mxu0 %vm3041_vm12, %v3042_v29 }
 0x16d   :  { %1478 = vmatpush1.bf16.msra.mxu1 %v4689_v33  ;;  %3308 = vmatpush3.bf16.msra.mxu0 %v4278_v7  ;;  %v4713_v7 = vld [vmem:[%s5762_s3 + $0x34] ss:$12 sps:$4 sm:$0xff]  }
 0x16e   :  { %1479 = vmatprep.subr.bf16.mxu1 %v4696_v36  ;;  %3309 = vmatprep.subr.bf16.mxu0 %v5775_v9 }
 0x16f   :  { %1509 = vmatprep.mubr.bf16.mxu1 %v5768_v1  ;;  %3323 = vmatprep.mubr.msk.bf16.mxu0 %vm3950_vm4, %v5775_v9 }
 0x171   :  { %1480 = vmatpush1.bf16.msra.mxu1 %v4706_v55  ;;  %3310 = vmatpush3.bf16.msra.mxu0 %v4298_v11  ;;  %v4727_v11 = vld [vmem:[%s5762_s3 + $0x4c] ss:$12 sps:$4 sm:$0xff]  }
 0x172   :  { %1481 = vmatprep.subr.bf16.mxu1 %v4713_v7  ;;  %3311 = vmatprep.subr.bf16.mxu0 %v5775_v9 }
 0x175   :  { %1482 = vmatpush1.bf16.msra.mxu1 %v4720_v2  ;;  %3312 = vmatpush3.bf16.msra.mxu0 %v4319_v14  ;;  %v4741_v14 = vld [vmem:[%s5762_s3 + $0x64] ss:$12 sps:$4 sm:$0xff]  }
 0x176   :  { %1483 = vmatprep.subr.bf16.mxu1 %v4727_v11  ;;  %3313 = vmatprep.subr.bf16.mxu0 %v5775_v9 }
 0x179   :  { %1484 = vmatpush1.bf16.msra.mxu1 %v4734_v58  ;;  %3314 = vmatpush3.bf16.msra.mxu0 %v4348_v19  ;;  %v4755_v19 = vld [vmem:[%s5762_s3 + $0x7c] ss:$12 sps:$4 sm:$0xff]  }
 0x17a   :  { %1485 = vmatprep.subr.bf16.mxu1 %v4741_v14  ;;  %3315 = vmatprep.subr.bf16.mxu0 %v5775_v9 }
 0x17d   :  { %1486 = vmatpush1.bf16.msra.mxu1 %v4748_v0  ;;  %3316 = vmatpush3.bf16.msra.mxu0 %v4370_v23  ;;  %v4769_v23 = vld [vmem:[%s5762_s3 + $0x94] ss:$12 sps:$4 sm:$0xff]  }
 0x17e   :  { %1487 = vmatprep.subr.bf16.mxu1 %v4755_v19  ;;  %3317 = vmatprep.subr.bf16.mxu0 %v5775_v9  ;;  %5805 = vst [vmem:[#allocation7_spill] sm:$0xff] %v4769_v23 }
 0x181   :  { %1488 = vmatpush1.bf16.msra.mxu1 %v4762_v57  ;;  %3318 = vmatpush3.bf16.msra.mxu0 %v4392_v27  ;;  %v4783_v27 = vld [vmem:[%s5762_s3 + $0xac] ss:$12 sps:$4 sm:$0xff]  }
 0x182   :  { %1489 = vmatprep.subr.bf16.mxu1 %v4769_v23  ;;  %3319 = vmatprep.subr.bf16.mxu0 %v5775_v9  ;;  %5807 = vst [vmem:[#allocation9_spill] sm:$0xff] %v4783_v27 }
 0x185   :  { %1490 = vmatpush1.bf16.msra.mxu1 %v4776_v61  ;;  %3320 = vmatpush3.bf16.msra.mxu0 %v4414_v31  ;;  %v1209_v31 = vld [vmem:[#allocation2 + $0x8] sm:$0xf0] }
 0x186   :  { %1491 = vmatprep.subr.bf16.mxu1 %v4783_v27  ;;  %3321 = vmatprep.subr.bf16.mxu0 %v5775_v9  ;;  %v1215_v60 = vrot.slane %v1209_v31, 4 }
 0x188   :  { %v1221_v44 = vunpack.c.l.bf16 %v1215_v60 }
 0x189   :  { %1492 = vmatpush1.bf16.msra.mxu1 %v4265_v5  ;;  %3322 = vmatpush3.bf16.msra.mxu0 %v4434_v35 }
 0x18a   :  { %1559 = vmatprep.subr.bf16.mxu1 %v4271_v6  ;;  %3327 = vmatprep.subr.bf16.mxu0 %v5775_v9 }
 0x21f   :  { %v1264_v17 = vpop.f32.mrb[24].mxu1  ;;  %v1305_v18 = vpop.f32.mrb[40].mxu0 }
 0x220   :  { %v1393_v22 = vadd.f32 %v1264_v17, %v1220_v62  ;;  %v1266_v53 = vpop.f32.mrb[25].mxu1  ;;  %v3285_v54 = vpop.f32.mrb[41].mxu0 }
 0x221   :  { %v1268_v46 = vpop.f32.mrb[26].mxu1  ;;  %v1308_v48 = vpop.f32.mrb[42].mxu0  ;;  %v1400_v56 = vadd.f32 %v1266_v53, %v1221_v44 }
 0x222   :  { %v3047_v5 = vmul.f32 -1.442695, %v1393_v22  ;;  %v1269_v3 = vpop.f32.mrb[27].mxu1  ;;  %v3286_v35 = vpop.f32.mrb[43].mxu0 }
 0x223   :  { %v3048_v6 = vmul.f32 -1.442695, %v1400_v56  ;;  %v4797_v48 = vpop.permute.xlu1 %1439 }
 0x224   :  { %3712 = vpow2.f32 %v3047_v5  ;;  %5808 = vst [vmem:[#allocation10_spill] sm:$0xff] %v4797_v48  ;;  %vm1441_vm13 = vcmp.eq.s32.totalorder %v4797_v48, 1  ;;  %v1461_v48 = vld [vmem:[#allocation2 + $0x78] sm:$0xf0] }
 0x225   :  { %3714 = vpow2.f32 %v3048_v6 }
 0x22e   :  { %v3713_v47 = vpop.eup %3712 }
 0x22f   :  { %v1397_v8 = vadd.f32 1.0, %v3713_v47  ;;  %v3715_v49 = vpop.eup %3714 }
 0x230   :  { %v1404_v12 = vadd.f32 1.0, %v3715_v49 }
 0x231   :  { %3716 = vrcp.f32 %v1397_v8 }
 0x232   :  { %3718 = vrcp.f32 %v1404_v12  ;;  %v4833_v12 = vld [vmem:[%s5763_s4 + $0x18] ss:$12 sps:$4 sm:$0xff]  }
 0x23b   :  { %v3717_v59 = vpop.eup %3716 }
 0x23c   :  { %v1407_v13 = vmul.f32 %v3717_v59, %v1305_v18  ;;  %v3719_v53 = vpop.eup %3718  ;;  %v4840_v59 = vld [vmem:[%s5763_s4 + $0x34] ss:$12 sps:$4 sm:$0xff]  }
 0x23d   :  { %v1410_v44 = vsub.f32 1.0, %v3719_v53  ;;  %v1412_v3 = vmul.f32 %v3719_v53, %v4630_v45 }
 0x23e   :  { %v1408_v51 = vadd.f32 %v1407_v13, %v1222_v26  ;;  %v4847_v13 = vld [vmem:[%s5763_s4 + $0x30] ss:$12 sps:$4 sm:$0xff]  }
 0x23f   :  { %v1346_v20 = vpop.f32.mrb[28].mxu1  ;;  %v1387_v21 = vpop.f32.mrb[44].mxu0 }
 0x240   :  { %3720 = vtanh.f32 %v1408_v51  ;;  %v1414_v24 = vadd.f32 %v1346_v20, %v1226_v15  ;;  %v1348_v29 = vpop.f32.mrb[29].mxu1  ;;  %v3305_v4 = vpop.f32.mrb[45].mxu0  ;;  %v4855_v15 = vld [vmem:[%s5763_s4 + $0x4c] ss:$12 sps:$4 sm:$0xff]  }
 0x241   :  { %v1350_v31 = vpop.f32.mrb[30].mxu1  ;;  %v1390_v60 = vpop.f32.mrb[46].mxu0  ;;  %v1421_v18 = vadd.f32 %v1348_v29, %v1227_v50  ;;  %v4890_v29 = vld [vmem:[%s5763_s4 + $0x78] ss:$12 sps:$4 sm:$0xff]  }
 0x242   :  { %v3049_v62 = vmul.f32 -1.442695, %v1414_v24  ;;  %v1351_v17 = vpop.f32.mrb[31].mxu1  ;;  %v3306_v22 = vpop.f32.mrb[47].mxu0  ;;  %v4862_v24 = vld [vmem:[%s5763_s4 + $0x48] ss:$12 sps:$4 sm:$0xff]  }
 0x243   :  { %v3050_v54 = vmul.f32 -1.442695, %v1421_v18  ;;  %v4904_v31 = vsel %vm1203_vm11, %v4670_v28, 0.0  ;;  %v4917_v17 = vld [vmem:[%s5763_s4 + $0xac] ss:$12 sps:$4 sm:$0xff]   ;;  %v4921_v28 = vpop.permute.xlu1 %1445 }
 0x244   :  { %3722 = vpow2.f32 %v3049_v62  ;;  %5809 = vst [vmem:[#allocation11_spill] sm:$0xff] %v4904_v31  ;;  %5810 = vst [vmem:[#allocation12_spill] sm:$0xff] %v4921_v28  ;;  %vm1447_vm14 = vcmp.eq.s32.totalorder %v4921_v28, 1  ;;  %v4935_v18 = vld [vmem:[%s5763_s4 + $0xa8] ss:$12 sps:$4 sm:$0xff]  }
 0x245   :  { %3724 = vpow2.f32 %v3050_v54  ;;  %v4947_v54 = vld [vmem:[%s5762_s3 + $0x8] ss:$12 sps:$4 sm:$0xff]  }
 0x24a   :  { %v3721_v46 = vpop.eup %3720 }
 0x24b   :  { %v1411_v5 = vmul.f32 %v3721_v46, %v1410_v44  ;;  %v4968_v44 = vld [vmem:[%s5762_s3 + $0x38] ss:$12 sps:$4 sm:$0xff]   ;;  %v4977_v46 = vld [vmem:[%s5762_s3 + $0x50] ss:$12 sps:$4 sm:$0xff]  }
 0x24d   :  { %v1413_v35 = vadd.f32 %v1412_v3, %v1411_v5  ;;  %v4986_v5 = vld [vmem:[%s5762_s3 + $0x68] ss:$12 sps:$4 sm:$0xff]   ;;  %v4995_v3 = vld [vmem:[%s5762_s3 + $0x80] ss:$12 sps:$4 sm:$0xff]  }
 0x24e   :  { %v3723_v56 = vpop.eup %3722  ;;  %5812 = vst [vmem:[#allocation14_spill] sm:$0xff] %v4995_v3 }
 0x24f   :  { %v1418_v6 = vadd.f32 1.0, %v3723_v56  ;;  %v4804_v47 = vsel %vm1441_vm13, %v1413_v35, %v4630_v45  ;;  %v1449_v8 = vsel %vm1441_vm13, %v1413_v35, 0.0  ;;  %v4823_v45 = vld [vmem:[%s5763_s4 + $0x1c] ss:$12 sps:$4 sm:$0xff]   ;;  %v3725_v52 = vpop.eup %3724  ;;  %v5004_v35 = vld [vmem:[%s5762_s3 + $0x98] ss:$12 sps:$4 sm:$0xff]  }
 0x250   :  { %3051 = vst [vmem:[%s5766_s6 + $0x8] sm:$0xff] %v1449_v8  ;;  %v1476_v49 = vpack.c.bf16 %v4804_v47, %v4804_v47  ;;  %5813 = vst [vmem:[#allocation15_spill] sm:$0xff] %v5004_v35  ;;  %v5012_v56 = vld [vmem:[%s5762_s3 + $0xa8] ss:$12 sps:$4 sm:$0xff]   ;;  %v5024_v8 = vld [vmem:[%s5763_s4 + $0x4] ss:$12 sps:$4 sm:$0xff]  }
 0x251   :  { %3726 = vrcp.f32 %v1418_v6  ;;  %5814 = vst [vmem:[#allocation16_spill] sm:$0xff] %v5012_v56  ;;  %v5018_v6 = vld [vmem:[%s5762_s3 + $0xb0] ss:$12 sps:$4 sm:$0xff]   ;;  %5816 = vst [vmem:[#allocation18_spill] sm:$0xff] %v5024_v8 }
 0x252   :  { %1510 = vmatmul.mubr.bf16.vlgmr.msra.gmra.mrb[32].mxu1 %v1476_v49  ;;  %3324 = vmatmul.mubr.bf16.vlgmr.msra.gmra.mrb[48].mxu0 %v1476_v49  ;;  %5815 = vst [vmem:[#allocation17_spill] sm:$0xff] %v5018_v6  ;;  %v1455_v49 = vld [vmem:[#allocation2 + $0x30] ss:$8 sps:$4 sm:$0xff]  }
 0x253   :  { %1560 = vmatpush1.bf16.msra.mxu1 %v4816_v10  ;;  %3328 = vmatpush3.bf16.msra.mxu0 %v4450_v38  ;;  %v1425_v38 = vadd.f32 1.0, %v3725_v52  ;;  %v1458_v52 = vunpack.c.l.bf16 %v1455_v49 }
 0x254   :  { %1561 = vmatprep.subr.bf16.mxu1 %v4823_v45  ;;  %3329 = vmatprep.subr.bf16.mxu0 %v5775_v9 }
 0x255   :  { %1591 = vmatprep.mubr.bf16.mxu1 %v5768_v1  ;;  %3343 = vmatprep.mubr.msk.bf16.mxu0 %vm3950_vm4, %v5775_v9  ;;  %3728 = vrcp.f32 %v1425_v38 }
 0x257   :  { %1562 = vmatpush1.bf16.msra.mxu1 %v4833_v12  ;;  %3330 = vmatpush3.bf16.msra.mxu0 %v4460_v40  ;;  %v1228_v40 = vunpack.c.h.bf16 %v4791_v63  ;;  %v4876_v63 = vld [vmem:[%s5763_s4 + $0x60] ss:$12 sps:$4 sm:$0xff]  }
 0x258   :  { %1563 = vmatprep.subr.bf16.mxu1 %v4840_v59  ;;  %3331 = vmatprep.subr.bf16.mxu0 %v5775_v9 }
 0x25b   :  { %v3727_v26 = vpop.eup %3726  ;;  %1564 = vmatpush1.bf16.msra.mxu1 %v4847_v13  ;;  %3332 = vmatpush3.bf16.msra.mxu0 %v4472_v34  ;;  %v4869_v34 = vld [vmem:[%s5763_s4 + $0x64] ss:$12 sps:$4 sm:$0xff]  }
 0x25c   :  { %v1428_v51 = vmul.f32 %v3727_v26, %v1387_v21  ;;  %1565 = vmatprep.subr.bf16.mxu1 %v4855_v15  ;;  %3333 = vmatprep.subr.bf16.mxu0 %v5775_v9 }
 0x25e   :  { %v1429_v20 = vadd.f32 %v1428_v51, %v1228_v40 }
 0x25f   :  { %1566 = vmatpush1.bf16.msra.mxu1 %v4862_v24  ;;  %3334 = vmatpush3.bf16.msra.mxu0 %v4481_v37  ;;  %v4883_v37 = vld [vmem:[%s5763_s4 + $0x7c] ss:$12 sps:$4 sm:$0xff]   ;;  %v3729_v21 = vpop.eup %3728 }
 0x260   :  { %3730 = vtanh.f32 %v1429_v20  ;;  %1567 = vmatprep.subr.bf16.mxu1 %v4869_v34  ;;  %3335 = vmatprep.subr.bf16.mxu0 %v5775_v9  ;;  %v1431_v4 = vsub.f32 1.0, %v3729_v21  ;;  %v1433_v62 = vmul.f32 %v3729_v21, %v4904_v31  ;;  %v1459_v21 = vunpack.c.h.bf16 %v1455_v49 }
 0x261   :  { %v1460_v49 = vunpack.c.l.bf16 %v4794_v16 }
 0x263   :  { %1568 = vmatpush1.bf16.msra.mxu1 %v4876_v63  ;;  %3336 = vmatpush3.bf16.msra.mxu0 %v4490_v39  ;;  %v4897_v39 = vld [vmem:[%s5763_s4 + $0x94] ss:$12 sps:$4 sm:$0xff]  }
 0x264   :  { %1569 = vmatprep.subr.bf16.mxu1 %v4883_v37  ;;  %3337 = vmatprep.subr.bf16.mxu0 %v5775_v9 }
 0x267   :  { %1570 = vmatpush1.bf16.msra.mxu1 %v4890_v29  ;;  %3338 = vmatpush3.bf16.msra.mxu0 %v4499_v41  ;;  %v4910_v41 = vld [vmem:[%s5763_s4 + $0x90] ss:$12 sps:$4 sm:$0xff]  }
 0x268   :  { %1571 = vmatprep.subr.bf16.mxu1 %v4897_v39  ;;  %3339 = vmatprep.subr.bf16.mxu0 %v5775_v9 }
 0x26a   :  { %v3731_v50 = vpop.eup %3730 }
 0x26b   :  { %v1432_v60 = vmul.f32 %v3731_v50, %v1431_v4  ;;  %1572 = vmatpush1.bf16.msra.mxu1 %v4910_v41  ;;  %3340 = vmatpush3.bf16.msra.mxu0 %v4508_v42 }
 0x26c   :  { %1573 = vmatprep.subr.bf16.mxu1 %v4917_v17  ;;  %3341 = vmatprep.subr.bf16.mxu0 %v5775_v9 }
 0x26d   :  { %v4923_v22 = vadd.f32 %v1433_v62, %v1432_v60 }
 0x26f   :  { %5811 = vst [vmem:[#allocation13_spill] sm:$0xff] %v4923_v22  ;;  %v4930_v42 = vsel %vm1447_vm14, %v4923_v22, %v4904_v31  ;;  %1574 = vmatpush1.bf16.msra.mxu1 %v4935_v18  ;;  %3342 = vmatpush3.bf16.msra.mxu0 %v4517_v43  ;;  %v4959_v43 = vld [vmem:[%s5762_s3 + $0x20] ss:$12 sps:$4 sm:$0xff]   ;;  %v1467_v22 = vrot.slane %v1461_v48, 4 }
 0x270   :  { %v1558_v53 = vpack.c.bf16 %v4930_v42, %v4930_v42  ;;  %1724 = vmatprep.subr.bf16.mxu1 %v4679_v32  ;;  %3347 = vmatprep.subr.bf16.mxu0 %v5775_v9 }
 0x272   :  { %1592 = vmatmul.mubr.bf16.vlgmr.msra.gmra.mrb[36].mxu1 %v1558_v53  ;;  %3344 = vmatmul.mubr.bf16.vlgmr.msra.gmra.mrb[52].mxu0 %v1558_v53 }
 0x273   :  { %1725 = vmatpush1.bf16.msra.mxu1 %v4689_v33  ;;  %3348 = vmatpush3.bf16.msra.mxu0 %v4947_v54 }
 0x274   :  { %1726 = vmatprep.subr.bf16.mxu1 %v4696_v36  ;;  %3349 = vmatprep.subr.bf16.mxu0 %v5775_v9 }
 0x275   :  { %1756 = vmatprep.mubr.bf16.mxu1 %v5768_v1  ;;  %3363 = vmatprep.mubr.msk.bf16.mxu0 %vm3950_vm4, %v5775_v9 }
 0x277   :  { %1727 = vmatpush1.bf16.msra.mxu1 %v4706_v55  ;;  %3350 = vmatpush3.bf16.msra.mxu0 %v4959_v43 }
 0x278   :  { %1728 = vmatprep.subr.bf16.mxu1 %v4713_v7  ;;  %3351 = vmatprep.subr.bf16.mxu0 %v5775_v9 }
 0x27b   :  { %1729 = vmatpush1.bf16.msra.mxu1 %v4720_v2  ;;  %3352 = vmatpush3.bf16.msra.mxu0 %v4968_v44 }
 0x27c   :  { %1730 = vmatprep.subr.bf16.mxu1 %v4727_v11  ;;  %3353 = vmatprep.subr.bf16.mxu0 %v5775_v9 }
 0x27f   :  { %1731 = vmatpush1.bf16.msra.mxu1 %v4734_v58  ;;  %3354 = vmatpush3.bf16.msra.mxu0 %v4977_v46 }
 0x280   :  { %1732 = vmatprep.subr.bf16.mxu1 %v4741_v14  ;;  %3355 = vmatprep.subr.bf16.mxu0 %v5775_v9 }
 0x283   :  { %1733 = vmatpush1.bf16.msra.mxu1 %v4748_v0  ;;  %3356 = vmatpush3.bf16.msra.mxu0 %v4986_v5 }
 0x284   :  { %1734 = vmatprep.subr.bf16.mxu1 %v4755_v19  ;;  %3357 = vmatprep.subr.bf16.mxu0 %v5775_v9 }
 0x287   :  { %1735 = vmatpush1.bf16.msra.mxu1 %v4762_v57  ;;  %3358 = vmatpush3.bf16.msra.mxu0 %v4995_v3 }
 0x288   :  { %1736 = vmatprep.subr.bf16.mxu1 %v4769_v23  ;;  %3359 = vmatprep.subr.bf16.mxu0 %v5775_v9 }
 0x28b   :  { %1737 = vmatpush1.bf16.msra.mxu1 %v4776_v61  ;;  %3360 = vmatpush3.bf16.msra.mxu0 %v5004_v35 }
 0x28c   :  { %1738 = vmatprep.subr.bf16.mxu1 %v4783_v27  ;;  %3361 = vmatprep.subr.bf16.mxu0 %v5775_v9 }
 0x28f   :  { %1739 = vmatpush1.bf16.msra.mxu1 %v5012_v56  ;;  %3362 = vmatpush3.bf16.msra.mxu0 %v5018_v6 }
 0x290   :  { %1806 = vmatprep.subr.bf16.mxu1 %v5024_v8  ;;  %3367 = vmatprep.subr.bf16.mxu0 %v5775_v9 }
 0x325   :  { %v1511_v38 = vpop.f32.mrb[32].mxu1  ;;  %v1552_v26 = vpop.f32.mrb[48].mxu0 }
 0x326   :  { %v1640_v40 = vadd.f32 %v1511_v38, %v1458_v52  ;;  %v1513_v51 = vpop.f32.mrb[33].mxu1  ;;  %v3325_v20 = vpop.f32.mrb[49].mxu0  ;;  %v1462_v52 = vld [vmem:[#allocation2 + $0x80] sm:$0xf0] }
 0x327   :  { %v1515_v4 = vpop.f32.mrb[34].mxu1  ;;  %v1555_v50 = vpop.f32.mrb[50].mxu0  ;;  %v1647_v1 = vadd.f32 %v1513_v51, %v1459_v21 }
 0x328   :  { %v3052_v60 = vmul.f32 -1.442695, %v1640_v40  ;;  %v1516_v62 = vpop.f32.mrb[35].mxu1  ;;  %v3326_v53 = vpop.f32.mrb[51].mxu0  ;;  %v1468_v40 = vrot.slane %v1462_v52, 4  ;;  %v1473_v50 = vunpack.c.l.bf16 %v1467_v22 }
 0x329   :  { %v3053_v30 = vmul.f32 -1.442695, %v1647_v1 }
 0x32a   :  { %3732 = vpow2.f32 %v3052_v60 }
 0x32b   :  { %3734 = vpow2.f32 %v3053_v30 }
 0x334   :  { %v3733_v31 = vpop.eup %3732 }
 0x335   :  { %v1644_v25 = vadd.f32 1.0, %v3733_v31  ;;  %v3735_v9 = vpop.eup %3734 }
 0x336   :  { %v1651_v28 = vadd.f32 1.0, %v3735_v9 }
 0x337   :  { %3736 = vrcp.f32 %v1644_v25  ;;  %v1474_v25 = vunpack.c.l.bf16 %v1468_v40 }
 0x338   :  { %3738 = vrcp.f32 %v1651_v28 }
 0x341   :  { %v3737_v38 = vpop.eup %3736 }
 0x342   :  { %v1654_v20 = vmul.f32 %v3737_v38, %v1552_v26  ;;  %v3739_v16 = vpop.eup %3738 }
 0x343   :  { %v1657_v28 = vsub.f32 1.0, %v3739_v16  ;;  %v1659_v22 = vmul.f32 %v3739_v16, %v4804_v47 }
 0x344   :  { %v1655_v4 = vadd.f32 %v1654_v20, %v1460_v49  ;;  %v5030_v49 = vpop.permute.xlu0 %1686 }
 0x345   :  { %v1593_v51 = vpop.f32.mrb[36].mxu1  ;;  %v1634_v21 = vpop.f32.mrb[52].mxu0  ;;  %5817 = vst [vmem:[#allocation19_spill] sm:$0xff] %v5030_v49  ;;  %vm1688_vm15 = vcmp.eq.s32.totalorder %v5030_v49, 1 }
 0x346   :  { %3740 = vtanh.f32 %v1655_v4  ;;  %v1661_v1 = vadd.f32 %v1593_v51, %v1473_v50  ;;  %v1595_v30 = vpop.f32.mrb[37].mxu1  ;;  %v3345_v31 = vpop.f32.mrb[53].mxu0  ;;  %v5047_v51 = vld [vmem:[%s5763_s4 + $0x8] ss:$12 sps:$4 sm:$0xff]  }
 0x347   :  { %v1597_v60 = vpop.f32.mrb[38].mxu1  ;;  %v1637_v62 = vpop.f32.mrb[54].mxu0  ;;  %v1668_v8 = vadd.f32 %v1595_v30, %v1474_v25  ;;  %v1463_v30 = vld [vmem:[#allocation2 + $0x88] sm:$0xf0]  ;;  %v5820_v31 = vmov 0  }
 0x348   :  { %v3054_v9 = vmul.f32 -1.442695, %v1661_v1  ;;  %v1598_v48 = vpop.f32.mrb[39].mxu1  ;;  %v3346_v53 = vpop.f32.mrb[55].mxu0  ;;  %v5819_v1 = vmov 0.0   ;;  %v1469_v60 = vrot.slane %v1463_v30, 4 }
 0x349   :  { %v3055_v26 = vmul.f32 -1.442695, %v1668_v8  ;;  %v5059_v25 = vld [vmem:[%s5763_s4 + $0x20] ss:$12 sps:$4 sm:$0xff]   ;;  %v5068_v48 = vld [vmem:[%s5763_s4 + $0x38] ss:$12 sps:$4 sm:$0xff]   ;;  %v5110_v30 = vpop.permute.xlu1 %1692 }
 0x34a   :  { %3742 = vpow2.f32 %v3054_v9  ;;  %v1475_v53 = vunpack.c.l.bf16 %v1469_v60  ;;  %5821 = vst [vmem:[#allocation21_spill] sm:$0xff] %v5110_v30  ;;  %vm1694_vm0 = vcmp.eq.s32.totalorder %v5110_v30, 1 }
 0x34b   :  { %3744 = vpow2.f32 %v3055_v26 }
 0x350   :  { %v3741_v52 = vpop.eup %3740 }
 0x351   :  { %v1658_v38 = vmul.f32 %v3741_v52, %v1657_v28  ;;  %v5077_v28 = vld [vmem:[%s5763_s4 + $0x50] ss:$12 sps:$4 sm:$0xff]  }
 0x353   :  { %v5032_v20 = vadd.f32 %v1659_v22, %v1658_v38  ;;  %v5095_v22 = vld [vmem:[%s5763_s4 + $0x80] ss:$12 sps:$4 sm:$0xff]  }
 0x354   :  { %v3743_v40 = vpop.eup %3742 }
 0x355   :  { %5818 = vst [vmem:[#allocation20_spill] sm:$0xff] %v5032_v20  ;;  %v1665_v4 = vadd.f32 1.0, %v3743_v40  ;;  %v5039_v50 = vsel %vm1688_vm15, %v5032_v20, %v4804_v47  ;;  %v3745_v47 = vpop.eup %3744 }
 0x356   :  { %v1723_v8 = vpack.c.bf16 %v5039_v50, %v5039_v50  ;;  %v1672_v62 = vadd.f32 1.0, %v3745_v47 }
 0x357   :  { %3746 = vrcp.f32 %v1665_v4 }
 0x358   :  { %1757 = vmatmul.mubr.bf16.vlgmr.msra.gmra.mrb[40].mxu1 %v1723_v8  ;;  %3364 = vmatmul.mubr.bf16.vlgmr.msra.gmra.mrb[56].mxu0 %v1723_v8  ;;  %3748 = vrcp.f32 %v1672_v62  ;;  %v5105_v8 = vld [vmem:[%s5763_s4 + $0x98] ss:$12 sps:$4 sm:$0xff]   ;;  %v5119_v62 = vld [vmem:[%s5763_s4 + $0xb0] ss:$12 sps:$4 sm:$0xff]  }
 0x359   :  { %1807 = vmatpush1.bf16.msra.mxu1 %v4816_v10  ;;  %3368 = vmatpush3.bf16.msra.mxu0 %v5047_v51 }
 0x35a   :  { %1808 = vmatprep.subr.bf16.mxu1 %v4823_v45  ;;  %3369 = vmatprep.subr.bf16.mxu0 %v5819_v1 }
 0x35b   :  { %1838 = vmatprep.mubr.bf16.mxu1 %v5820_v31  ;;  %3383 = vmatprep.mubr.msk.bf16.mxu0 %vm3950_vm4, %v5819_v1 }
 0x35d   :  { %1809 = vmatpush1.bf16.msra.mxu1 %v4833_v12  ;;  %3370 = vmatpush3.bf16.msra.mxu0 %v5059_v25 }
 0x35e   :  { %1810 = vmatprep.subr.bf16.mxu1 %v4840_v59  ;;  %3371 = vmatprep.subr.bf16.mxu0 %v5819_v1 }
 0x361   :  { %v3747_v9 = vpop.eup %3746  ;;  %1811 = vmatpush1.bf16.msra.mxu1 %v4847_v13  ;;  %3372 = vmatpush3.bf16.msra.mxu0 %v5068_v48 }
 0x362   :  { %v1675_v16 = vmul.f32 %v3747_v9, %v1634_v21  ;;  %1812 = vmatprep.subr.bf16.mxu1 %v4855_v15  ;;  %3373 = vmatprep.subr.bf16.mxu0 %v5819_v1  ;;  %v5086_v21 = vld [vmem:[%s5763_s4 + $0x68] ss:$12 sps:$4 sm:$0xff]   ;;  %v3749_v52 = vpop.eup %3748 }
 0x363   :  { %v1678_v38 = vsub.f32 1.0, %v3749_v52  ;;  %v1680_v4 = vmul.f32 %v3749_v52, %v4930_v42  ;;  %v1703_v52 = vld [vmem:[#allocation2 + $0x38] sm:$0xf0] }
 0x364   :  { %v1676_v26 = vadd.f32 %v1675_v16, %v1475_v53  ;;  %v1702_v16 = vld [vmem:[#allocation2 + $0x30] sm:$0xf0] }
 0x365   :  { %1813 = vmatpush1.bf16.msra.mxu1 %v4862_v24  ;;  %3374 = vmatpush3.bf16.msra.mxu0 %v5077_v28 }
 0x366   :  { %3750 = vtanh.f32 %v1676_v26  ;;  %1814 = vmatprep.subr.bf16.mxu1 %v4869_v34  ;;  %3375 = vmatprep.subr.bf16.mxu0 %v5819_v1  ;;  %v1708_v26 = vrot.slane %v1702_v16, 4 }
 0x369   :  { %1815 = vmatpush1.bf16.msra.mxu1 %v4876_v63  ;;  %3376 = vmatpush3.bf16.msra.mxu0 %v5086_v21 }
 0x36a   :  { %1816 = vmatprep.subr.bf16.mxu1 %v4883_v37  ;;  %3377 = vmatprep.subr.bf16.mxu0 %v5819_v1 }
 0x36d   :  { %1817 = vmatpush1.bf16.msra.mxu1 %v4890_v29  ;;  %3378 = vmatpush3.bf16.msra.mxu0 %v5095_v22 }
 0x36e   :  { %1818 = vmatprep.subr.bf16.mxu1 %v4897_v39  ;;  %3379 = vmatprep.subr.bf16.mxu0 %v5819_v1 }
 0x370   :  { %v3751_v40 = vpop.eup %3750 }
 0x371   :  { %1819 = vmatpush1.bf16.msra.mxu1 %v4910_v41  ;;  %3380 = vmatpush3.bf16.msra.mxu0 %v5105_v8  ;;  %v1679_v47 = vmul.f32 %v3751_v40, %v1678_v38  ;;  %v1709_v38 = vrot.slane %v1703_v52, 4  ;;  %v1714_v40 = vunpack.c.l.bf16 %v1708_v26  ;;  %v1704_v26 = vld [vmem:[#allocation2 + $0x40] sm:$0xf0] }
 0x372   :  { %1820 = vmatprep.subr.bf16.mxu1 %v4917_v17  ;;  %3381 = vmatprep.subr.bf16.mxu0 %v5819_v1 }
 0x373   :  { %v5112_v60 = vadd.f32 %v1680_v4, %v1679_v47  ;;  %v1715_v30 = vunpack.c.l.bf16 %v1709_v38 }
 0x375   :  { %5822 = vst [vmem:[#allocation22_spill] sm:$0xff] %v5112_v60  ;;  %1821 = vmatpush1.bf16.msra.mxu1 %v4935_v18  ;;  %3382 = vmatpush3.bf16.msra.mxu0 %v5119_v62  ;;  %v5126_v9 = vsel %vm1694_vm0, %v5112_v60, %v4930_v42  ;;  %v5823_v42 = vld [vmem:[#allocation18_spill] sm:$0xff] }
 0x376   :  { %v1805_v53 = vpack.c.bf16 %v5126_v9, %v5126_v9  ;;  %1971 = vmatprep.subr.bf16.mxu1 %v4679_v32  ;;  %3387 = vmatprep.subr.bf16.mxu0 %v5819_v1 }
 0x378   :  { %1839 = vmatmul.mubr.bf16.vlgmr.msra.gmra.mrb[44].mxu1 %v1805_v53  ;;  %3384 = vmatmul.mubr.bf16.vlgmr.msra.gmra.mrb[60].mxu0 %v1805_v53 }
 0x379   :  { %1972 = vmatpush1.bf16.msra.mxu1 %v4689_v33  ;;  %3388 = vmatpush3.bf16.msra.mxu0 %v4947_v54 }
 0x37a   :  { %1973 = vmatprep.subr.bf16.mxu1 %v4696_v36  ;;  %3389 = vmatprep.subr.bf16.mxu0 %v5819_v1 }
 0x37b   :  { %2003 = vmatprep.mubr.bf16.mxu1 %v5820_v31  ;;  %3403 = vmatprep.mubr.msk.bf16.mxu0 %vm3950_vm4, %v5819_v1 }
 0x37d   :  { %1974 = vmatpush1.bf16.msra.mxu1 %v4706_v55  ;;  %3390 = vmatpush3.bf16.msra.mxu0 %v4959_v43 }
 0x37e   :  { %1975 = vmatprep.subr.bf16.mxu1 %v4713_v7  ;;  %3391 = vmatprep.subr.bf16.mxu0 %v5819_v1 }
 0x381   :  { %1976 = vmatpush1.bf16.msra.mxu1 %v4720_v2  ;;  %3392 = vmatpush3.bf16.msra.mxu0 %v4968_v44 }
 0x382   :  { %1977 = vmatprep.subr.bf16.mxu1 %v4727_v11  ;;  %3393 = vmatprep.subr.bf16.mxu0 %v5819_v1 }
 0x385   :  { %1978 = vmatpush1.bf16.msra.mxu1 %v4734_v58  ;;  %3394 = vmatpush3.bf16.msra.mxu0 %v4977_v46 }
 0x386   :  { %1979 = vmatprep.subr.bf16.mxu1 %v4741_v14  ;;  %3395 = vmatprep.subr.bf16.mxu0 %v5819_v1 }
 0x389   :  { %1980 = vmatpush1.bf16.msra.mxu1 %v4748_v0  ;;  %3396 = vmatpush3.bf16.msra.mxu0 %v4986_v5 }
 0x38a   :  { %1981 = vmatprep.subr.bf16.mxu1 %v4755_v19  ;;  %3397 = vmatprep.subr.bf16.mxu0 %v5819_v1 }
 0x38d   :  { %1982 = vmatpush1.bf16.msra.mxu1 %v4762_v57  ;;  %3398 = vmatpush3.bf16.msra.mxu0 %v4995_v3  ;;  %v1710_v3 = vrot.slane %v1704_v26, 4 }
 0x38e   :  { %1983 = vmatprep.subr.bf16.mxu1 %v4769_v23  ;;  %3399 = vmatprep.subr.bf16.mxu0 %v5819_v1 }
 0x391   :  { %1984 = vmatpush1.bf16.msra.mxu1 %v4776_v61  ;;  %3400 = vmatpush3.bf16.msra.mxu0 %v5004_v35 }
 0x392   :  { %1985 = vmatprep.subr.bf16.mxu1 %v4783_v27  ;;  %3401 = vmatprep.subr.bf16.mxu0 %v5819_v1 }
 0x395   :  { %1986 = vmatpush1.bf16.msra.mxu1 %v5012_v56  ;;  %3402 = vmatpush3.bf16.msra.mxu0 %v5018_v6 }
 0x396   :  { %2053 = vmatprep.subr.bf16.mxu1 %v5823_v42  ;;  %3407 = vmatprep.subr.bf16.mxu0 %v5819_v1 }
 0x42b   :  { %v1758_v4 = vpop.f32.mrb[40].mxu1  ;;  %v1799_v47 = vpop.f32.mrb[56].mxu0 }
 0x42c   :  { %v1887_v53 = vadd.f32 %v1758_v4, %v1714_v40  ;;  %v1760_v49 = vpop.f32.mrb[41].mxu1  ;;  %v3365_v20 = vpop.f32.mrb[57].mxu0  ;;  %v1717_v4 = vld [vmem:[#allocation2 + $0x78] ss:$16 sps:$4 sm:$0xff]  }
 0x42d   :  { %v1762_v60 = vpop.f32.mrb[42].mxu1  ;;  %v1802_v27 = vpop.f32.mrb[58].mxu0  ;;  %v1894_v61 = vadd.f32 %v1760_v49, %v1715_v30  ;;  %v1716_v20 = vunpack.c.l.bf16 %v1710_v3 }
 0x42e   :  { %v3057_v56 = vmul.f32 -1.442695, %v1887_v53  ;;  %v1763_v35 = vpop.f32.mrb[43].mxu1  ;;  %v3366_v6 = vpop.f32.mrb[59].mxu0  ;;  %v1720_v60 = vunpack.c.l.bf16 %v1717_v4 }
 0x42f   :  { %v3058_v42 = vmul.f32 -1.442695, %v1894_v61  ;;  %v5167_v35 = vld [vmem:[#allocation2 + $0x70] ss:$16 sps:$4 sm:$0xff]  }
 0x430   :  { %3752 = vpow2.f32 %v3057_v56  ;;  %v1721_v30 = vunpack.c.h.bf16 %v5167_v35 }
 0x431   :  { %3754 = vpow2.f32 %v3058_v42 }
 0x43a   :  { %v3753_v23 = vpop.eup %3752 }
 0x43b   :  { %v1891_v16 = vadd.f32 1.0, %v3753_v23  ;;  %v3755_v52 = vpop.eup %3754 }
 0x43c   :  { %v1898_v57 = vadd.f32 1.0, %v3755_v52 }
 0x43d   :  { %3756 = vrcp.f32 %v1891_v16 }
 0x43e   :  { %3758 = vrcp.f32 %v1898_v57 }
 0x447   :  { %v3757_v40 = vpop.eup %3756 }
 0x448   :  { %v1901_v38 = vmul.f32 %v3757_v40, %v1799_v47  ;;  %v3759_v57 = vpop.eup %3758 }
 0x449   :  { %v1904_v40 = vsub.f32 1.0, %v3759_v57 }
 0x44a   :  { %v1902_v27 = vadd.f32 %v1901_v38, %v1716_v20  ;;  %v5170_v38 = vpop.permute.xlu0 %1933 }
 0x44b   :  { %v1840_v6 = vpop.f32.mrb[44].mxu1  ;;  %v1881_v56 = vpop.f32.mrb[60].mxu0  ;;  %vm1935_vm1 = vcmp.eq.s32.totalorder %v5170_v38, 1  ;;  %v5351_v38 = vld [vmem:[%s5762_s3 + $0x1c] ss:$12 sps:$4 sm:$0xff]  }
 0x44c   :  { %3760 = vtanh.f32 %v1902_v27  ;;  %v1908_v61 = vadd.f32 %v1840_v6, %v1720_v60  ;;  %v1842_v49 = vpop.f32.mrb[45].mxu1  ;;  %v3385_v23 = vpop.f32.mrb[61].mxu0  ;;  %v1906_v27 = vmul.f32 %v3759_v57, %v5039_v50 }
 0x44d   :  { %v1844_v42 = vpop.f32.mrb[46].mxu1  ;;  %v1884_v53 = vpop.f32.mrb[62].mxu0  ;;  %v1915_v3 = vadd.f32 %v1842_v49, %v1721_v30 }
 0x44e   :  { %v3059_v16 = vmul.f32 -1.442695, %v1908_v61  ;;  %v1845_v52 = vpop.f32.mrb[47].mxu1  ;;  %v3386_v26 = vpop.f32.mrb[63].mxu0 }
 0x44f   :  { %v3060_v47 = vmul.f32 -1.442695, %v1915_v3  ;;  %v5211_v57 = vpop.permute.xlu1 %1939 }
 0x450   :  { %3762 = vpow2.f32 %v3059_v16  ;;  %v1722_v16 = vunpack.c.h.bf16 %v1717_v4  ;;  %vm1941_vm2 = vcmp.eq.s32.totalorder %v5211_v57, 1  ;;  %v1957_v57 = vld [vmem:[#allocation2 + $0x58] sm:$0xf0] }
 0x451   :  { %3764 = vpow2.f32 %v3060_v47 }
 0x456   :  { %v3761_v20 = vpop.eup %3760 }
 0x457   :  { %v1905_v60 = vmul.f32 %v3761_v20, %v1904_v40 }
 0x459   :  { %v5173_v6 = vadd.f32 %v1906_v27, %v1905_v60 }
 0x45a   :  { %v3763_v23 = vpop.eup %3762 }
 0x45b   :  { %v1912_v61 = vadd.f32 1.0, %v3763_v23  ;;  %v5180_v49 = vsel %vm1935_vm1, %v5173_v6, %v5039_v50  ;;  %v3765_v42 = vpop.eup %3764 }
 0x45c   :  { %v1970_v30 = vpack.c.bf16 %v5180_v49, %v5180_v49  ;;  %v1919_v50 = vadd.f32 1.0, %v3765_v42 }
 0x45d   :  { %3766 = vrcp.f32 %v1912_v61 }
 0x45e   :  { %2004 = vmatmul.mubr.bf16.vlgmr.msra.gmra.mrb[48].mxu1 %v1970_v30  ;;  %3404 = vmatmul.mubr.bf16.vlgmr.msra.gmra.mrb[64].mxu0 %v1970_v30  ;;  %3768 = vrcp.f32 %v1919_v50 }
 0x45f   :  { %2054 = vmatpush1.bf16.msra.mxu1 %v4816_v10  ;;  %3408 = vmatpush3.bf16.msra.mxu0 %v5047_v51 }
 0x460   :  { %2055 = vmatprep.subr.bf16.mxu1 %v4823_v45  ;;  %3409 = vmatprep.subr.bf16.mxu0 %v5819_v1 }
 0x461   :  { %2085 = vmatprep.mubr.bf16.mxu1 %v5820_v31  ;;  %3423 = vmatprep.mubr.msk.bf16.mxu0 %vm3950_vm4, %v5819_v1 }
 0x463   :  { %2056 = vmatpush1.bf16.msra.mxu1 %v4833_v12  ;;  %3410 = vmatpush3.bf16.msra.mxu0 %v5059_v25 }
 0x464   :  { %2057 = vmatprep.subr.bf16.mxu1 %v4840_v59  ;;  %3411 = vmatprep.subr.bf16.mxu0 %v5819_v1 }
 0x467   :  { %v3767_v53 = vpop.eup %3766  ;;  %2058 = vmatpush1.bf16.msra.mxu1 %v4847_v13  ;;  %3412 = vmatpush3.bf16.msra.mxu0 %v5068_v48 }
 0x468   :  { %v1922_v52 = vmul.f32 %v3767_v53, %v1881_v56  ;;  %2059 = vmatprep.subr.bf16.mxu1 %v4855_v15  ;;  %3413 = vmatprep.subr.bf16.mxu0 %v5819_v1  ;;  %v3769_v4 = vpop.eup %3768 }
 0x469   :  { %v1925_v56 = vsub.f32 1.0, %v3769_v4  ;;  %v1927_v47 = vmul.f32 %v3769_v4, %v5126_v9 }
 0x46a   :  { %v1923_v26 = vadd.f32 %v1922_v52, %v1722_v16 }
 0x46b   :  { %2060 = vmatpush1.bf16.msra.mxu1 %v4862_v24  ;;  %3414 = vmatpush3.bf16.msra.mxu0 %v5077_v28 }
 0x46c   :  { %3770 = vtanh.f32 %v1923_v26  ;;  %2061 = vmatprep.subr.bf16.mxu1 %v4869_v34  ;;  %3415 = vmatprep.subr.bf16.mxu0 %v5819_v1 }
 0x46f   :  { %2062 = vmatpush1.bf16.msra.mxu1 %v4876_v63  ;;  %3416 = vmatpush3.bf16.msra.mxu0 %v5086_v21 }
 0x470   :  { %2063 = vmatprep.subr.bf16.mxu1 %v4883_v37  ;;  %3417 = vmatprep.subr.bf16.mxu0 %v5819_v1 }
 0x473   :  { %2064 = vmatpush1.bf16.msra.mxu1 %v4890_v29  ;;  %3418 = vmatpush3.bf16.msra.mxu0 %v5095_v22 }
 0x474   :  { %2065 = vmatprep.subr.bf16.mxu1 %v4897_v39  ;;  %3419 = vmatprep.subr.bf16.mxu0 %v5819_v1 }
 0x476   :  { %v3771_v3 = vpop.eup %3770 }
 0x477   :  { %2066 = vmatpush1.bf16.msra.mxu1 %v4910_v41  ;;  %3420 = vmatpush3.bf16.msra.mxu0 %v5105_v8  ;;  %v1926_v40 = vmul.f32 %v3771_v3, %v1925_v56 }
 0x478   :  { %2067 = vmatprep.subr.bf16.mxu1 %v4917_v17  ;;  %3421 = vmatprep.subr.bf16.mxu0 %v5819_v1 }
 0x479   :  { %v5218_v20 = vadd.f32 %v1927_v47, %v1926_v40 }
 0x47b   :  { %2068 = vmatpush1.bf16.msra.mxu1 %v4935_v18  ;;  %3422 = vmatpush3.bf16.msra.mxu0 %v5119_v62  ;;  %v5227_v27 = vsel %vm1941_vm2, %v5218_v20, %v5126_v9 }
 0x47c   :  { %v2052_v60 = vpack.c.bf16 %v5227_v27, %v5227_v27  ;;  %2206 = vmatprep.subr.bf16.mxu1 %v4679_v32  ;;  %3427 = vmatprep.subr.bf16.mxu0 %v5819_v1  ;;  %v5824_v32 = vld [vmem:[#allocation6_spill] sm:$0xff] }
 0x47e   :  { %2086 = vmatmul.mubr.bf16.vlgmr.msra.gmra.mrb[52].mxu1 %v2052_v60  ;;  %3424 = vmatmul.mubr.bf16.vlgmr.msra.gmra.mrb[68].mxu0 %v2052_v60 }
 0x47f   :  { %2207 = vmatpush1.bf16.msra.mxu1 %v4689_v33  ;;  %3428 = vmatpush3.bf16.msra.mxu0 %v4947_v54  ;;  %v5825_v33 = vld [vmem:[#allocation14_spill] sm:$0xff] }
 0x480   :  { %2208 = vmatprep.subr.bf16.mxu1 %v4696_v36  ;;  %3429 = vmatprep.subr.bf16.mxu0 %v5819_v1  ;;  %v5826_v36 = vld [vmem:[#allocation7_spill] sm:$0xff] }
 0x481   :  { %2238 = vmatprep.mubr.bf16.mxu1 %v5820_v31  ;;  %3443 = vmatprep.mubr.msk.bf16.mxu0 %vm3950_vm4, %v5819_v1 }
 0x483   :  { %2209 = vmatpush1.bf16.msra.mxu1 %v4706_v55  ;;  %3430 = vmatpush3.bf16.msra.mxu0 %v4959_v43  ;;  %v5827_v55 = vld [vmem:[#allocation8_spill] sm:$0xff] }
 0x484   :  { %2210 = vmatprep.subr.bf16.mxu1 %v4713_v7  ;;  %3431 = vmatprep.subr.bf16.mxu0 %v5819_v1  ;;  %v5828_v7 = vld [vmem:[#allocation15_spill] sm:$0xff] }
 0x487   :  { %2211 = vmatpush1.bf16.msra.mxu1 %v4720_v2  ;;  %3432 = vmatpush3.bf16.msra.mxu0 %v4968_v44  ;;  %v5829_v2 = vld [vmem:[#allocation9_spill] sm:$0xff] }
 0x488   :  { %2212 = vmatprep.subr.bf16.mxu1 %v4727_v11  ;;  %3433 = vmatprep.subr.bf16.mxu0 %v5819_v1  ;;  %v5830_v11 = vld [vmem:[#allocation16_spill] sm:$0xff] }
 0x48b   :  { %2213 = vmatpush1.bf16.msra.mxu1 %v4734_v58  ;;  %3434 = vmatpush3.bf16.msra.mxu0 %v4977_v46  ;;  %v5831_v58 = vld [vmem:[#allocation17_spill] sm:$0xff] }
 0x48c   :  { %2214 = vmatprep.subr.bf16.mxu1 %v4741_v14  ;;  %3435 = vmatprep.subr.bf16.mxu0 %v5819_v1  ;;  %v5832_v14 = vld [vmem:[#allocation18_spill] sm:$0xff] }
 0x48f   :  { %2215 = vmatpush1.bf16.msra.mxu1 %v4748_v0  ;;  %3436 = vmatpush3.bf16.msra.mxu0 %v4986_v5  ;;  %v1949_v0 = vld [vmem:[#allocation2 + $0x60] ss:$8 sps:$4 sm:$0xff]  }
 0x490   :  { %2216 = vmatprep.subr.bf16.mxu1 %v4755_v19  ;;  %3437 = vmatprep.subr.bf16.mxu0 %v5819_v1  ;;  %v1952_v19 = vunpack.c.l.bf16 %v1949_v0  ;;  %v1953_v50 = vunpack.c.h.bf16 %v1949_v0  ;;  %v1954_v0 = vunpack.c.l.bf16 %v5167_v35 }
 0x493   :  { %2217 = vmatpush1.bf16.msra.mxu1 %v5824_v32  ;;  %3438 = vmatpush3.bf16.msra.mxu0 %v5825_v33  ;;  %v1955_v32 = vld [vmem:[#allocation2 + $0x48] sm:$0xf0] }
 0x494   :  { %2218 = vmatprep.subr.bf16.mxu1 %v5826_v36  ;;  %3439 = vmatprep.subr.bf16.mxu0 %v5819_v1 }
 0x497   :  { %2219 = vmatpush1.bf16.msra.mxu1 %v5827_v55  ;;  %3440 = vmatpush3.bf16.msra.mxu0 %v5828_v7  ;;  %v1961_v55 = vrot.slane %v1955_v32, 4 }
 0x498   :  { %2220 = vmatprep.subr.bf16.mxu1 %v5829_v2  ;;  %3441 = vmatprep.subr.bf16.mxu0 %v5819_v1  ;;  %v1956_v2 = vld [vmem:[#allocation2 + $0x50] sm:$0xf0] }
 0x49b   :  { %2221 = vmatpush1.bf16.msra.mxu1 %v5830_v11  ;;  %3442 = vmatpush3.bf16.msra.mxu0 %v5831_v58 }
 0x49c   :  { %2288 = vmatprep.subr.bf16.mxu1 %v5832_v14  ;;  %3447 = vmatprep.subr.bf16.mxu0 %v5819_v1 }
 0x531   :  { %v2005_v9 = vpop.f32.mrb[48].mxu1  ;;  %v2046_v23 = vpop.f32.mrb[64].mxu0 }
 0x532   :  { %v2134_v61 = vadd.f32 %v2005_v9, %v1952_v19  ;;  %v2007_v30 = vpop.f32.mrb[49].mxu1  ;;  %v3405_v42 = vpop.f32.mrb[65].mxu0 }
 0x533   :  { %v2009_v53 = vpop.f32.mrb[50].mxu1  ;;  %v2049_v16 = vpop.f32.mrb[66].mxu0  ;;  %v2141_v56 = vadd.f32 %v2007_v30, %v1953_v50 }
 0x534   :  { %v3062_v52 = vmul.f32 -1.442695, %v2134_v61  ;;  %v2010_v26 = vpop.f32.mrb[51].mxu1  ;;  %v3406_v4 = vpop.f32.mrb[67].mxu0  ;;  %v1962_v61 = vrot.slane %v1956_v2, 4  ;;  %v1967_v53 = vunpack.c.l.bf16 %v1961_v55 }
 0x535   :  { %v3063_v3 = vmul.f32 -1.442695, %v2141_v56 }
 0x536   :  { %3772 = vpow2.f32 %v3062_v52  ;;  %v1968_v4 = vunpack.c.l.bf16 %v1962_v61  ;;  %v1946_v61 = vsel %vm1941_vm2, %v5218_v20, 0.0  ;;  %v1963_v20 = vrot.slane %v1957_v57, 4 }
 0x537   :  { %3774 = vpow2.f32 %v3063_v3 }
 0x540   :  { %v3773_v47 = vpop.eup %3772 }
 0x541   :  { %v2138_v40 = vadd.f32 1.0, %v3773_v47  ;;  %v3775_v60 = vpop.eup %3774 }
 0x542   :  { %v2145_v36 = vadd.f32 1.0, %v3775_v60 }
 0x543   :  { %3776 = vrcp.f32 %v2138_v40 }
 0x544   :  { %3778 = vrcp.f32 %v2145_v36 }
 0x54d   :  { %v3777_v19 = vpop.eup %3776 }
 0x54e   :  { %v2148_v9 = vmul.f32 %v3777_v19, %v2046_v23  ;;  %v3779_v35 = vpop.eup %3778 }
 0x54f   :  { %v2151_v36 = vsub.f32 1.0, %v3779_v35  ;;  %v2153_v55 = vmul.f32 %v3779_v35, %v5180_v49 }
 0x550   :  { %v2149_v42 = vadd.f32 %v2148_v9, %v1954_v0 }
 0x551   :  { %v2087_v30 = vpop.f32.mrb[52].mxu1  ;;  %v2128_v50 = vpop.f32.mrb[68].mxu0 }
 0x552   :  { %3780 = vtanh.f32 %v2149_v42  ;;  %v2155_v16 = vadd.f32 %v2087_v30, %v1967_v53  ;;  %v2089_v52 = vpop.f32.mrb[53].mxu1  ;;  %v3425_v26 = vpop.f32.mrb[69].mxu0 }
 0x553   :  { %v2091_v56 = vpop.f32.mrb[54].mxu1  ;;  %v2131_v3 = vpop.f32.mrb[70].mxu0  ;;  %v2162_v32 = vadd.f32 %v2089_v52, %v1968_v4 }
 0x554   :  { %v3064_v47 = vmul.f32 -1.442695, %v2155_v16  ;;  %v2092_v40 = vpop.f32.mrb[55].mxu1  ;;  %v3426_v60 = vpop.f32.mrb[71].mxu0  ;;  %v5389_v56 = vld [vmem:[%s5762_s3 + $0x48] ss:$12 sps:$4 sm:$0xff]  }
 0x555   :  { %v3065_v23 = vmul.f32 -1.442695, %v2162_v32  ;;  %v5403_v3 = vld [vmem:[%s5762_s3 + $0x60] ss:$12 sps:$4 sm:$0xff]   ;;  %v5431_v40 = vld [vmem:[%s5762_s3 + $0x90] ss:$12 sps:$4 sm:$0xff]  }
 0x556   :  { %3782 = vpow2.f32 %v3064_v47  ;;  %v5417_v47 = vld [vmem:[%s5762_s3 + $0x78] ss:$12 sps:$4 sm:$0xff]  }
 0x557   :  { %3784 = vpow2.f32 %v3065_v23  ;;  %v2184_v60 = vld [vmem:[#allocation2 + $0x60] sm:$0xf0] }
 0x558   :  { %v2190_v32 = vrot.slane %v2184_v60, 4 }
 0x55a   :  { %v2196_v23 = vunpack.c.l.bf16 %v2190_v32 }
 0x55c   :  { %v3781_v2 = vpop.eup %3780 }
 0x55d   :  { %v2152_v19 = vmul.f32 %v3781_v2, %v2151_v36 }
 0x55f   :  { %v2154_v0 = vadd.f32 %v2153_v55, %v2152_v19 }
 0x560   :  { %v3783_v9 = vpop.eup %3782 }
 0x561   :  { %v2159_v42 = vadd.f32 1.0, %v3783_v9  ;;  %v5276_v53 = vsel %vm1941_vm2, %v2154_v0, %v5180_v49  ;;  %v2178_v30 = vsel %vm1941_vm2, %v2154_v0, 0.0  ;;  %v3785_v49 = vpop.eup %3784 }
 0x562   :  { %v2205_v16 = vpack.c.bf16 %v5276_v53, %v5276_v53  ;;  %v2908_v52 = vadd.f32 %v2178_v30, %v1946_v61  ;;  %v2166_v26 = vadd.f32 1.0, %v3785_v49 }
 0x563   :  { %3786 = vrcp.f32 %v2159_v42 }
 0x564   :  { %2239 = vmatmul.mubr.bf16.vlgmr.msra.gmra.mrb[56].mxu1 %v2205_v16  ;;  %2916 = vst [vmem:[%s5766_s6 + $0x20] sm:$0xff] %v2908_v52  ;;  %3444 = vmatmul.mubr.bf16.vlgmr.msra.gmra.mrb[72].mxu0 %v2205_v16  ;;  %3788 = vrcp.f32 %v2166_v26 }
 0x565   :  { %2289 = vmatpush1.bf16.msra.mxu1 %v4816_v10  ;;  %3448 = vmatpush3.bf16.msra.mxu0 %v5047_v51 }
 0x566   :  { %2290 = vmatprep.subr.bf16.mxu1 %v4823_v45  ;;  %3449 = vmatprep.subr.bf16.mxu0 %v5819_v1  ;;  %v1969_v45 = vunpack.c.l.bf16 %v1963_v20  ;;  %v2186_v20 = vld [vmem:[#allocation2 + $0x70] sm:$0xf0] }
 0x567   :  { %2320 = vmatprep.mubr.bf16.mxu1 %v5820_v31  ;;  %3463 = vmatprep.mubr.msk.bf16.mxu0 %vm3950_vm4, %v5819_v1  ;;  %v2192_v26 = vrot.slane %v2186_v20, 4 }
 0x569   :  { %2291 = vmatpush1.bf16.msra.mxu1 %v4833_v12  ;;  %3450 = vmatpush3.bf16.msra.mxu0 %v5059_v25 }
 0x56a   :  { %2292 = vmatprep.subr.bf16.mxu1 %v4840_v59  ;;  %3451 = vmatprep.subr.bf16.mxu0 %v5819_v1 }
 0x56d   :  { %v3787_v10 = vpop.eup %3786  ;;  %2293 = vmatpush1.bf16.msra.mxu1 %v4847_v13  ;;  %3452 = vmatpush3.bf16.msra.mxu0 %v5068_v48 }
 0x56e   :  { %v2169_v4 = vmul.f32 %v3787_v10, %v2128_v50  ;;  %2294 = vmatprep.subr.bf16.mxu1 %v4855_v15  ;;  %3453 = vmatprep.subr.bf16.mxu0 %v5819_v1  ;;  %v3789_v59 = vpop.eup %3788  ;;  %v5375_v50 = vld [vmem:[%s5762_s3 + $0x30] ss:$12 sps:$4 sm:$0xff]  }
 0x56f   :  { %v2172_v13 = vsub.f32 1.0, %v3789_v59 }
 0x570   :  { %v2170_v12 = vadd.f32 %v2169_v4, %v1969_v45  ;;  %v5446_v4 = vld [vmem:[#allocation2 + $0x48] ss:$16 sps:$4 sm:$0xff]  }
 0x571   :  { %2295 = vmatpush1.bf16.msra.mxu1 %v4862_v24  ;;  %3454 = vmatpush3.bf16.msra.mxu0 %v5077_v28  ;;  %v2174_v24 = vmul.f32 %v3789_v59, %v5227_v27 }
 0x572   :  { %3790 = vtanh.f32 %v2170_v12  ;;  %2296 = vmatprep.subr.bf16.mxu1 %v4869_v34  ;;  %3455 = vmatprep.subr.bf16.mxu0 %v5819_v1  ;;  %v2198_v12 = vunpack.c.l.bf16 %v2192_v26  ;;  %v5471_v26 = vld [vmem:[%s5763_s4] ss:$12 sps:$4 sm:$0xff]  }
 0x575   :  { %2297 = vmatpush1.bf16.msra.mxu1 %v4876_v63  ;;  %3456 = vmatpush3.bf16.msra.mxu0 %v5086_v21 }
 0x576   :  { %2298 = vmatprep.subr.bf16.mxu1 %v4883_v37  ;;  %3457 = vmatprep.subr.bf16.mxu0 %v5819_v1  ;;  %v1943_v37 = vsel %vm1935_vm1, %v5173_v6, 0.0  ;;  %v5334_v6 = vld [vmem:[%s5762_s3 + $0x4] ss:$12 sps:$4 sm:$0xff]  }
 0x579   :  { %2299 = vmatpush1.bf16.msra.mxu1 %v4890_v29  ;;  %3458 = vmatpush3.bf16.msra.mxu0 %v5095_v22 }
 0x57a   :  { %2300 = vmatprep.subr.bf16.mxu1 %v4897_v39  ;;  %3459 = vmatprep.subr.bf16.mxu0 %v5819_v1 }
 0x57c   :  { %v3791_v15 = vpop.eup %3790 }
 0x57d   :  { %2301 = vmatpush1.bf16.msra.mxu1 %v4910_v41  ;;  %3460 = vmatpush3.bf16.msra.mxu0 %v5105_v8  ;;  %v2173_v34 = vmul.f32 %v3791_v15, %v2172_v13  ;;  %v2202_v15 = vunpack.c.l.bf16 %v5446_v4 }
 0x57e   :  { %2302 = vmatprep.subr.bf16.mxu1 %v4917_v17  ;;  %3461 = vmatprep.subr.bf16.mxu0 %v5819_v1 }
 0x57f   :  { %v2175_v63 = vadd.f32 %v2174_v24, %v2173_v34  ;;  %v5449_v24 = vld [vmem:[#allocation2 + $0x50] ss:$80 sps:$4 sm:$0xff]  }
 0x581   :  { %2303 = vmatpush1.bf16.msra.mxu1 %v4935_v18  ;;  %3462 = vmatpush3.bf16.msra.mxu0 %v5119_v62  ;;  %v5325_v29 = vsel %vm1935_vm1, %v2175_v63, %v5227_v27  ;;  %v2181_v39 = vsel %vm1935_vm1, %v2175_v63, 0.0  ;;  %v5344_v18 = vld [vmem:[%s5762_s3] ss:$12 sps:$4 sm:$0xff]   ;;  %v5361_v27 = vld [vmem:[%s5762_s3 + $0x18] ss:$12 sps:$4 sm:$0xff]  }
 0x582   :  { %v2287_v41 = vpack.c.bf16 %v5325_v29, %v5325_v29  ;;  %v2907_v17 = vadd.f32 %v2181_v39, %v1943_v37  ;;  %2441 = vmatprep.subr.bf16.mxu1 %v5334_v6  ;;  %3467 = vmatprep.subr.bf16.mxu0 %v5819_v1 }
 0x584   :  { %2321 = vmatmul.mubr.bf16.vlgmr.msra.gmra.mrb[60].mxu1 %v2287_v41  ;;  %2915 = vst [vmem:[%s5766_s6 + $0x18] sm:$0xff] %v2907_v17  ;;  %3464 = vmatmul.mubr.bf16.vlgmr.msra.gmra.mrb[76].mxu0 %v2287_v41  ;;  %v2203_v17 = vunpack.c.l.bf16 %v5449_v24 }
 0x585   :  { %2442 = vmatpush1.bf16.msra.mxu1 %v5344_v18  ;;  %3468 = vmatpush3.bf16.msra.mxu0 %v4947_v54  ;;  %v5368_v54 = vld [vmem:[%s5762_s3 + $0x34] ss:$12 sps:$4 sm:$0xff]  }
 0x586   :  { %2443 = vmatprep.subr.bf16.mxu1 %v5351_v38  ;;  %3469 = vmatprep.subr.bf16.mxu0 %v5819_v1 }
 0x587   :  { %2473 = vmatprep.mubr.bf16.mxu1 %v5820_v31  ;;  %3483 = vmatprep.mubr.msk.bf16.mxu0 %vm3950_vm4, %v5819_v1 }
 0x589   :  { %2444 = vmatpush1.bf16.msra.mxu1 %v5361_v27  ;;  %3470 = vmatpush3.bf16.msra.mxu0 %v4959_v43  ;;  %v5382_v43 = vld [vmem:[%s5762_s3 + $0x4c] ss:$12 sps:$4 sm:$0xff]  }
 0x58a   :  { %2445 = vmatprep.subr.bf16.mxu1 %v5368_v54  ;;  %3471 = vmatprep.subr.bf16.mxu0 %v5819_v1 }
 0x58d   :  { %2446 = vmatpush1.bf16.msra.mxu1 %v5375_v50  ;;  %3472 = vmatpush3.bf16.msra.mxu0 %v4968_v44  ;;  %v5396_v44 = vld [vmem:[%s5762_s3 + $0x64] ss:$12 sps:$4 sm:$0xff]  }
 0x58e   :  { %2447 = vmatprep.subr.bf16.mxu1 %v5382_v43  ;;  %3473 = vmatprep.subr.bf16.mxu0 %v5819_v1 }
 0x591   :  { %2448 = vmatpush1.bf16.msra.mxu1 %v5389_v56  ;;  %3474 = vmatpush3.bf16.msra.mxu0 %v4977_v46  ;;  %v5410_v46 = vld [vmem:[%s5762_s3 + $0x7c] ss:$12 sps:$4 sm:$0xff]  }
 0x592   :  { %2449 = vmatprep.subr.bf16.mxu1 %v5396_v44  ;;  %3475 = vmatprep.subr.bf16.mxu0 %v5819_v1 }
 0x595   :  { %2450 = vmatpush1.bf16.msra.mxu1 %v5403_v3  ;;  %3476 = vmatpush3.bf16.msra.mxu0 %v4986_v5  ;;  %v5424_v5 = vld [vmem:[%s5762_s3 + $0x94] ss:$12 sps:$4 sm:$0xff]  }
 0x596   :  { %2451 = vmatprep.subr.bf16.mxu1 %v5410_v46  ;;  %3477 = vmatprep.subr.bf16.mxu0 %v5819_v1 }
 0x599   :  { %2452 = vmatpush1.bf16.msra.mxu1 %v5417_v47  ;;  %3478 = vmatpush3.bf16.msra.mxu0 %v5825_v33  ;;  %v5438_v33 = vld [vmem:[%s5762_s3 + $0xac] ss:$12 sps:$4 sm:$0xff]  }
 0x59a   :  { %2453 = vmatprep.subr.bf16.mxu1 %v5424_v5  ;;  %3479 = vmatprep.subr.bf16.mxu0 %v5819_v1 }
 0x59d   :  { %2454 = vmatpush1.bf16.msra.mxu1 %v5431_v40  ;;  %3480 = vmatpush3.bf16.msra.mxu0 %v5828_v7  ;;  %v2185_v7 = vld [vmem:[#allocation2 + $0x68] sm:$0xf0] }
 0x59e   :  { %2455 = vmatprep.subr.bf16.mxu1 %v5438_v33  ;;  %3481 = vmatprep.subr.bf16.mxu0 %v5819_v1  ;;  %v2191_v35 = vrot.slane %v2185_v7, 4 }
 0x5a0   :  { %v2197_v9 = vunpack.c.l.bf16 %v2191_v35 }
 0x5a1   :  { %2456 = vmatpush1.bf16.msra.mxu1 %v5830_v11  ;;  %3482 = vmatpush3.bf16.msra.mxu0 %v5831_v58 }
 0x5a2   :  { %2523 = vmatprep.subr.bf16.mxu1 %v5832_v14  ;;  %3487 = vmatprep.subr.bf16.mxu0 %v5819_v1 }
 0x637   :  { %v2240_v36 = vpop.f32.mrb[56].mxu1  ;;  %v2281_v2 = vpop.f32.mrb[72].mxu0 }
 0x638   :  { %v2369_v55 = vadd.f32 %v2240_v36, %v2196_v23  ;;  %v2242_v19 = vpop.f32.mrb[57].mxu1  ;;  %v3445_v0 = vpop.f32.mrb[73].mxu0 }
 0x639   :  { %v2244_v61 = vpop.f32.mrb[58].mxu1  ;;  %v2284_v42 = vpop.f32.mrb[74].mxu0  ;;  %v2376_v16 = vadd.f32 %v2242_v19, %v2197_v9 }
 0x63a   :  { %v3067_v11 = vmul.f32 -1.442695, %v2369_v55  ;;  %v2245_v30 = vpop.f32.mrb[59].mxu1  ;;  %v3446_v58 = vpop.f32.mrb[75].mxu0 }
 0x63b   :  { %v3068_v14 = vmul.f32 -1.442695, %v2376_v16  ;;  %v5833_v30 = vld [vmem:[#allocation22_spill] sm:$0xff] }
 0x63c   :  { %3792 = vpow2.f32 %v3067_v11  ;;  %v1699_v16 = vsel %vm1694_vm0, %v5833_v30, 0.0 }
 0x63d   :  { %3794 = vpow2.f32 %v3068_v14 }
 0x646   :  { %v3793_v52 = vpop.eup %3792 }
 0x647   :  { %v2373_v49 = vadd.f32 1.0, %v3793_v52  ;;  %v3795_v57 = vpop.eup %3794 }
 0x648   :  { %v2380_v10 = vadd.f32 1.0, %v3795_v57 }
 0x649   :  { %3796 = vrcp.f32 %v2373_v49 }
 0x64a   :  { %3798 = vrcp.f32 %v2380_v10 }
 0x653   :  { %v3797_v45 = vpop.eup %3796 }
 0x654   :  { %v2383_v59 = vmul.f32 %v3797_v45, %v2281_v2  ;;  %v3799_v2 = vpop.eup %3798  ;;  %v5488_v45 = vld [vmem:[%s5763_s4 + $0x18] ss:$12 sps:$4 sm:$0xff]  }
 0x655   :  { %v2386_v19 = vsub.f32 1.0, %v3799_v2  ;;  %v2388_v9 = vmul.f32 %v3799_v2, %v5276_v53 }
 0x656   :  { %v2384_v13 = vadd.f32 %v2383_v59, %v2198_v12  ;;  %v5495_v12 = vld [vmem:[%s5763_s4 + $0x34] ss:$12 sps:$4 sm:$0xff]  }
 0x657   :  { %v2322_v34 = vpop.f32.mrb[60].mxu1  ;;  %v2363_v63 = vpop.f32.mrb[76].mxu0 }
 0x658   :  { %3800 = vtanh.f32 %v2384_v13  ;;  %v2390_v37 = vadd.f32 %v2322_v34, %v2202_v15  ;;  %v2324_v39 = vpop.f32.mrb[61].mxu1  ;;  %v3465_v41 = vpop.f32.mrb[77].mxu0  ;;  %v5502_v13 = vld [vmem:[%s5763_s4 + $0x30] ss:$12 sps:$4 sm:$0xff]   ;;  %v5510_v34 = vld [vmem:[%s5763_s4 + $0x4c] ss:$12 sps:$4 sm:$0xff]  }
 0x659   :  { %v2326_v60 = vpop.f32.mrb[62].mxu1  ;;  %v2366_v32 = vpop.f32.mrb[78].mxu0  ;;  %v2397_v36 = vadd.f32 %v2324_v39, %v2203_v17  ;;  %v5517_v39 = vld [vmem:[%s5763_s4 + $0x48] ss:$12 sps:$4 sm:$0xff]   ;;  %v5545_v41 = vld [vmem:[%s5763_s4 + $0x78] ss:$12 sps:$4 sm:$0xff]  }
 0x65a   :  { %v3069_v7 = vmul.f32 -1.442695, %v2390_v37  ;;  %v2327_v35 = vpop.f32.mrb[63].mxu1  ;;  %v3466_v23 = vpop.f32.mrb[79].mxu0 }
 0x65b   :  { %v3070_v55 = vmul.f32 -1.442695, %v2397_v36  ;;  %v5567_v35 = vld [vmem:[%s5763_s4 + $0xac] ss:$12 sps:$4 sm:$0xff]   ;;  %v5835_v36 = vld [vmem:[#allocation20_spill] sm:$0xff] }
 0x65c   :  { %3802 = vpow2.f32 %v3069_v7  ;;  %v5560_v7 = vld [vmem:[%s5763_s4 + $0x90] ss:$12 sps:$4 sm:$0xff]  }
 0x65d   :  { %3804 = vpow2.f32 %v3070_v55  ;;  %v1696_v55 = vsel %vm1688_vm15, %v5835_v36, 0.0 }
 0x662   :  { %v3801_v0 = vpop.eup %3800 }
 0x663   :  { %v2387_v61 = vmul.f32 %v3801_v0, %v2386_v19  ;;  %v5577_v19 = vld [vmem:[%s5763_s4 + $0xa8] ss:$12 sps:$4 sm:$0xff]  }
 0x665   :  { %v2389_v42 = vadd.f32 %v2388_v9, %v2387_v61 }
 0x666   :  { %v3803_v11 = vpop.eup %3802 }
 0x667   :  { %v2394_v14 = vadd.f32 1.0, %v3803_v11  ;;  %v5459_v52 = vsel %vm1694_vm0, %v2389_v42, %v5276_v53  ;;  %v2413_v49 = vsel %vm1694_vm0, %v2389_v42, 0.0  ;;  %v5478_v53 = vld [vmem:[%s5763_s4 + $0x1c] ss:$12 sps:$4 sm:$0xff]   ;;  %v3805_v10 = vpop.eup %3804 }
 0x668   :  { %v2440_v57 = vpack.c.bf16 %v5459_v52, %v5459_v52  ;;  %v2909_v20 = vadd.f32 %v2413_v49, %v1699_v16 }
 0x669   :  { %3806 = vrcp.f32 %v2394_v14 }
 0x66a   :  { %2474 = vmatmul.mubr.bf16.vlgmr.msra.gmra.mrb[64].mxu1 %v2440_v57  ;;  %2917 = vst [vmem:[%s5766_s6 + $0x28] sm:$0xff] %v2909_v20  ;;  %3484 = vmatmul.mubr.bf16.vlgmr.msra.gmra.mrb[80].mxu0 %v2440_v57 }
 0x66b   :  { %2524 = vmatpush1.bf16.msra.mxu1 %v5471_v26  ;;  %3488 = vmatpush3.bf16.msra.mxu0 %v5047_v51  ;;  %v2401_v51 = vadd.f32 1.0, %v3805_v10 }
 0x66c   :  { %2525 = vmatprep.subr.bf16.mxu1 %v5478_v53  ;;  %3489 = vmatprep.subr.bf16.mxu0 %v5819_v1 }
 0x66d   :  { %2555 = vmatprep.mubr.bf16.mxu1 %v5820_v31  ;;  %3503 = vmatprep.mubr.msk.bf16.mxu0 %vm3950_vm4, %v5819_v1  ;;  %3808 = vrcp.f32 %v2401_v51 }
 0x66f   :  { %2526 = vmatpush1.bf16.msra.mxu1 %v5488_v45  ;;  %3490 = vmatpush3.bf16.msra.mxu0 %v5059_v25  ;;  %v2204_v25 = vunpack.c.h.bf16 %v5446_v4  ;;  %v5531_v4 = vld [vmem:[%s5763_s4 + $0x60] ss:$12 sps:$4 sm:$0xff]  }
 0x670   :  { %2527 = vmatprep.subr.bf16.mxu1 %v5495_v12  ;;  %3491 = vmatprep.subr.bf16.mxu0 %v5819_v1 }
 0x673   :  { %v3807_v59 = vpop.eup %3806  ;;  %2528 = vmatpush1.bf16.msra.mxu1 %v5502_v13  ;;  %3492 = vmatpush3.bf16.msra.mxu0 %v5068_v48  ;;  %v5524_v48 = vld [vmem:[%s5763_s4 + $0x64] ss:$12 sps:$4 sm:$0xff]  }
 0x674   :  { %v2404_v15 = vmul.f32 %v3807_v59, %v2363_v63  ;;  %2529 = vmatprep.subr.bf16.mxu1 %v5510_v34  ;;  %3493 = vmatprep.subr.bf16.mxu0 %v5819_v1  ;;  %v2425_v59 = vld [vmem:[#allocation2 + $0x18] sm:$0xf0] }
 0x676   :  { %v2405_v37 = vadd.f32 %v2404_v15, %v2204_v25  ;;  %v2431_v15 = vrot.slane %v2425_v59, 4 }
 0x677   :  { %2530 = vmatpush1.bf16.msra.mxu1 %v5517_v39  ;;  %3494 = vmatpush3.bf16.msra.mxu0 %v5077_v28  ;;  %v5538_v28 = vld [vmem:[%s5763_s4 + $0x7c] ss:$12 sps:$4 sm:$0xff]   ;;  %v3809_v63 = vpop.eup %3808 }
 0x678   :  { %3810 = vtanh.f32 %v2405_v37  ;;  %2531 = vmatprep.subr.bf16.mxu1 %v5524_v48  ;;  %3495 = vmatprep.subr.bf16.mxu0 %v5819_v1  ;;  %v2407_v17 = vsub.f32 1.0, %v3809_v63  ;;  %v2409_v32 = vmul.f32 %v3809_v63, %v5325_v29  ;;  %v2426_v37 = vld [vmem:[#allocation2 + $0x20] sm:$0xf0] }
 0x67b   :  { %2532 = vmatpush1.bf16.msra.mxu1 %v5531_v4  ;;  %3496 = vmatpush3.bf16.msra.mxu0 %v5086_v21  ;;  %v5552_v21 = vld [vmem:[%s5763_s4 + $0x94] ss:$12 sps:$4 sm:$0xff]  }
 0x67c   :  { %2533 = vmatprep.subr.bf16.mxu1 %v5538_v28  ;;  %3497 = vmatprep.subr.bf16.mxu0 %v5819_v1 }
 0x67f   :  { %2534 = vmatpush1.bf16.msra.mxu1 %v5545_v41  ;;  %3498 = vmatpush3.bf16.msra.mxu0 %v5095_v22 }
 0x680   :  { %2535 = vmatprep.subr.bf16.mxu1 %v5552_v21  ;;  %3499 = vmatprep.subr.bf16.mxu0 %v5819_v1 }
 0x682   :  { %v3811_v60 = vpop.eup %3810 }
 0x683   :  { %2536 = vmatpush1.bf16.msra.mxu1 %v5560_v7  ;;  %3500 = vmatpush3.bf16.msra.mxu0 %v5105_v8  ;;  %v2408_v22 = vmul.f32 %v3811_v60, %v2407_v17  ;;  %v2424_v17 = vunpack.c.h.bf16 %v5449_v24 }
 0x684   :  { %2537 = vmatprep.subr.bf16.mxu1 %v5567_v35  ;;  %3501 = vmatprep.subr.bf16.mxu0 %v5819_v1 }
 0x685   :  { %v2410_v23 = vadd.f32 %v2409_v32, %v2408_v22  ;;  %v2432_v32 = vrot.slane %v2426_v37, 4  ;;  %v2654_v37 = vld [vmem:[#allocation2 + $0x90] sm:$0xf0] }
 0x687   :  { %2538 = vmatpush1.bf16.msra.mxu1 %v5577_v19  ;;  %3502 = vmatpush3.bf16.msra.mxu0 %v5119_v62  ;;  %v5584_v8 = vsel %vm1688_vm15, %v2410_v23, %v5325_v29  ;;  %v2416_v0 = vsel %vm1688_vm15, %v2410_v23, 0.0  ;;  %v3930_v62 = vld [vmem:[%s5762_s3 + $0x8] ss:$12 sps:$4 sm:$0xff]   ;;  %v3931_v29 = vld [vmem:[%s5762_s3 + $0x20] ss:$12 sps:$4 sm:$0xff]   ;;  %v2437_v23 = vunpack.c.l.bf16 %v2431_v15 }
 0x688   :  { %v2522_v9 = vpack.c.bf16 %v5584_v8, %v5584_v8  ;;  %v2906_v61 = vadd.f32 %v2416_v0, %v1696_v55  ;;  %2676 = vmatprep.subr.bf16.mxu1 %v5334_v6  ;;  %3507 = vmatprep.subr.bf16.mxu0 %v5819_v1  ;;  %v3932_v6 = vld [vmem:[%s5762_s3 + $0x38] ss:$12 sps:$4 sm:$0xff]  }
 0x68a   :  { %2556 = vmatmul.mubr.bf16.vlgmr.msra.gmra.mrb[68].mxu1 %v2522_v9  ;;  %2914 = vst [vmem:[%s5766_s6 + $0x10] sm:$0xff] %v2906_v61  ;;  %3504 = vmatmul.mubr.bf16.vlgmr.msra.gmra.mrb[84].mxu0 %v2522_v9  ;;  %v2438_v61 = vunpack.c.l.bf16 %v2432_v32 }
 0x68b   :  { %2677 = vmatpush1.bf16.msra.mxu1 %v5344_v18  ;;  %3508 = vmatpush3.bf16.msra.mxu0 %v3930_v62  ;;  %v3933_v18 = vld [vmem:[%s5762_s3 + $0x50] ss:$12 sps:$4 sm:$0xff]  }
 0x68c   :  { %2678 = vmatprep.subr.bf16.mxu1 %v5351_v38  ;;  %3509 = vmatprep.subr.bf16.mxu0 %v5819_v1  ;;  %v3934_v38 = vld [vmem:[%s5762_s3 + $0x68] ss:$12 sps:$4 sm:$0xff]  }
 0x68d   :  { %2708 = vmatprep.mubr.bf16.mxu1 %v5820_v31  ;;  %3523 = vmatprep.mubr.msk.bf16.mxu0 %vm3950_vm4, %v5819_v1 }
 0x68f   :  { %2679 = vmatpush1.bf16.msra.mxu1 %v5361_v27  ;;  %3510 = vmatpush3.bf16.msra.mxu0 %v3931_v29  ;;  %v3935_v27 = vld [vmem:[%s5762_s3 + $0x80] ss:$12 sps:$4 sm:$0xff]  }
 0x690   :  { %2680 = vmatprep.subr.bf16.mxu1 %v5368_v54  ;;  %3511 = vmatprep.subr.bf16.mxu0 %v5819_v1  ;;  %v3936_v54 = vld [vmem:[%s5762_s3 + $0x98] ss:$12 sps:$4 sm:$0xff]  }
 0x693   :  { %2681 = vmatpush1.bf16.msra.mxu1 %v5375_v50  ;;  %3512 = vmatpush3.bf16.msra.mxu0 %v3932_v6  ;;  %v3937_v50 = vld [vmem:[%s5762_s3 + $0xa8] ss:$12 sps:$4 sm:$0xff]  }
 0x694   :  { %2682 = vmatprep.subr.bf16.mxu1 %v5382_v43  ;;  %3513 = vmatprep.subr.bf16.mxu0 %v5819_v1  ;;  %v3938_v43 = vld [vmem:[%s5762_s3 + $0xb0] ss:$12 sps:$4 sm:$0xff]  }
 0x697   :  { %2683 = vmatpush1.bf16.msra.mxu1 %v5389_v56  ;;  %3514 = vmatpush3.bf16.msra.mxu0 %v3933_v18  ;;  %v3939_v56 = vld [vmem:[%s5763_s4 + $0x4] ss:$12 sps:$4 sm:$0xff]  }
 0x698   :  { %2684 = vmatprep.subr.bf16.mxu1 %v5396_v44  ;;  %3515 = vmatprep.subr.bf16.mxu0 %v5819_v1  ;;  %v2419_v44 = vld [vmem:[#allocation2 + $0x90] ss:$8 sps:$4 sm:$0xff]  }
 0x699   :  { %v2423_v42 = vunpack.c.h.bf16 %v2419_v44 }
 0x69b   :  { %2685 = vmatpush1.bf16.msra.mxu1 %v5403_v3  ;;  %3516 = vmatpush3.bf16.msra.mxu0 %v3934_v38  ;;  %v2422_v3 = vunpack.c.l.bf16 %v2419_v44 }
 0x69c   :  { %2686 = vmatprep.subr.bf16.mxu1 %v5410_v46  ;;  %3517 = vmatprep.subr.bf16.mxu0 %v5819_v1 }
 0x69f   :  { %2687 = vmatpush1.bf16.msra.mxu1 %v5417_v47  ;;  %3518 = vmatpush3.bf16.msra.mxu0 %v3935_v27 }
 0x6a0   :  { %2688 = vmatprep.subr.bf16.mxu1 %v5424_v5  ;;  %3519 = vmatprep.subr.bf16.mxu0 %v5819_v1 }
 0x6a3   :  { %2689 = vmatpush1.bf16.msra.mxu1 %v5431_v40  ;;  %3520 = vmatpush3.bf16.msra.mxu0 %v3936_v54 }
 0x6a4   :  { %2690 = vmatprep.subr.bf16.mxu1 %v5438_v33  ;;  %3521 = vmatprep.subr.bf16.mxu0 %v5819_v1 }
 0x6a7   :  { %2691 = vmatpush1.bf16.msra.mxu1 %v3937_v50  ;;  %3522 = vmatpush3.bf16.msra.mxu0 %v3938_v43 }
 0x6a8   :  { %2758 = vmatprep.subr.bf16.mxu1 %v3939_v56  ;;  %3527 = vmatprep.subr.bf16.mxu0 %v5819_v1 }
 0x73d   :  { %v2475_v46 = vpop.f32.mrb[64].mxu1  ;;  %v2516_v47 = vpop.f32.mrb[80].mxu0 }
 0x73e   :  { %v2604_v5 = vadd.f32 %v2475_v46, %v2422_v3  ;;  %v2477_v40 = vpop.f32.mrb[65].mxu1  ;;  %v3485_v33 = vpop.f32.mrb[81].mxu0 }
 0x73f   :  { %v2479_v11 = vpop.f32.mrb[66].mxu1  ;;  %v2519_v30 = vpop.f32.mrb[82].mxu0  ;;  %v2611_v49 = vadd.f32 %v2477_v40, %v2423_v42 }
 0x740   :  { %v3072_v58 = vmul.f32 -1.442695, %v2604_v5  ;;  %v2480_v16 = vpop.f32.mrb[67].mxu1  ;;  %v3486_v14 = vpop.f32.mrb[83].mxu0 }
 0x741   :  { %v3073_v57 = vmul.f32 -1.442695, %v2611_v49  ;;  %v2427_v14 = vld [vmem:[#allocation2 + $0x28] sm:$0xf0] }
 0x742   :  { %3812 = vpow2.f32 %v3072_v58  ;;  %v2433_v49 = vrot.slane %v2427_v14, 4 }
 0x743   :  { %3814 = vpow2.f32 %v3073_v57 }
 0x74c   :  { %v3813_v20 = vpop.eup %3812 }
 0x74d   :  { %v2608_v10 = vadd.f32 1.0, %v3813_v20  ;;  %v3815_v51 = vpop.eup %3814 }
 0x74e   :  { %v2615_v25 = vadd.f32 1.0, %v3815_v51 }
 0x74f   :  { %3816 = vrcp.f32 %v2608_v10 }
 0x750   :  { %3818 = vrcp.f32 %v2615_v25 }
 0x759   :  { %v3817_v63 = vpop.eup %3816 }
 0x75a   :  { %v2618_v60 = vmul.f32 %v3817_v63, %v2516_v47  ;;  %v3819_v24 = vpop.eup %3818  ;;  %v5837_v47 = vld [vmem:[#allocation13_spill] sm:$0xff]  ;;  %v2655_v63 = vld [vmem:[#allocation2 + $0x98] sm:$0xf0] }
 0x75b   :  { %v2621_v50 = vsub.f32 1.0, %v3819_v24  ;;  %v2623_v56 = vmul.f32 %v3819_v24, %v5459_v52  ;;  %v1452_v40 = vsel %vm1447_vm14, %v5837_v47, 0.0 }
 0x75c   :  { %v2619_v22 = vadd.f32 %v2618_v60, %v2424_v17  ;;  %v2661_v17 = vrot.slane %v2655_v63, 4 }
 0x75d   :  { %v2557_v36 = vpop.f32.mrb[68].mxu1  ;;  %v2598_v2 = vpop.f32.mrb[84].mxu0 }
 0x75e   :  { %3820 = vtanh.f32 %v2619_v22  ;;  %v2625_v55 = vadd.f32 %v2557_v36, %v2437_v23  ;;  %v2559_v0 = vpop.f32.mrb[69].mxu1  ;;  %v3505_v9 = vpop.f32.mrb[85].mxu0 }
 0x75f   :  { %v2561_v62 = vpop.f32.mrb[70].mxu1  ;;  %v2601_v29 = vpop.f32.mrb[86].mxu0  ;;  %v2632_v27 = vadd.f32 %v2559_v0, %v2438_v61 }
 0x760   :  { %v3074_v6 = vmul.f32 -1.442695, %v2625_v55  ;;  %v2562_v18 = vpop.f32.mrb[71].mxu1  ;;  %v3506_v38 = vpop.f32.mrb[87].mxu0  ;;  %v2667_v55 = vunpack.c.l.bf16 %v2661_v17 }
 0x761   :  { %v3075_v54 = vmul.f32 -1.442695, %v2632_v27 }
 0x762   :  { %3822 = vpow2.f32 %v3074_v6 }
 0x763   :  { %3824 = vpow2.f32 %v3075_v54  ;;  %v2656_v54 = vld [vmem:[#allocation2 + $0xa0] sm:$0xf0] }
 0x768   :  { %v3821_v43 = vpop.eup %3820 }
 0x769   :  { %v2622_v44 = vmul.f32 %v3821_v43, %v2621_v50  ;;  %v2662_v50 = vrot.slane %v2656_v54, 4 }
 0x76b   :  { %v2624_v3 = vadd.f32 %v2623_v56, %v2622_v44  ;;  %v2669_v44 = vld [vmem:[#allocation2 + $0x18] ss:$16 sps:$4 sm:$0xff]  }
 0x76c   :  { %v3823_v46 = vpop.eup %3822  ;;  %v2672_v5 = vunpack.c.l.bf16 %v2669_v44 }
 0x76d   :  { %v2629_v33 = vadd.f32 1.0, %v3823_v46  ;;  %v5658_v42 = vsel %vm1447_vm14, %v2624_v3, %v5459_v52  ;;  %v2648_v11 = vsel %vm1447_vm14, %v2624_v3, 0.0  ;;  %v3940_v52 = vld [vmem:[%s5763_s4 + $0x8] ss:$12 sps:$4 sm:$0xff]   ;;  %v3825_v16 = vpop.eup %3824  ;;  %v2668_v3 = vunpack.c.l.bf16 %v2662_v50 }
 0x76e   :  { %v2675_v30 = vpack.c.bf16 %v5658_v42, %v5658_v42  ;;  %v2910_v58 = vadd.f32 %v2648_v11, %v1452_v40  ;;  %v2636_v57 = vadd.f32 1.0, %v3825_v16  ;;  %v2670_v40 = vld [vmem:[#allocation2 + $0x20] sm:$0xf] }
 0x76f   :  { %3826 = vrcp.f32 %v2629_v33  ;;  %v2673_v16 = vunpack.c.l.bf16 %v2670_v40 }
 0x770   :  { %2709 = vmatmul.mubr.bf16.vlgmr.msra.gmra.mrb[72].mxu1 %v2675_v30  ;;  %2918 = vst [vmem:[%s5766_s6 + $0x30] sm:$0xff] %v2910_v58  ;;  %3524 = vmatmul.mubr.bf16.vlgmr.msra.gmra.mrb[88].mxu0 %v2675_v30  ;;  %3828 = vrcp.f32 %v2636_v57 }
 0x771   :  { %2759 = vmatpush1.bf16.msra.mxu1 %v5471_v26  ;;  %3528 = vmatpush3.bf16.msra.mxu0 %v3940_v52  ;;  %v3941_v26 = vld [vmem:[%s5763_s4 + $0x20] ss:$12 sps:$4 sm:$0xff]  }
 0x772   :  { %2760 = vmatprep.subr.bf16.mxu1 %v5478_v53  ;;  %3529 = vmatprep.subr.bf16.mxu0 %v5819_v1 }
 0x773   :  { %2790 = vmatprep.mubr.bf16.mxu1 %v5820_v31  ;;  %3543 = vmatprep.mubr.msk.bf16.mxu0 %vm3950_vm4, %v5819_v1  ;;  %v3942_v31 = vld [vmem:[%s5763_s4 + $0x38] ss:$12 sps:$4 sm:$0xff]  }
 0x775   :  { %2761 = vmatpush1.bf16.msra.mxu1 %v5488_v45  ;;  %3530 = vmatpush3.bf16.msra.mxu0 %v3941_v26  ;;  %v2439_v45 = vunpack.c.l.bf16 %v2433_v49 }
 0x776   :  { %2762 = vmatprep.subr.bf16.mxu1 %v5495_v12  ;;  %3531 = vmatprep.subr.bf16.mxu0 %v5819_v1  ;;  %v3943_v12 = vld [vmem:[%s5763_s4 + $0x50] ss:$12 sps:$4 sm:$0xff]  }
 0x779   :  { %v3827_v53 = vpop.eup %3826  ;;  %2763 = vmatpush1.bf16.msra.mxu1 %v5502_v13  ;;  %3532 = vmatpush3.bf16.msra.mxu0 %v3942_v31  ;;  %v3944_v13 = vld [vmem:[%s5763_s4 + $0x68] ss:$12 sps:$4 sm:$0xff]  }
 0x77a   :  { %v2639_v20 = vmul.f32 %v3827_v53, %v2598_v2  ;;  %2764 = vmatprep.subr.bf16.mxu1 %v5510_v34  ;;  %3533 = vmatprep.subr.bf16.mxu0 %v5819_v1  ;;  %v3829_v34 = vpop.eup %3828 }
 0x77b   :  { %v2644_v51 = vmul.f32 %v3829_v34, %v5584_v8 }
 0x77c   :  { %v2640_v10 = vadd.f32 %v2639_v20, %v2439_v45 }
 0x77d   :  { %2765 = vmatpush1.bf16.msra.mxu1 %v5517_v39  ;;  %3534 = vmatpush3.bf16.msra.mxu0 %v3943_v12  ;;  %v3945_v39 = vld [vmem:[%s5763_s4 + $0x80] ss:$12 sps:$4 sm:$0xff]  }
 0x77e   :  { %3830 = vtanh.f32 %v2640_v10  ;;  %2766 = vmatprep.subr.bf16.mxu1 %v5524_v48  ;;  %3535 = vmatprep.subr.bf16.mxu0 %v5819_v1  ;;  %v2642_v48 = vsub.f32 1.0, %v3829_v34 }
 0x781   :  { %2767 = vmatpush1.bf16.msra.mxu1 %v5531_v4  ;;  %3536 = vmatpush3.bf16.msra.mxu0 %v3944_v13 }
 0x782   :  { %2768 = vmatprep.subr.bf16.mxu1 %v5538_v28  ;;  %3537 = vmatprep.subr.bf16.mxu0 %v5819_v1  ;;  %v3946_v28 = vld [vmem:[%s5763_s4 + $0x98] ss:$12 sps:$4 sm:$0xff]  }
 0x785   :  { %2769 = vmatpush1.bf16.msra.mxu1 %v5545_v41  ;;  %3538 = vmatpush3.bf16.msra.mxu0 %v3945_v39 }
 0x786   :  { %2770 = vmatprep.subr.bf16.mxu1 %v5552_v21  ;;  %3539 = vmatprep.subr.bf16.mxu0 %v5819_v1  ;;  %v3947_v21 = vld [vmem:[%s5763_s4 + $0xb0] ss:$12 sps:$4 sm:$0xff]  }
 0x788   :  { %v3831_v4 = vpop.eup %3830 }
 0x789   :  { %2771 = vmatpush1.bf16.msra.mxu1 %v5560_v7  ;;  %3540 = vmatpush3.bf16.msra.mxu0 %v3946_v28  ;;  %v2643_v41 = vmul.f32 %v3831_v4, %v2642_v48 }
 0x78a   :  { %2772 = vmatprep.subr.bf16.mxu1 %v5567_v35  ;;  %3541 = vmatprep.subr.bf16.mxu0 %v5819_v1  ;;  %v2889_v1 = vld [vmem:[%s5766_s6 + $0x8] sm:$0xff] }
 0x78b   :  { %v2645_v59 = vadd.f32 %v2644_v51, %v2643_v41 }
 0x78d   :  { %2773 = vmatpush1.bf16.msra.mxu1 %v5577_v19  ;;  %3542 = vmatpush3.bf16.msra.mxu0 %v3947_v21  ;;  %v5720_v25 = vsel %vm1441_vm13, %v2645_v59, %v5584_v8  ;;  %v2651_v15 = vsel %vm1441_vm13, %v2645_v59, 0.0  ;;  %v2660_v8 = vrot.slane %v2654_v37, 4  ;;  %v5841_v59 = vld [vmem:[#allocation11_spill] sm:$0xff] }
 0x78e   :  { %v2757_v35 = vpack.c.bf16 %v5720_v25, %v5720_v25  ;;  %v2905_v19 = vadd.f32 %v2889_v1, %v2651_v15 }
 0x78f   :  { %v2666_v60 = vunpack.c.l.bf16 %v2660_v8 }
 0x790   :  { %2791 = vmatmul.mubr.bf16.vlgmr.msra.gmra.mrb[76].mxu1 %v2757_v35  ;;  %2913 = vst [vmem:[%s5766_s6 + $0x8] sm:$0xff] %v2905_v19  ;;  %3544 = vmatmul.mubr.bf16.vlgmr.msra.gmra.mrb[92].mxu0 %v2757_v35  ;;  %v2674_v35 = vunpack.c.h.bf16 %v2669_v44 }
 0x843   :  { %v2710_v32 = vpop.f32.mrb[72].mxu1  ;;  %v2751_v22 = vpop.f32.mrb[88].mxu0 }
 0x844   :  { %v2839_v23 = vadd.f32 %v2710_v32, %v2666_v60  ;;  %v2712_v36 = vpop.f32.mrb[73].mxu1  ;;  %v3525_v2 = vpop.f32.mrb[89].mxu0 }
 0x845   :  { %v2714_v0 = vpop.f32.mrb[74].mxu1  ;;  %v2754_v9 = vpop.f32.mrb[90].mxu0  ;;  %v2846_v6 = vadd.f32 %v2712_v36, %v2667_v55  ;;  %v2888_v2 = vld [vmem:[%s5766_s6] sm:$0xff] }
 0x846   :  { %v3077_v61 = vmul.f32 -1.442695, %v2839_v23  ;;  %v2715_v62 = vpop.f32.mrb[75].mxu1  ;;  %v3526_v29 = vpop.f32.mrb[91].mxu0 }
 0x847   :  { %v3078_v18 = vmul.f32 -1.442695, %v2846_v6 }
 0x848   :  { %3832 = vpow2.f32 %v3077_v61 }
 0x849   :  { %3834 = vpow2.f32 %v3078_v18 }
 0x852   :  { %v3833_v38 = vpop.eup %3832 }
 0x853   :  { %v2843_v27 = vadd.f32 1.0, %v3833_v38  ;;  %v3835_v24 = vpop.eup %3834 }
 0x854   :  { %v2850_v43 = vadd.f32 1.0, %v3835_v24 }
 0x855   :  { %3836 = vrcp.f32 %v2843_v27 }
 0x856   :  { %3838 = vrcp.f32 %v2850_v43 }
 0x85f   :  { %v3837_v56 = vpop.eup %3836 }
 0x860   :  { %v2853_v46 = vmul.f32 %v3837_v56, %v2751_v22  ;;  %v3839_v45 = vpop.eup %3838 }
 0x861   :  { %v2856_v10 = vsub.f32 1.0, %v3839_v45  ;;  %v2858_v34 = vmul.f32 %v3839_v45, %v5658_v42 }
 0x862   :  { %v2854_v47 = vadd.f32 %v2853_v46, %v2668_v3 }
 0x863   :  { %v2792_v33 = vpop.f32.mrb[76].mxu1  ;;  %v2833_v11 = vpop.f32.mrb[92].mxu0 }
 0x864   :  { %3840 = vtanh.f32 %v2854_v47  ;;  %v2860_v30 = vadd.f32 %v2792_v33, %v2672_v5  ;;  %v2794_v58 = vpop.f32.mrb[77].mxu1  ;;  %v3545_v52 = vpop.f32.mrb[93].mxu0 }
 0x865   :  { %v2796_v14 = vpop.f32.mrb[78].mxu1  ;;  %v2836_v26 = vpop.f32.mrb[94].mxu0  ;;  %v2867_v31 = vadd.f32 %v2794_v58, %v2673_v16 }
 0x866   :  { %v3079_v49 = vmul.f32 -1.442695, %v2860_v30  ;;  %v2797_v57 = vpop.f32.mrb[79].mxu1  ;;  %v3546_v53 = vpop.f32.mrb[95].mxu0 }
 0x867   :  { %v3080_v20 = vmul.f32 -1.442695, %v2867_v31 }
 0x868   :  { %3842 = vpow2.f32 %v3079_v49 }
 0x869   :  { %3844 = vpow2.f32 %v3080_v20 }
 0x86e   :  { %v3841_v12 = vpop.eup %3840 }
 0x86f   :  { %v2857_v13 = vmul.f32 %v3841_v12, %v2856_v10 }
 0x871   :  { %v2859_v39 = vadd.f32 %v2858_v34, %v2857_v13 }
 0x872   :  { %v3843_v48 = vpop.eup %3842 }
 0x873   :  { %v2881_v51 = vsel %vm1203_vm11, %v2859_v39, %v5658_v42  ;;  %v2883_v28 = vsel %vm1203_vm11, %v2859_v39, 0.0  ;;  %v2864_v41 = vadd.f32 1.0, %v3843_v48  ;;  %v3845_v7 = vpop.eup %3844 }
 0x874   :  { %v2911_v21 = vadd.f32 %v2883_v28, %v5841_v59  ;;  %2920 = vst [vmem:[%s5767_s7] sm:$0xff] %v2881_v51  ;;  %v2871_v15 = vadd.f32 1.0, %v3845_v7 }
 0x875   :  { %3846 = vrcp.f32 %v2864_v41 }
 0x876   :  { %2919 = vst [vmem:[%s5766_s6 + $0x38] sm:$0xff] %v2911_v21  ;;  %3848 = vrcp.f32 %v2871_v15 }
 0x87f   :  { %v3847_v1 = vpop.eup %3846 }
 0x880   :  { %v2874_v42 = vmul.f32 %v3847_v1, %v2833_v11  ;;  %v3849_v37 = vpop.eup %3848 }
 0x881   :  { %v2877_v8 = vsub.f32 1.0, %v3849_v37  ;;  %v2879_v60 = vmul.f32 %v3849_v37, %v5720_v25 }
 0x882   :  { %v2875_v19 = vadd.f32 %v2874_v42, %v2674_v35 }
 0x884   :  { %3850 = vtanh.f32 %v2875_v19 }
 0x88e   :  { %v3851_v63 = vpop.eup %3850 }
 0x88f   :  { %v2878_v17 = vmul.f32 %v3851_v63, %v2877_v8 }
 0x891   :  { %v2880_v32 = vadd.f32 %v2879_v60, %v2878_v17 }
 0x893   :  { %v2882_v23 = vsel %vm1197_vm9, %v2880_v32, %v5720_v25  ;;  %v2886_v36 = vsel %vm1197_vm9, %v2880_v32, 0.0 }
 0x894   :  { %v2904_v55 = vadd.f32 %v2888_v2, %v2886_v36  ;;  %3082 = vst [vmem:[%s5767_s7 + $0x8] sm:$0xff] %v2882_v23 }
 0x896   :  { %2912 = vst [vmem:[%s5766_s6] sm:$0xff] %v2904_v55 }

</bundles_post_ra>
